<compile_context>
chip_gen: v5e
topology: v5e:2x2
jax: 0.10.0
libtpu: 0.0.40
codegen_flags: <defaults>
</compile_context>

<pallas_src>
import functools

import numpy as np
import jax
import jax.numpy as jnp
from jax import lax
from jax.experimental import pallas as pl
from jax.experimental.pallas import tpu as pltpu

_LANE = 128           # lane granularity (last-dim tiles padded to multiples of this)
_ROWS_TARGET = 256    # target MXU LHS rows per grid step (fills v6e/v7x 256x256 MXU;
                      # two pushes on v5e's 128x128 MXU — still fine)
_T_TILE_MAX = 512     # snapshot (reduction) tile for the covariance pipeline
_G_TILE_MAX = 512     # scan-grid tile for the spectrum kernel (bounds VMEM on v7x and
                      # provides a second 'parallel' grid axis for its 2 TensorCores)


def _pad_to(n, mult):
    return ((n + mult - 1) // mult) * mult


def _pick_tile(n, max_tile):
    """Pick a lane-aligned tile and padded extent: tile % 128 == 0 and tile | padded."""
    p = _pad_to(n, _LANE)
    if p <= max_tile:
        return p, p
    return max_tile, _pad_to(n, max_tile)


def _pick_batch_block(two_m):
    """Batch elements per grid step: bb*2M ~ _ROWS_TARGET, bb a multiple of 8
    (sublane alignment for the [bb, G_tile] spectrum output block)."""
    bb = max(1, _ROWS_TARGET // two_m)
    return _pad_to(bb, 8)


# ----------------------------------------------------------------------------
# Pallas kernel 1: flattened, T-tiled covariance Gram.
#   x block : [rows, TT] f32   rows = bb*2M stacked [Re;Im] antenna rows of bb
#                              batch elements, TT = snapshot tile.
#   S block : [rows, rows] f32 full Gram (lane-dense, unmasked vst); per-batch
#                              2Mx2M covariances are its diagonal sub-blocks.
# The output block index is constant along the T axis, so it stays resident in
# VMEM and is used directly as the f32 accumulator (init via pl.when at k==0).
# ----------------------------------------------------------------------------
def _cov_kernel(x_ref, s_ref):
    k = pl.program_id(1)

    @pl.when(k == 0)
    def _():
        s_ref[...] = jnp.zeros_like(s_ref)

    xf = x_ref[...]                                            # [rows, TT]
    s_ref[...] += lax.dot_general(                             # Xf @ Xf^T on the MXU
        xf, xf, dimension_numbers=(((1,), (1,)), ((), ())),
        precision=lax.Precision.HIGHEST,
        preferred_element_type=jnp.float32)


def _covariance_gram(xs2_flat, rows, t_tile):
    rtot, t_pad = xs2_flat.shape
    nb = rtot // rows
    kt = t_pad // t_tile
    cost = pl.CostEstimate(
        flops=2 * rtot * rows * t_pad,
        transcendentals=0,
        bytes_accessed=4 * (rtot * t_pad + rtot * rows))
    return pl.pallas_call(
        _cov_kernel,
        out_shape=jax.ShapeDtypeStruct((rtot, rows), jnp.float32),
        grid=(nb, kt),
        in_specs=[pl.BlockSpec((rows, t_tile), lambda i, k: (i, k))],
        out_specs=pl.BlockSpec((rows, rows), lambda i, k: (i, 0)),
        compiler_params=pltpu.CompilerParams(
            dimension_semantics=("parallel", "arbitrary")),
        cost_estimate=cost,
    )(xs2_flat)


# ----------------------------------------------------------------------------
# Pallas kernel 2: MUSIC spectrum, one fused f32 matmul per (batch-block, G-tile).
#   pq block : [bb*2M, 2M] f32  (per batch element: [[p, q], [-q, p]],
#              p = Re(En)^T, q = Im(En)^T) — kept in f32: MUSIC peaks come from
#              near-cancellation of En^H a, bf16 input rounding flattens them.
#   aa block : [2M, TG] f32     (constant [Ar; Ai] slab, G-tiled)
#   spec     : [bb, TG] f32     lane-dense output
# Rows of (pq @ aa) within a batch element are [cr; ci], so the per-element sum
# of squares over its 2M rows is exactly sum_k |C_kg|^2.
# ----------------------------------------------------------------------------
def _spec_kernel(pq_ref, aa_ref, spec_ref, *, bb, two_m):
    pq = pq_ref[...]                                           # [bb*2M, 2M]
    aa = aa_ref[...]                                           # [2M, TG]
    c = jnp.dot(pq, aa, precision=lax.Precision.HIGHEST,
                preferred_element_type=jnp.float32)            # [bb*2M, TG]
    denom = jnp.sum((c * c).reshape(bb, two_m, -1), axis=1)    # [bb, TG]
    denom = jnp.maximum(denom, 1e-20)                          # guard k == M / padding
    spec_ref[...] = pl.reciprocal(denom, approx=False)         # exact: callers may
    #                                                            compare peak heights


def _spectrum(pq_flat, aa_pad, bb, two_m, g_tile):
    rows = bb * two_m
    rtot = pq_flat.shape[0]
    nb = rtot // rows
    g_pad = aa_pad.shape[1]
    ng = g_pad // g_tile
    b_pad = nb * bb
    cost = pl.CostEstimate(
        flops=2 * rtot * two_m * g_pad + 2 * rtot * g_pad,
        transcendentals=b_pad * g_pad,
        bytes_accessed=4 * (rtot * two_m + two_m * g_pad + b_pad * g_pad))
    kern = functools.partial(_spec_kernel, bb=bb, two_m=two_m)
    return pl.pallas_call(
        kern,
        out_shape=jax.ShapeDtypeStruct((b_pad, g_pad), jnp.float32),
        grid=(nb, ng),
        in_specs=[pl.BlockSpec((rows, two_m), lambda i, j: (i, 0)),
                  pl.BlockSpec((two_m, g_tile), lambda i, j: (0, j))],
        out_specs=pl.BlockSpec((bb, g_tile), lambda i, j: (i, j)),
        compiler_params=pltpu.CompilerParams(
            dimension_semantics=("parallel", "parallel")),
        cost_estimate=cost,
    )(pq_flat, aa_pad)


def _build_aa(steering_mat, g):
    """Padded f32 [Ar; Ai] slab, [2M, g_pad]."""
    _, g_pad = _pick_tile(g, _G_TILE_MAX)
    ar = jnp.real(steering_mat).astype(jnp.float32)
    ai = jnp.imag(steering_mat).astype(jnp.float32)
    aa = jnp.concatenate([ar, ai], axis=0)
    return jnp.pad(aa, ((0, 0), (0, g_pad - g)))


# ----------------------------------------------------------------------------
# music_spectrum: covariance (Pallas) -> eigh (JAX, unpadded batch) -> spectrum (Pallas)
# ----------------------------------------------------------------------------
@functools.partial(jax.jit, static_argnums=(3,))
def _music_spectrum_impl(x, num_signal_source, aa_pad, g):
    b, m = x.shape[0], x.shape[1]
    two_m = 2 * m
    xs = x.reshape(b, m, -1)
    t = xs.shape[-1]

    bb = _pick_batch_block(two_m)
    rows = bb * two_m
    b_pad = _pad_to(b, bb)
    t_tile, t_pad = _pick_tile(t, _T_TILE_MAX)

    # stacked re/im planes, batch padded (zeros) and snapshots lane-padded
    xr = jnp.real(xs).astype(jnp.float32)
    xi = jnp.imag(xs).astype(jnp.float32)
    xs2 = jnp.concatenate([xr, xi], axis=1)                               # [b, 2M, T]
    xs2 = jnp.pad(xs2, ((0, b_pad - b), (0, 0), (0, t_pad - t)))
    xs2_flat = xs2.reshape(b_pad * two_m, t_pad)

    s_full = _covariance_gram(xs2_flat, rows, t_tile)                     # [b_pad*2M, rows]

    # extract per-batch diagonal 2Mx2M Gram blocks, slice off padded batch rows,
    # and do the /T scaling + complex assembly in XLA glue (keeps the Pallas
    # output lane-dense and the eigh on only the real batch rows).
    nb = b_pad // bb
    s_blocks = s_full.reshape(nb, bb, two_m, bb, two_m)
    s_diag = jnp.diagonal(s_blocks, axis1=1, axis2=3)                     # [nb, 2M, 2M, bb]
    s_diag = jnp.moveaxis(s_diag, -1, 1).reshape(b_pad, two_m, two_m)[:b]

    inv_t = 1.0 / float(t)
    rr = (s_diag[:, :m, :m] + s_diag[:, m:, m:]) * inv_t                  # Re(R)
    ri = (s_diag[:, m:, :m] - s_diag[:, :m, m:]) * inv_t                  # Im(R)
    r = (rr + 1j * ri).astype(jnp.complex64)

    # TODO(synk): complex Hermitian eigendecomposition has no Pallas equivalent;
    # done with jnp.linalg.eigh (eigenvalues ascending, columns are eigenvectors).
    _, eigvecs = jnp.linalg.eigh(r)                                       # [b, M, M]

    k = jnp.asarray(num_signal_source, dtype=jnp.int32).reshape(-1)[:b]
    col = jnp.arange(m, dtype=jnp.int32)[None, :]
    noise_mask = (col < (m - k[:, None])).astype(jnp.float32)             # [b, M]
    en = eigvecs * noise_mask[:, None, :].astype(eigvecs.dtype)           # masked noise subspace

    # build [[p, q], [-q, p]] per batch element so that (PQ @ [Ar; Ai]) = [cr; ci]
    p = jnp.swapaxes(jnp.real(en).astype(jnp.float32), 1, 2)              # Re(En)^T
    q = jnp.swapaxes(jnp.imag(en).astype(jnp.float32), 1, 2)              # Im(En)^T
    pq = jnp.concatenate(
        [jnp.concatenate([p, q], axis=-1),
         jnp.concatenate([-q, p], axis=-1)], axis=1)                      # [b, 2M, 2M]
    pq = jnp.pad(pq, ((0, b_pad - b), (0, 0), (0, 0)))                    # f32, no bf16 cast
    pq_flat = pq.reshape(b_pad * two_m, two_m)

    g_tile, _ = _pick_tile(g, _G_TILE_MAX)
    spec = _spectrum(pq_flat, aa_pad, bb, two_m, g_tile)                  # [b_pad, g_pad]
    return spec[:b, :g]


def music_spectrum(x, num_signal_source, steering_mat):
    """Reference-compatible entry point."""
    steering_mat = jnp.asarray(steering_mat)
    g = int(steering_mat.shape[1])
    aa_pad = _build_aa(steering_mat, g)
    k = jnp.asarray(num_signal_source, dtype=jnp.int32)
    return _music_spectrum_impl(jnp.asarray(x), k, aa_pad, g)


# ----------------------------------------------------------------------------
# On-device peak picking: local maxima via shifted compares + lax.top_k, angle
# gather fused into the same jit; k_max is a fixed (per-estimator) static so it
# never recompiles when num_signal_source changes.
# TODO(synk): strict '>' drops exact plateau peaks (two equal adjacent samples);
#             verify against the reference find_peaks semantics if that matters.
# ----------------------------------------------------------------------------
@functools.partial(jax.jit, static_argnums=(2,))
def _find_peaks_topk(spectrum, scan_grid, k_max):
    s = spectrum
    mid = s[:, 1:-1]
    is_peak = (mid > s[:, :-2]) & (mid > s[:, 2:])
    vals = jnp.where(is_peak, mid, -jnp.inf)
    top_vals, top_idx = lax.top_k(vals, k_max)            # descending by peak height
    n_valid = jnp.sum(jnp.isfinite(top_vals), axis=1).astype(jnp.int32)
    peak_angles = scan_grid[top_idx + 1]
    return peak_angles, n_valid


# ----------------------------------------------------------------------------
# Minimal ULA + estimator mirroring the PyTorch module API
# ----------------------------------------------------------------------------
class UniformLinearArray:
    def __init__(self, num_antennas, spacing_wavelengths=0.5):
        self.num_antennas = int(num_antennas)
        self.spacing_wavelengths = float(spacing_wavelengths)

    def steering_matrix(self, scan_grid, axis=1):
        # a_m(theta) = exp(-j * 2*pi * d/lambda * m * sin(theta)), shape [M, G]
        m_idx = jnp.arange(self.num_antennas, dtype=jnp.float32)
        phase = (2.0 * jnp.pi * self.spacing_wavelengths
                 * m_idx[:, None] * jnp.sin(jnp.asarray(scan_grid))[None, :])
        a = jnp.exp(-1j * phase.astype(jnp.complex64))
        return a if axis == 1 else a.T


class MUSICAoAEstimator1D:
    def __init__(self, antenna_array, scan_grid):
        assert isinstance(antenna_array, UniformLinearArray)
        sg = jnp.asarray(scan_grid, dtype=jnp.float32)
        assert sg.ndim == 1
        # tolerance covers float32 rounding of +/- pi/2 endpoints
        tol = 1e-6
        assert float(jnp.max(sg)) <= np.pi / 2 + tol
        assert float(jnp.min(sg)) >= -np.pi / 2 - tol
        self.antenna_array = antenna_array
        self.scan_grid = sg
        self._g = int(sg.shape[0])
        # cache steering matrix + padded f32 [Ar; Ai] slab once (the reference
        # property rebuilds exp(-j*phase) every forward call).
        self._steering_mat = antenna_array.steering_matrix(sg, axis=1)
        self._aa_pad = _build_aa(self._steering_mat, self._g)
        # MUSIC supports at most M-1 sources; fixing k_max keeps peak-picking static.
        self._k_max = int(max(1, min(antenna_array.num_antennas, self._g - 2)))

    @property
    def steering_mat(self):
        return self._steering_mat

    def forward(self, x, num_signal_source):
        k_dev = jnp.asarray(num_signal_source, dtype=jnp.int32).reshape(-1)
        spectrum = _music_spectrum_impl(jnp.asarray(x), k_dev, self._aa_pad, self._g)

        peak_angles, n_valid = _find_peaks_topk(spectrum, self.scan_grid, self._k_max)
        # single small device->host transfer; per-batch list assembly on host
        pa_np, nv_np, k_np = jax.device_get((peak_angles, n_valid, k_dev))

        angs = []
        for i in range(spectrum.shape[0]):
            n = int(min(int(k_np[i]), int(nv_np[i])))
            angs.append(pa_np[i, :n])
        return angs, spectrum


# ----------------------------------------------------------------------------
# Demo / smoke test
# ----------------------------------------------------------------------------
if __name__ == "__main__":
    B, M, T, G = 2, 8, 64, 128

    ula = UniformLinearArray(num_antennas=M, spacing_wavelengths=0.5)
    scan_grid = jnp.linspace(-jnp.pi / 2, jnp.pi / 2, G)
    estimator = MUSICAoAEstimator1D(ula, scan_grid)

    key = jax.random.PRNGKey(0)
    k1, k2, k3, k4 = jax.random.split(key, 4)

    # synthetic signal: up to 2 sources per batch element through the true ULA + noise
    num_src = jnp.array([1, 2], dtype=jnp.int32)
    true_angles = jnp.array([[0.30, 0.00], [-0.50, 0.70]], dtype=jnp.float32)  # [B, 2]
    m_idx = jnp.arange(M, dtype=jnp.float32)
    a_true = jnp.exp(-1j * (jnp.pi * m_idx[None, :, None]
                            * jnp.sin(true_angles)[:, None, :]).astype(jnp.complex64))  # [B, M, 2]
    src_mask = (jnp.arange(2)[None, :] < num_src[:, None]).astype(jnp.complex64)        # [B, 2]
    sig = ((jax.random.normal(k1, (B, 2, T)) + 1j * jax.random.normal(k2, (B, 2, T)))
           / np.sqrt(2)).astype(jnp.complex64)
    noise = (0.05 * (jax.random.normal(k3, (B, M, T)) + 1j * jax.random.normal(k4, (B, M, T)))
             ).astype(jnp.complex64)
    x = jnp.einsum('bms,bst->bmt', a_true * src_mask[:, None, :], sig) + noise          # [B, M, T]

    angs, spectrum = estimator.forward(x, num_src)
    jax.block_until_ready(spectrum)

    assert spectrum.shape == (B, G)
    assert spectrum.dtype == jnp.float32
    assert len(angs) == B
    assert all(angs[i].shape[0] <= int(num_src[i]) for i in range(B))
    print("KERNEL_OK")
</pallas_src>

<mosaic_0001>
module attributes {stable_mosaic.version = 11 : i64} {
  func.func @_cov_kernel(%arg0: i32, %arg1: i32, %arg2: memref<256x128xf32, #tpu.memory_space<vmem>>, %arg3: memref<256x256xf32, #tpu.memory_space<vmem>>) attributes {dimension_semantics = [#tpu.dimension_semantics<parallel>, #tpu.dimension_semantics<arbitrary>], iteration_bounds = array<i64: 1, 1>, scalar_prefetch = 0 : i64, scratch_operands = 0 : i64, tpu.core_type = #tpu.core_type<tc>, window_params = [{transform_indices = @transform_0, window_bounds = array<i64: 256, 128>}, {transform_indices = @transform_1, window_bounds = array<i64: 256, 256>}]} {
    %c0_i32 = arith.constant 0 : i32
    %0 = arith.cmpi eq, %arg1, %c0_i32 : i32
    %1 = arith.extui %0 : i1 to i32
    %c0_i32_0 = arith.constant 0 : i32
    %2 = arith.cmpi ne, %1, %c0_i32_0 : i32
    scf.if %2 {
      %cst_6 = arith.constant 0.000000e+00 : f32
      %8 = vector.broadcast %cst_6 : f32 to vector<256x256xf32>
      %c0_7 = arith.constant 0 : index
      %c0_8 = arith.constant 0 : index
      %9 = vector.load %arg3[%c0_7, %c0_8] : memref<256x256xf32, #tpu.memory_space<vmem>>, vector<256x256xf32>
      tpu.vector_store %arg3[%c0_7, %c0_8], %8 {strides = array<i32>} : memref<256x256xf32, #tpu.memory_space<vmem>>, vector<256x256xf32>,
    } else {
    }
    %c0 = arith.constant 0 : index
    %c0_1 = arith.constant 0 : index
    %3 = vector.load %arg2[%c0, %c0_1] : memref<256x128xf32, #tpu.memory_space<vmem>>, vector<256x128xf32>
    %c0_2 = arith.constant 0 : index
    %c0_3 = arith.constant 0 : index
    %4 = vector.load %arg3[%c0_2, %c0_3] : memref<256x256xf32, #tpu.memory_space<vmem>>, vector<256x256xf32>
    %cst = arith.constant dense<0.000000e+00> : vector<256x256xf32>
    %5 = tpu.matmul %3, %3, %cst {dimension_numbers = #tpu.dot_dimension_numbers<[1], [1], [0], [0], [0, 0, 1, 0], [], []>, precision = #tpu.contract_precision<fp32>} : vector<256x128xf32>, vector<256x128xf32>, vector<256x256xf32> -> vector<256x256xf32>
    %6 = arith.addf %4, %5 : vector<256x256xf32>
    %c0_4 = arith.constant 0 : index
    %c0_5 = arith.constant 0 : index
    %7 = vector.load %arg3[%c0_4, %c0_5] : memref<256x256xf32, #tpu.memory_space<vmem>>, vector<256x256xf32>
    tpu.vector_store %arg3[%c0_4, %c0_5], %6 {strides = array<i32>} : memref<256x256xf32, #tpu.memory_space<vmem>>, vector<256x256xf32>,
    return
  }
  func.func @transform_0(%arg0: i32, %arg1: i32) -> (i32, i32) {
    %c0_i32 = arith.constant 0 : i32
    return %arg0, %arg1 : i32, i32
  }
  func.func @transform_1(%arg0: i32, %arg1: i32) -> (i32, i32) {
    %c0_i32 = arith.constant 0 : i32
    %c0_i32_0 = arith.constant 0 : i32
    return %arg0, %c0_i32 : i32, i32
  }
}

module attributes {stable_mosaic.version = 11 : i64} {
  func.func @_spec_kernel(%arg0: i32, %arg1: i32, %arg2: memref<256x16xf32, #tpu.memory_space<vmem>>, %arg3: memref<16x128xf32, #tpu.memory_space<vmem>>, %arg4: memref<16x128xf32, #tpu.memory_space<vmem>>) attributes {dimension_semantics = [#tpu.dimension_semantics<parallel>, #tpu.dimension_semantics<parallel>], iteration_bounds = array<i64: 1, 1>, scalar_prefetch = 0 : i64, scratch_operands = 0 : i64, tpu.core_type = #tpu.core_type<tc>, window_params = [{transform_indices = @transform_0, window_bounds = array<i64: 256, 16>}, {transform_indices = @transform_1, window_bounds = array<i64: 16, 128>}, {transform_indices = @transform_2, window_bounds = array<i64: 16, 128>}]} {
    %c0 = arith.constant 0 : index
    %c0_0 = arith.constant 0 : index
    %0 = vector.load %arg2[%c0, %c0_0] : memref<256x16xf32, #tpu.memory_space<vmem>>, vector<256x16xf32>
    %c0_1 = arith.constant 0 : index
    %c0_2 = arith.constant 0 : index
    %1 = vector.load %arg3[%c0_1, %c0_2] : memref<16x128xf32, #tpu.memory_space<vmem>>, vector<16x128xf32>
    %cst = arith.constant dense<0.000000e+00> : vector<256x128xf32>
    %2 = tpu.matmul %0, %1, %cst {dimension_numbers = #tpu.dot_dimension_numbers<[1], [0], [0], [1], [0, 0, 1, 1], [], []>, precision = #tpu.contract_precision<fp32>} : vector<256x16xf32>, vector<16x128xf32>, vector<256x128xf32> -> vector<256x128xf32>
    %3 = arith.mulf %2, %2 : vector<256x128xf32>
    %4 = vector.shape_cast %3 : vector<256x128xf32> to vector<16x16x128xf32>
    %cst_3 = arith.constant dense<0.000000e+00> : vector<16x128xf32>
    %5 = vector.multi_reduction <add>, %4, %cst_3 [1] : vector<16x16x128xf32> to vector<16x128xf32>
    %cst_4 = arith.constant 9.99999968E-21 : f32
    %6 = vector.broadcast %cst_4 : f32 to vector<16x128xf32>
    %7 = arith.maximumf %5, %6 : vector<16x128xf32>
    %8 = tpu.reciprocal %7 : vector<16x128xf32> -> vector<16x128xf32>
    %c0_5 = arith.constant 0 : index
    %c0_6 = arith.constant 0 : index
    %9 = vector.load %arg4[%c0_5, %c0_6] : memref<16x128xf32, #tpu.memory_space<vmem>>, vector<16x128xf32>
    tpu.vector_store %arg4[%c0_5, %c0_6], %8 {strides = array<i32>} : memref<16x128xf32, #tpu.memory_space<vmem>>, vector<16x128xf32>,
    return
  }
  func.func @transform_0(%arg0: i32, %arg1: i32) -> (i32, i32) {
    %c0_i32 = arith.constant 0 : i32
    %c0_i32_0 = arith.constant 0 : i32
    return %arg0, %c0_i32 : i32, i32
  }
  func.func @transform_1(%arg0: i32, %arg1: i32) -> (i32, i32) {
    %c0_i32 = arith.constant 0 : i32
    %c0_i32_0 = arith.constant 0 : i32
    return %c0_i32, %arg1 : i32, i32
  }
  func.func @transform_2(%arg0: i32, %arg1: i32) -> (i32, i32) {
    %c0_i32 = arith.constant 0 : i32
    return %arg0, %arg1 : i32, i32
  }
}

</mosaic_0001>

<bundles_post_ra>
// kernel: custom-call
= control target key start
LH: loop header
LB: loop body
LE: loop exit
PB: predicated region body
PF: predicated region fallthrough
CT: control target
= control target key end

     0   :  { %2 = vsyncpa [#allocation0], 0  ;;  %s55_s0 = inlined_call_operand.hbm [shape: c64[2,8,64], index: 0, kind: input, shape index: {}]   ;;  %s56_s1 = inlined_call_operand.vmem [shape: f32[2,8,64], index: 1, kind: output, shape index: {}]  }
   0x1   :  { %s4_s8 = sshll.u32 %s55_s0, 4  ;;  %s6_s11 = sshll.u32 %s56_s1, 4  ;;  %s5_s8 = int_to_ptr.hbm [resolvable:$true] %s4_s8  ;;  %s7_s11 = int_to_ptr.vmem [resolvable:$true] %s6_s11 }
   0x2   :  { %9 = dma.hbm_to_vmem [thread:$0]  %s5_s8, 256, %s7_s11, [#allocation0] }
   0x3   :  { %37 = dma.done.wait [#allocation0], 256  }
   0x4   :  { %38 = vsyncadd [#allocation0], 4294967040 }
   0x5   :  { %12 = vsyncpa [#allocation0], 1 }

// kernel: custom-call.1
= control target key start
LH: loop header
LB: loop body
LE: loop exit
PB: predicated region body
PF: predicated region fallthrough
CT: control target
= control target key end

     0   :  { %s56_s0 = inlined_call_operand.hbm [shape: c64[2,8,64], index: 0, kind: input, shape index: {}]   ;;  %s57_s1 = inlined_call_operand.vmem [shape: f32[2,8,64], index: 1, kind: output, shape index: {}]  }
   0x1   :  { %s2_s8 = scalar_lea.hbm %s56_s0, 16 }
   0x2   :  { %3 = vsyncpa [#allocation0], 0  ;;  %s5_s9 = sshll.u32 %s2_s8, 4  ;;  %s7_s12 = sshll.u32 %s57_s1, 4  ;;  %s6_s9 = int_to_ptr.hbm [resolvable:$true] %s5_s9  ;;  %s8_s12 = int_to_ptr.vmem [resolvable:$true] %s7_s12 }
   0x3   :  { %10 = dma.hbm_to_vmem [thread:$0]  %s6_s9, 256, %s8_s12, [#allocation0] }
   0x4   :  { %38 = dma.done.wait [#allocation0], 256  }
   0x5   :  { %39 = vsyncadd [#allocation0], 4294967040 }
   0x6   :  { %13 = vsyncpa [#allocation0], 1 }

// kernel: _music_spectrum_impl.2
= control target key start
LH: loop header
LB: loop body
LE: loop exit
PB: predicated region body
PF: predicated region fallthrough
CT: control target
= control target key end

     0   :  { %s4359_s0 = inlined_call_operand.vmem [shape: f32[256,128], index: 0, kind: input, shape index: {}]   ;;  %s4360_s1 = inlined_call_operand.vmem [shape: f32[256,256], index: 1, kind: output, shape index: {}]  }
   0x1   :  { %v91_v0 = vld [vmem:[%s4359_s0 + $0x78] sm:$0xff]  ;;  %v90_v1 = vld [vmem:[%s4359_s0 + $0x70] sm:$0xff]  ;;  %v89_v2 = vld [vmem:[%s4359_s0 + $0x68] sm:$0xff] }
   0x2   :  { %v2928_v3 = vand.u32 4294901760, %v91_v0  ;;  %v2930_v4 = vand.u32 4294901760, %v90_v1  ;;  %v2932_v5 = vand.u32 4294901760, %v89_v2  ;;  %v88_v6 = vld [vmem:[%s4359_s0 + $0x60] sm:$0xff]  ;;  %v87_v11 = vld [vmem:[%s4359_s0 + $0x58] sm:$0xff]  ;;  %v86_v19 = vld [vmem:[%s4359_s0 + $0x50] sm:$0xff] }
   0x3   :  { %v2945_v9 = vand.u32 4294901760, %v88_v6  ;;  %v2960_v14 = vand.u32 4294901760, %v87_v11  ;;  %v2980_v21 = vand.u32 4294901760, %v86_v19  ;;  %v85_v26 = vld [vmem:[%s4359_s0 + $0x48] sm:$0xff]  ;;  %v84_v32 = vld [vmem:[%s4359_s0 + $0x40] sm:$0xff]  ;;  %v83_v38 = vld [vmem:[%s4359_s0 + $0x38] sm:$0xff] }
   0x4   :  { %4511 = vst [vmem:[#allocation2_spill] sm:$0xff] %v2928_v3  ;;  %173 = vmatpush.xpose.msra.mxu0 %v2928_v3  ;;  %v2939_v7 = vsub.f32 %v91_v0, %v2928_v3  ;;  %896 = vmatpush.xpose.msra.mxu3 %v2928_v3  ;;  %v2943_v8 = vsub.f32 %v90_v1, %v2930_v4  ;;  %v2999_v27 = vand.u32 4294901760, %v85_v26  ;;  %v3027_v36 = vand.u32 4294901760, %v84_v32  ;;  %v82_v44 = vld [vmem:[%s4359_s0 + $0x30] sm:$0xff]  ;;  %v81_v50 = vld [vmem:[%s4359_s0 + $0x28] sm:$0xff]  ;;  %v80_v56 = vld [vmem:[%s4359_s0 + $0x20] sm:$0xff] }
   0x5   :  { %4512 = vst [vmem:[#allocation3_spill] sm:$0xff] %v2930_v4  ;;  %v2948_v10 = vsub.f32 %v89_v2, %v2932_v5  ;;  %v2972_v18 = vsub.f32 %v88_v6, %v2945_v9  ;;  %v2992_v25 = vsub.f32 %v87_v11, %v2960_v14  ;;  %v3011_v31 = vsub.f32 %v86_v19, %v2980_v21  ;;  %v79_v62 = vld [vmem:[%s4359_s0 + $0x18] sm:$0xff]  ;;  %v78_v11 = vld [vmem:[%s4359_s0 + $0x10] sm:$0xff] }
   0x6   :  { %4513 = vst [vmem:[#allocation4_spill] sm:$0xff] %v2932_v5  ;;  %688 = vmatpush.xpose.msra.mxu2 %v2939_v7  ;;  %v2955_v12 = vand.u32 4294901760, %v2939_v7  ;;  %v2958_v13 = vand.u32 4294901760, %v2943_v8  ;;  %v3019_v33 = vsub.f32 %v85_v26, %v2999_v27  ;;  %v3046_v42 = vand.u32 4294901760, %v83_v38 }
   0x7   :  { %4514 = vst [vmem:[#allocation5_spill] sm:$0xff] %v2939_v7  ;;  %v2969_v17 = vand.u32 4294901760, %v2948_v10  ;;  %v2989_v24 = vand.u32 4294901760, %v2972_v18  ;;  %v3008_v30 = vand.u32 4294901760, %v2992_v25  ;;  %v3030_v37 = vand.u32 4294901760, %v3011_v31 }
   0x8   :  { %4515 = vst [vmem:[#allocation6_spill] sm:$0xff] %v2943_v8  ;;  %175 = vmatpush.xpose.msra.mxu0 %v2930_v4  ;;  %v327_v15 = vsub.f32 %v2939_v7, %v2955_v12  ;;  %898 = vmatpush.xpose.msra.mxu3 %v2930_v4  ;;  %v319_v16 = vsub.f32 %v2943_v8, %v2958_v13  ;;  %v3038_v39 = vand.u32 4294901760, %v3019_v33  ;;  %v3062_v47 = vand.u32 4294901760, %v82_v44 }
   0x9   :  { %4516 = vst [vmem:[#allocation7_spill] sm:$0xff] %v2945_v9  ;;  %v311_v23 = vsub.f32 %v2948_v10, %v2969_v17  ;;  %v303_v29 = vsub.f32 %v2972_v18, %v2989_v24  ;;  %v295_v35 = vsub.f32 %v2992_v25, %v3008_v30  ;;  %v287_v41 = vsub.f32 %v3011_v31, %v3030_v37 }
   0xa   :  { %4517 = vst [vmem:[#allocation8_spill] sm:$0xff] %v2948_v10  ;;  %v2977_v20 = vand.u32 4294901760, %v327_v15  ;;  %691 = vmatpush.xpose.msra.mxu2 %v2943_v8  ;;  %v2984_v22 = vand.u32 4294901760, %v319_v16  ;;  %v3049_v43 = vsub.f32 %v84_v32, %v3027_v36  ;;  %v279_v45 = vsub.f32 %v3019_v33, %v3038_v39  ;;  %v107_v16 = vld [vmem:[%s4359_s0 + $0xf8] sm:$0xff]  ;;  %v76_v32 = vld [vmem:[%s4359_s0] sm:$0xff] }
   0xb   :  { %4518 = vst [vmem:[#allocation9_spill] sm:$0xff] %v2955_v12  ;;  %v3003_v28 = vand.u32 4294901760, %v311_v23  ;;  %v3023_v34 = vand.u32 4294901760, %v303_v29  ;;  %v3042_v40 = vand.u32 4294901760, %v295_v35  ;;  %v3060_v46 = vand.u32 4294901760, %v287_v41  ;;  %v77_v35 = vld [vmem:[%s4359_s0 + $0x8] sm:$0xff] }
   0xc   :  { %4519 = vst [vmem:[#allocation10_spill] sm:$0xff] %v2958_v13  ;;  %177 = vmatpush.xpose.msra.mxu0 %v2932_v5  ;;  %466 = vmatpush.xpose.msra.mxu1 %v2977_v20  ;;  %v3065_v48 = vand.u32 4294901760, %v3049_v43  ;;  %v3068_v49 = vsub.f32 %v83_v38, %v3046_v42  ;;  %v3075_v51 = vand.u32 4294901760, %v81_v50  ;;  %v3079_v52 = vand.u32 4294901760, %v279_v45 }
   0xd   :  { %4520 = vst [vmem:[#allocation11_spill] sm:$0xff] %v2960_v14  ;;  %900 = vmatpush.xpose.msra.mxu3 %v2932_v5  ;;  %v3087_v55 = vsub.f32 %v82_v44, %v3062_v47  ;;  %v3103_v60 = vand.u32 4294901760, %v80_v56  ;;  %v3122_v2 = vand.u32 4294901760, %v79_v62  ;;  %v3141_v23 = vand.u32 4294901760, %v78_v11 }
   0xe   :  { %4521 = vst [vmem:[#allocation12_spill] sm:$0xff] %v2969_v17  ;;  %694 = vmatpush.xpose.msra.mxu2 %v2948_v10  ;;  %v271_v53 = vsub.f32 %v3049_v43, %v3065_v48  ;;  %v3084_v54 = vand.u32 4294901760, %v3068_v49  ;;  %v3095_v57 = vsub.f32 %v81_v50, %v3075_v51  ;;  %v3157_v38 = vand.u32 4294901760, %v107_v16 }
   0xf   :  { %4522 = vst [vmem:[#allocation13_spill] sm:$0xff] %v2972_v18  ;;  %v3106_v61 = vand.u32 4294901760, %v3087_v55  ;;  %v3125_v6 = vsub.f32 %v80_v56, %v3103_v60  ;;  %v3147_v29 = vsub.f32 %v79_v62, %v3122_v2  ;;  %v3161_v44 = vand.u32 4294901760, %v76_v32 }
  0x10   :  { %4523 = vst [vmem:[#allocation14_spill] sm:$0xff] %v2977_v20  ;;  %179 = vmatpush.xpose.msra.mxu0 %v2945_v9  ;;  %472 = vmatpush.xpose.msra.mxu1 %v2984_v22  ;;  %v3099_v58 = vand.u32 4294901760, %v271_v53  ;;  %v263_v59 = vsub.f32 %v3068_v49, %v3084_v54  ;;  %v3114_v63 = vand.u32 4294901760, %v3095_v57  ;;  %v3167_v50 = vand.u32 4294901760, %v77_v35 }
  0x11   :  { %4524 = vst [vmem:[#allocation15_spill] sm:$0xff] %v2980_v21  ;;  %902 = vmatpush.xpose.msra.mxu3 %v2945_v9  ;;  %v255_v1 = vsub.f32 %v3087_v55, %v3106_v61  ;;  %v3144_v26 = vand.u32 4294901760, %v3125_v6  ;;  %v3170_v53 = vand.u32 4294901760, %v3147_v29  ;;  %v3173_v56 = vsub.f32 %v78_v11, %v3141_v23 }
  0x12   :  { %4525 = vst [vmem:[#allocation16_spill] sm:$0xff] %v2984_v22  ;;  %697 = vmatpush.xpose.msra.mxu2 %v2972_v18  ;;  %v3118_v0 = vand.u32 4294901760, %v263_v59  ;;  %v247_v15 = vsub.f32 %v3095_v57, %v3114_v63  ;;  %v3178_v59 = vsub.f32 %v107_v16, %v3157_v38  ;;  %v3181_v62 = vsub.f32 %v76_v32, %v3161_v44  ;;  %v106_v16 = vld [vmem:[%s4359_s0 + $0xf0] sm:$0xff] }
  0x13   :  { %4526 = vst [vmem:[#allocation17_spill] sm:$0xff] %v2989_v24  ;;  %v3139_v19 = vand.u32 4294901760, %v255_v1  ;;  %v239_v45 = vsub.f32 %v3125_v6, %v3144_v26  ;;  %v231_v11 = vsub.f32 %v3147_v29, %v3170_v53  ;;  %v3193_v7 = vsub.f32 %v77_v35, %v3167_v50 }
  0x14   :  { %4527 = vst [vmem:[#allocation18_spill] sm:$0xff] %v2992_v25  ;;  %181 = vmatpush.xpose.msra.mxu0 %v2960_v14  ;;  %478 = vmatpush.xpose.msra.mxu1 %v3003_v28  ;;  %v3159_v41 = vand.u32 4294901760, %v247_v15  ;;  %v3190_v15 = vand.u32 4294901760, %v3173_v56  ;;  %v3201_v32 = vand.u32 4294901760, %v3178_v59  ;;  %v3206_v20 = vand.u32 4294901760, %v3181_v62 }
  0x15   :  { %4528 = vst [vmem:[#allocation19_spill] sm:$0xff] %v2999_v27  ;;  %904 = vmatpush.xpose.msra.mxu3 %v2960_v14  ;;  %v3185_v1 = vand.u32 4294901760, %v239_v45  ;;  %v3203_v45 = vand.u32 4294901760, %v106_v16  ;;  %v3210_v35 = vand.u32 4294901760, %v231_v11  ;;  %v3215_v22 = vand.u32 4294901760, %v3193_v7 }
  0x16   :  { %4529 = vst [vmem:[#allocation20_spill] sm:$0xff] %v3003_v28  ;;  %700 = vmatpush.xpose.msra.mxu2 %v2992_v25  ;;  %v223_v8 = vsub.f32 %v3173_v56, %v3190_v15  ;;  %v455_v28 = vsub.f32 %v3178_v59, %v3201_v32  ;;  %v207_v11 = vsub.f32 %v3181_v62, %v3206_v20 }
  0x17   :  { %4530 = vst [vmem:[#allocation21_spill] sm:$0xff] %v3008_v30  ;;  %v3218_v10 = vsub.f32 %v106_v16, %v3203_v45  ;;  %v215_v16 = vsub.f32 %v3193_v7, %v3215_v22 }
  0x18   :  { %4531 = vst [vmem:[#allocation22_spill] sm:$0xff] %v3011_v31  ;;  %183 = vmatpush.xpose.msra.mxu0 %v2980_v21  ;;  %484 = vmatpush.xpose.msra.mxu1 %v3023_v34 }
  0x19   :  { %4532 = vst [vmem:[#allocation23_spill] sm:$0xff] %v3019_v33  ;;  %906 = vmatpush.xpose.msra.mxu3 %v2980_v21  ;;  %v3225_v18 = vand.u32 4294901760, %v3218_v10 }
  0x1a   :  { %4533 = vst [vmem:[#allocation24_spill] sm:$0xff] %v3023_v34  ;;  %703 = vmatpush.xpose.msra.mxu2 %v3011_v31  ;;  %v3231_v34 = vand.u32 4294901760, %v223_v8  ;;  %v3245_v8 = vand.u32 4294901760, %v215_v16 }
  0x1b   :  { %4534 = vst [vmem:[#allocation25_spill] sm:$0xff] %v3027_v36  ;;  %v447_v25 = vsub.f32 %v3218_v10, %v3225_v18 }
  0x1c   :  { %4535 = vst [vmem:[#allocation26_spill] sm:$0xff] %v3030_v37  ;;  %185 = vmatpush.xpose.msra.mxu0 %v2999_v27  ;;  %490 = vmatpush.xpose.msra.mxu1 %v3042_v40 }
  0x1d   :  { %4536 = vst [vmem:[#allocation27_spill] sm:$0xff] %v3038_v39  ;;  %908 = vmatpush.xpose.msra.mxu3 %v2999_v27 }
  0x1e   :  { %4537 = vst [vmem:[#allocation28_spill] sm:$0xff] %v3042_v40  ;;  %706 = vmatpush.xpose.msra.mxu2 %v3019_v33  ;;  %v3241_v40 = vand.u32 4294901760, %v207_v11  ;;  %v105_v11 = vld [vmem:[%s4359_s0 + $0xe8] sm:$0xff] }
  0x1f   :  { %4538 = vst [vmem:[#allocation29_spill] sm:$0xff] %v3046_v42 }
  0x20   :  { %4539 = vst [vmem:[#allocation30_spill] sm:$0xff] %v3049_v43  ;;  %187 = vmatpush.xpose.msra.mxu0 %v3027_v36  ;;  %496 = vmatpush.xpose.msra.mxu1 %v3060_v46 }
  0x21   :  { %4540 = vst [vmem:[#allocation31_spill] sm:$0xff] %v3060_v46  ;;  %910 = vmatpush.xpose.msra.mxu3 %v3027_v36 }
  0x22   :  { %4541 = vst [vmem:[#allocation32_spill] sm:$0xff] %v3062_v47  ;;  %709 = vmatpush.xpose.msra.mxu2 %v3049_v43 }
  0x23   :  { %4542 = vst [vmem:[#allocation33_spill] sm:$0xff] %v3065_v48 }
  0x24   :  { %4543 = vst [vmem:[#allocation34_spill] sm:$0xff] %v3068_v49  ;;  %189 = vmatpush.xpose.msra.mxu0 %v3046_v42  ;;  %502 = vmatpush.xpose.msra.mxu1 %v3079_v52 }
  0x25   :  { %4544 = vst [vmem:[#allocation35_spill] sm:$0xff] %v3075_v51  ;;  %912 = vmatpush.xpose.msra.mxu3 %v3046_v42 }
  0x26   :  { %4545 = vst [vmem:[#allocation36_spill] sm:$0xff] %v3079_v52  ;;  %712 = vmatpush.xpose.msra.mxu2 %v3068_v49 }
  0x27   :  { %4546 = vst [vmem:[#allocation37_spill] sm:$0xff] %v3084_v54 }
  0x28   :  { %4547 = vst [vmem:[#allocation38_spill] sm:$0xff] %v3087_v55  ;;  %191 = vmatpush.xpose.msra.mxu0 %v3062_v47  ;;  %508 = vmatpush.xpose.msra.mxu1 %v3099_v58 }
  0x29   :  { %4548 = vst [vmem:[#allocation39_spill] sm:$0xff] %v3095_v57  ;;  %914 = vmatpush.xpose.msra.mxu3 %v3062_v47 }
  0x2a   :  { %4549 = vst [vmem:[#allocation40_spill] sm:$0xff] %v3099_v58  ;;  %715 = vmatpush.xpose.msra.mxu2 %v3087_v55 }
  0x2b   :  { %4550 = vst [vmem:[#allocation41_spill] sm:$0xff] %v3103_v60 }
  0x2c   :  { %4551 = vst [vmem:[#allocation42_spill] sm:$0xff] %v3106_v61  ;;  %193 = vmatpush.xpose.msra.mxu0 %v3075_v51  ;;  %514 = vmatpush.xpose.msra.mxu1 %v3118_v0 }
  0x2d   :  { %4552 = vst [vmem:[#allocation43_spill] sm:$0xff] %v3114_v63  ;;  %916 = vmatpush.xpose.msra.mxu3 %v3075_v51 }
  0x2e   :  { %4553 = vst [vmem:[#allocation44_spill] sm:$0xff] %v3118_v0  ;;  %718 = vmatpush.xpose.msra.mxu2 %v3095_v57 }
  0x2f   :  { %4554 = vst [vmem:[#allocation45_spill] sm:$0xff] %v3122_v2 }
  0x30   :  { %4555 = vst [vmem:[#allocation46_spill] sm:$0xff] %v3125_v6  ;;  %195 = vmatpush.xpose.msra.mxu0 %v3103_v60  ;;  %520 = vmatpush.xpose.msra.mxu1 %v3139_v19 }
  0x31   :  { %4556 = vst [vmem:[#allocation47_spill] sm:$0xff] %v3139_v19  ;;  %918 = vmatpush.xpose.msra.mxu3 %v3103_v60 }
  0x32   :  { %4557 = vst [vmem:[#allocation48_spill] sm:$0xff] %v3141_v23  ;;  %721 = vmatpush.xpose.msra.mxu2 %v3125_v6 }
  0x33   :  { %4558 = vst [vmem:[#allocation49_spill] sm:$0xff] %v3144_v26 }
  0x34   :  { %4559 = vst [vmem:[#allocation50_spill] sm:$0xff] %v3147_v29  ;;  %197 = vmatpush.xpose.msra.mxu0 %v3122_v2  ;;  %526 = vmatpush.xpose.msra.mxu1 %v3159_v41 }
  0x35   :  { %4560 = vst [vmem:[#allocation51_spill] sm:$0xff] %v3159_v41  ;;  %920 = vmatpush.xpose.msra.mxu3 %v3122_v2 }
  0x36   :  { %4561 = vst [vmem:[#allocation52_spill] sm:$0xff] %v3161_v44  ;;  %724 = vmatpush.xpose.msra.mxu2 %v3147_v29 }
  0x37   :  { %4562 = vst [vmem:[#allocation53_spill] sm:$0xff] %v3167_v50 }
  0x38   :  { %4563 = vst [vmem:[#allocation54_spill] sm:$0xff] %v3170_v53  ;;  %199 = vmatpush.xpose.msra.mxu0 %v3141_v23  ;;  %532 = vmatpush.xpose.msra.mxu1 %v3185_v1 }
  0x39   :  { %4564 = vst [vmem:[#allocation55_spill] sm:$0xff] %v3173_v56  ;;  %922 = vmatpush.xpose.msra.mxu3 %v3141_v23 }
  0x3a   :  { %4565 = vst [vmem:[#allocation56_spill] sm:$0xff] %v3178_v59  ;;  %727 = vmatpush.xpose.msra.mxu2 %v3173_v56 }
  0x3b   :  { %4566 = vst [vmem:[#allocation57_spill] sm:$0xff] %v3181_v62 }
  0x3c   :  { %4567 = vst [vmem:[#allocation58_spill] sm:$0xff] %v3185_v1  ;;  %201 = vmatpush.xpose.msra.mxu0 %v3167_v50  ;;  %538 = vmatpush.xpose.msra.mxu1 %v3210_v35 }
  0x3d   :  { %4568 = vst [vmem:[#allocation59_spill] sm:$0xff] %v3190_v15  ;;  %924 = vmatpush.xpose.msra.mxu3 %v3167_v50 }
  0x3e   :  { %4569 = vst [vmem:[#allocation60_spill] sm:$0xff] %v3193_v7  ;;  %730 = vmatpush.xpose.msra.mxu2 %v3193_v7 }
  0x3f   :  { %4570 = vst [vmem:[#allocation61_spill] sm:$0xff] %v3201_v32  ;;  %v3237_v32 = vand.u32 4294901760, %v455_v28  ;;  %v3251_v28 = vand.u32 4294901760, %v447_v25  ;;  %v3263_v25 = vand.u32 4294901760, %v105_v11 }
  0x40   :  { %4571 = vst [vmem:[#allocation62_spill] sm:$0xff] %v3206_v20  ;;  %203 = vmatpush.xpose.msra.mxu0 %v3161_v44  ;;  %544 = vmatpush.xpose.msra.mxu1 %v3231_v34 }
  0x41   :  { %4572 = vst [vmem:[#allocation63_spill] sm:$0xff] %v3210_v35  ;;  %926 = vmatpush.xpose.msra.mxu3 %v3161_v44  ;;  %v3268_v16 = vsub.f32 %v105_v11, %v3263_v25 }
  0x42   :  { %4573 = vst [vmem:[#allocation64_spill] sm:$0xff] %v3215_v22  ;;  %733 = vmatpush.xpose.msra.mxu2 %v3181_v62 }
  0x43   :  { %4574 = vst [vmem:[#allocation65_spill] sm:$0xff] %v3218_v10  ;;  %209 = vmatmul.f32.vlgmr.msra.gmra.mxu0 %v3241_v40 }
  0x44   :  { %4575 = vst [vmem:[#allocation66_spill] sm:$0xff] %v3225_v18  ;;  %1123 = vmatpush.xpose.msrb.mxu0 %v2955_v12  ;;  %550 = vmatpush.xpose.msra.mxu1 %v3245_v8 }
  0x45   :  { %4576 = vst [vmem:[#allocation67_spill] sm:$0xff] %v3231_v34  ;;  %1768 = vmatpush.xpose.msrb.mxu3 %v3237_v32  ;;  %736 = vmatmul.f32.vlgmr.msra.gmra.mxu2 %v3181_v62  ;;  %v3273_v62 = vand.u32 4294901760, %v3268_v16 }
  0x46   :  { %4577 = vst [vmem:[#allocation68_spill] sm:$0xff] %v3237_v32  ;;  %1475 = vmatpush.xpose.msrb.mxu2 %v3157_v38  ;;  %930 = vmatmul.f32.vlgmr.msra.gmra.mxu3 %v3206_v20 }
  0x47   :  { %4578 = vst [vmem:[#allocation69_spill] sm:$0xff] %v3241_v40 }
  0x48   :  { %4579 = vst [vmem:[#allocation70_spill] sm:$0xff] %v3245_v8  ;;  %1127 = vmatpush.xpose.msrb.mxu0 %v2958_v13  ;;  %556 = vmatpush.xpose.msra.mxu1 %v3241_v40  ;;  %v439_v40 = vsub.f32 %v3268_v16, %v3273_v62 }
  0x49   :  { %4580 = vst [vmem:[#allocation71_spill] sm:$0xff] %v3251_v28  ;;  %1774 = vmatpush.xpose.msrb.mxu3 %v3251_v28 }
  0x4a   :  { %1477 = vmatpush.xpose.msrb.mxu2 %v3203_v45  ;;  %4581 = vst [vmem:[#allocation72_spill] sm:$0xff] %v3268_v16  ;;  %v3283_v11 = vand.u32 4294901760, %v439_v40  ;;  %v104_v40 = vld [vmem:[%s4359_s0 + $0xe0] sm:$0xff] }
  0x4b   :  { %4582 = vst [vmem:[#allocation73_spill] sm:$0xff] %v3273_v62  ;;  %217 = vmatmul.f32.gmra.mxu0 %v3245_v8  ;;  %558 = vmatmul.f32.vlgmr.msra.gmra.mxu1 %v3161_v44 }
  0x4c   :  { %1314 = vmatpush.xpose.msrb.mxu1 %v2928_v3  ;;  %1131 = vmatpush.xpose.msrb.mxu0 %v2969_v17  ;;  %4583 = vst [vmem:[#allocation74_spill] sm:$0xff] %v3283_v11 }
  0x4d   :  { %741 = vmatmul.f32.gmra.mxu2 %v3193_v7  ;;  %1780 = vmatpush.xpose.msrb.mxu3 %v3283_v11  ;;  %v3297_v7 = vand.u32 4294901760, %v104_v40 }
  0x4e   :  { %936 = vmatmul.f32.gmra.mxu3 %v3215_v22  ;;  %1479 = vmatpush.xpose.msrb.mxu2 %v3263_v25 }
  0x50   :  { %1316 = vmatpush.xpose.msrb.mxu1 %v2930_v4  ;;  %1135 = vmatpush.xpose.msrb.mxu0 %v2989_v24 }
  0x52   :  { %1481 = vmatpush.xpose.msrb.mxu2 %v3297_v7 }
  0x53   :  { %225 = vmatmul.f32.gmra.mxu0 %v3231_v34  ;;  %562 = vmatmul.f32.gmra.mxu1 %v3167_v50  ;;  %v3302_v34 = vsub.f32 %v104_v40, %v3297_v7 }
  0x54   :  { %1318 = vmatpush.xpose.msrb.mxu1 %v2932_v5  ;;  %1139 = vmatpush.xpose.msrb.mxu0 %v3008_v30 }
  0x55   :  { %746 = vmatmul.f32.gmra.mxu2 %v3173_v56  ;;  %4584 = vst [vmem:[#allocation75_spill] sm:$0xff] %v3302_v34  ;;  %v3306_v8 = vand.u32 4294901760, %v3302_v34 }
  0x56   :  { %942 = vmatmul.f32.gmra.mxu3 %v3190_v15 }
  0x57   :  { %4585 = vst [vmem:[#allocation76_spill] sm:$0xff] %v3306_v8  ;;  %v431_v56 = vsub.f32 %v3302_v34, %v3306_v8 }
  0x58   :  { %1320 = vmatpush.xpose.msrb.mxu1 %v2945_v9  ;;  %1143 = vmatpush.xpose.msrb.mxu0 %v3030_v37 }
  0x59   :  { %v3316_v40 = vand.u32 4294901760, %v431_v56  ;;  %v103_v56 = vld [vmem:[%s4359_s0 + $0xd8] sm:$0xff] }
  0x5b   :  { %233 = vmatmul.f32.gmra.mxu0 %v3210_v35  ;;  %566 = vmatmul.f32.gmra.mxu1 %v3141_v23  ;;  %4586 = vst [vmem:[#allocation77_spill] sm:$0xff] %v3316_v40 }
  0x5c   :  { %1322 = vmatpush.xpose.msrb.mxu1 %v2960_v14  ;;  %1147 = vmatpush.xpose.msrb.mxu0 %v3038_v39 }
  0x5d   :  { %751 = vmatmul.f32.gmra.mxu2 %v3147_v29  ;;  %1786 = vmatpush.xpose.msrb.mxu3 %v3316_v40  ;;  %v3330_v29 = vand.u32 4294901760, %v103_v56 }
  0x5e   :  { %948 = vmatmul.f32.gmra.mxu3 %v3170_v53 }
  0x5f   :  { %1483 = vmatpush.xpose.msrb.mxu2 %v3330_v29 }
  0x60   :  { %1324 = vmatpush.xpose.msrb.mxu1 %v2980_v21  ;;  %1151 = vmatpush.xpose.msrb.mxu0 %v3065_v48 }
  0x63   :  { %241 = vmatmul.f32.gmra.mxu0 %v3185_v1  ;;  %570 = vmatmul.f32.gmra.mxu1 %v3122_v2  ;;  %v3335_v1 = vsub.f32 %v103_v56, %v3330_v29 }
  0x64   :  { %1326 = vmatpush.xpose.msrb.mxu1 %v2999_v27  ;;  %1155 = vmatpush.xpose.msrb.mxu0 %v3084_v54 }
  0x65   :  { %756 = vmatmul.f32.gmra.mxu2 %v3125_v6  ;;  %4587 = vst [vmem:[#allocation78_spill] sm:$0xff] %v3335_v1  ;;  %v3339_v35 = vand.u32 4294901760, %v3335_v1 }
  0x66   :  { %954 = vmatmul.f32.gmra.mxu3 %v3144_v26 }
  0x67   :  { %4588 = vst [vmem:[#allocation79_spill] sm:$0xff] %v3339_v35  ;;  %v423_v6 = vsub.f32 %v3335_v1, %v3339_v35 }
  0x68   :  { %1328 = vmatpush.xpose.msrb.mxu1 %v3027_v36  ;;  %1159 = vmatpush.xpose.msrb.mxu0 %v3106_v61 }
  0x69   :  { %v3349_v56 = vand.u32 4294901760, %v423_v6  ;;  %v102_v6 = vld [vmem:[%s4359_s0 + $0xd0] sm:$0xff] }
  0x6b   :  { %249 = vmatmul.f32.gmra.mxu0 %v3159_v41  ;;  %574 = vmatmul.f32.gmra.mxu1 %v3103_v60 }
  0x6c   :  { %1330 = vmatpush.xpose.msrb.mxu1 %v3046_v42  ;;  %1163 = vmatpush.xpose.msrb.mxu0 %v3114_v63 }
  0x6d   :  { %761 = vmatmul.f32.gmra.mxu2 %v3095_v57  ;;  %1792 = vmatpush.xpose.msrb.mxu3 %v3349_v56 }
  0x6e   :  { %960 = vmatmul.f32.gmra.mxu3 %v3114_v63  ;;  %v3363_v63 = vand.u32 4294901760, %v102_v6 }
  0x70   :  { %1332 = vmatpush.xpose.msrb.mxu1 %v3062_v47  ;;  %1167 = vmatpush.xpose.msrb.mxu0 %v3144_v26  ;;  %v3368_v26 = vsub.f32 %v102_v6, %v3363_v63 }
  0x71   :  { %1485 = vmatpush.xpose.msrb.mxu2 %v3363_v63 }
  0x72   :  { %4589 = vst [vmem:[#allocation80_spill] sm:$0xff] %v3368_v26 }
  0x73   :  { %257 = vmatmul.f32.gmra.mxu0 %v3139_v19  ;;  %578 = vmatmul.f32.gmra.mxu1 %v3075_v51  ;;  %v95_v19 = vld [vmem:[%s4359_s0 + $0x98] sm:$0xff] }
  0x74   :  { %1334 = vmatpush.xpose.msrb.mxu1 %v3075_v51  ;;  %1171 = vmatpush.xpose.msrb.mxu0 %v3170_v53  ;;  %v3559_v41 = vand.u32 4294901760, %v95_v19 }
  0x75   :  { %766 = vmatmul.f32.gmra.mxu2 %v3087_v55 }
  0x76   :  { %966 = vmatmul.f32.gmra.mxu3 %v3106_v61  ;;  %v3372_v61 = vand.u32 4294901760, %v3368_v26 }
  0x78   :  { %1336 = vmatpush.xpose.msrb.mxu1 %v3103_v60  ;;  %1175 = vmatpush.xpose.msrb.mxu0 %v3190_v15  ;;  %4590 = vst [vmem:[#allocation81_spill] sm:$0xff] %v3372_v61  ;;  %v415_v55 = vsub.f32 %v3368_v26, %v3372_v61  ;;  %v4597_v15 = vld [vmem:[#allocation24_spill] sm:$0xff] }
  0x7a   :  { %v3382_v6 = vand.u32 4294901760, %v415_v55  ;;  %v101_v55 = vld [vmem:[%s4359_s0 + $0xc8] sm:$0xff] }
  0x7b   :  { %265 = vmatmul.f32.gmra.mxu0 %v3118_v0  ;;  %582 = vmatmul.f32.gmra.mxu1 %v3062_v47 }
  0x7c   :  { %1338 = vmatpush.xpose.msrb.mxu1 %v3122_v2  ;;  %1179 = vmatpush.xpose.msrb.mxu0 %v3215_v22 }
  0x7d   :  { %771 = vmatmul.f32.gmra.mxu2 %v3068_v49  ;;  %1798 = vmatpush.xpose.msrb.mxu3 %v3382_v6 }
  0x7e   :  { %972 = vmatmul.f32.gmra.mxu3 %v3084_v54  ;;  %v3397_v54 = vand.u32 4294901760, %v101_v55 }
  0x80   :  { %1340 = vmatpush.xpose.msrb.mxu1 %v3141_v23  ;;  %1183 = vmatpush.xpose.msrb.mxu0 %v3206_v20  ;;  %v3402_v49 = vsub.f32 %v101_v55, %v3397_v54  ;;  %v4600_v20 = vld [vmem:[#allocation20_spill] sm:$0xff] }
  0x81   :  { %1487 = vmatpush.xpose.msrb.mxu2 %v3397_v54 }
  0x82   :  { %4591 = vst [vmem:[#allocation82_spill] sm:$0xff] %v3402_v49 }
  0x83   :  { %273 = vmatmul.f32.gmra.mxu0 %v3099_v58  ;;  %586 = vmatmul.f32.gmra.mxu1 %v3046_v42 }
  0x84   :  { %1990 = vmatpush.xpose.msra.mxu0 %v3178_v59  ;;  %1342 = vmatpush.xpose.msrb.mxu1 %v3167_v50 }
  0x85   :  { %776 = vmatmul.f32.gmra.mxu2 %v3049_v43 }
  0x86   :  { %978 = vmatmul.f32.gmra.mxu3 %v3065_v48  ;;  %v3406_v48 = vand.u32 4294901760, %v3402_v49 }
  0x88   :  { %1993 = vmatpush.xpose.msra.mxu0 %v3218_v10  ;;  %1344 = vmatpush.xpose.msrb.mxu1 %v3161_v44  ;;  %4592 = vst [vmem:[#allocation83_spill] sm:$0xff] %v3406_v48  ;;  %v407_v43 = vsub.f32 %v3402_v49, %v3406_v48 }
  0x8a   :  { %v3416_v55 = vand.u32 4294901760, %v407_v43  ;;  %v100_v43 = vld [vmem:[%s4359_s0 + $0xc0] sm:$0xff] }
  0x8b   :  { %281 = vmatmul.f32.gmra.mxu0 %v3079_v52  ;;  %590 = vmatmul.f32.gmra.mxu1 %v3027_v36  ;;  %v94_v52 = vld [vmem:[%s4359_s0 + $0x90] sm:$0xff] }
  0x8c   :  { %2198 = vmatpush.xpose.msra.mxu1 %v3157_v38  ;;  %1996 = vmatpush.xpose.msra.mxu0 %v3268_v16 }
  0x8d   :  { %781 = vmatmul.f32.gmra.mxu2 %v3019_v33  ;;  %1804 = vmatpush.xpose.msrb.mxu3 %v3416_v55 }
  0x8e   :  { %984 = vmatmul.f32.gmra.mxu3 %v3038_v39  ;;  %v3430_v39 = vand.u32 4294901760, %v100_v43 }
  0x90   :  { %2200 = vmatpush.xpose.msra.mxu1 %v3203_v45  ;;  %1999 = vmatpush.xpose.msra.mxu0 %v3302_v34  ;;  %v3435_v33 = vsub.f32 %v100_v43, %v3430_v39  ;;  %v4596_v43 = vld [vmem:[#allocation18_spill] sm:$0xff] }
  0x91   :  { %1489 = vmatpush.xpose.msrb.mxu2 %v3430_v39 }
  0x92   :  { %4593 = vst [vmem:[#allocation84_spill] sm:$0xff] %v3435_v33 }
  0x93   :  { %289 = vmatmul.f32.gmra.mxu0 %v3060_v46  ;;  %594 = vmatmul.f32.gmra.mxu1 %v2999_v27 }
  0x94   :  { %2202 = vmatpush.xpose.msra.mxu1 %v3263_v25  ;;  %2002 = vmatpush.xpose.msra.mxu0 %v3335_v1  ;;  %v4622_v1 = vld [vmem:[#allocation61_spill] sm:$0xff] }
  0x95   :  { %786 = vmatmul.f32.gmra.mxu2 %v3011_v31  ;;  %v4595_v31 = vld [vmem:[#allocation28_spill] sm:$0xff] }
  0x96   :  { %990 = vmatmul.f32.gmra.mxu3 %v3030_v37  ;;  %v3439_v37 = vand.u32 4294901760, %v3435_v33 }
  0x98   :  { %2204 = vmatpush.xpose.msra.mxu1 %v3297_v7  ;;  %2005 = vmatpush.xpose.msra.mxu0 %v3368_v26  ;;  %4594 = vst [vmem:[#allocation85_spill] sm:$0xff] %v3439_v37  ;;  %v399_v57 = vsub.f32 %v3435_v33, %v3439_v37 }
  0x9a   :  { %v3449_v53 = vand.u32 4294901760, %v399_v57 }
  0x9b   :  { %297 = vmatmul.f32.gmra.mxu0 %v4595_v31  ;;  %598 = vmatmul.f32.gmra.mxu1 %v2980_v21 }
  0x9c   :  { %2206 = vmatpush.xpose.msra.mxu1 %v3330_v29  ;;  %2008 = vmatpush.xpose.msra.mxu0 %v3402_v49 }
  0x9d   :  { %791 = vmatmul.f32.gmra.mxu2 %v4596_v43  ;;  %1810 = vmatpush.xpose.msrb.mxu3 %v3449_v53  ;;  %v99_v43 = vld [vmem:[%s4359_s0 + $0xb8] sm:$0xff] }
  0x9e   :  { %996 = vmatmul.f32.gmra.mxu3 %v3008_v30  ;;  %v4598_v30 = vld [vmem:[#allocation13_spill] sm:$0xff]  ;;  %v3461_v57 = vand.u32 4294901760, %v99_v43 }
  0xa0   :  { %2208 = vmatpush.xpose.msra.mxu1 %v3363_v63  ;;  %2011 = vmatpush.xpose.msra.mxu0 %v3435_v33  ;;  %v3466_v22 = vsub.f32 %v99_v43, %v3461_v57 }
  0xa1   :  { %1491 = vmatpush.xpose.msrb.mxu2 %v3461_v57 }
  0xa2   :  { %4599 = vst [vmem:[#allocation86_spill] sm:$0xff] %v3466_v22 }
  0xa3   :  { %305 = vmatmul.f32.gmra.mxu0 %v4597_v15  ;;  %602 = vmatmul.f32.gmra.mxu1 %v2960_v14  ;;  %v4602_v15 = vld [vmem:[#allocation8_spill] sm:$0xff]  ;;  %v4605_v14 = vld [vmem:[#allocation6_spill] sm:$0xff] }
  0xa4   :  { %2210 = vmatpush.xpose.msra.mxu1 %v3397_v54  ;;  %2014 = vmatpush.xpose.msra.mxu0 %v3466_v22 }
  0xa5   :  { %796 = vmatmul.f32.gmra.mxu2 %v4598_v30  ;;  %v92_v30 = vld [vmem:[%s4359_s0 + $0x80] sm:$0xff] }
  0xa6   :  { %1002 = vmatmul.f32.gmra.mxu3 %v2989_v24  ;;  %v3471_v24 = vand.u32 4294901760, %v3466_v22  ;;  %v3481_v31 = vand.u32 4294901760, %v92_v30 }
  0xa8   :  { %2212 = vmatpush.xpose.msra.mxu1 %v3430_v39  ;;  %4601 = vst [vmem:[#allocation87_spill] sm:$0xff] %v3471_v24  ;;  %v391_v43 = vsub.f32 %v3466_v22, %v3471_v24 }
  0xab   :  { %313 = vmatmul.f32.gmra.mxu0 %v4600_v20  ;;  %606 = vmatmul.f32.gmra.mxu1 %v2945_v9  ;;  %v3483_v20 = vand.u32 4294901760, %v391_v43  ;;  %v4603_v9 = vld [vmem:[#allocation16_spill] sm:$0xff] }
  0xac   :  { %2214 = vmatpush.xpose.msra.mxu1 %v3461_v57  ;;  %v98_v43 = vld [vmem:[%s4359_s0 + $0xb0] sm:$0xff] }
  0xad   :  { %801 = vmatmul.f32.gmra.mxu2 %v4602_v15  ;;  %1816 = vmatpush.xpose.msrb.mxu3 %v3483_v20  ;;  %v93_v15 = vld [vmem:[%s4359_s0 + $0x88] sm:$0xff]  ;;  %v3499_v46 = vand.u32 4294901760, %v98_v43 }
  0xae   :  { %1008 = vmatmul.f32.gmra.mxu3 %v2969_v17  ;;  %v3489_v17 = vsub.f32 %v92_v30, %v3481_v31 }
  0xaf   :  { %1493 = vmatpush.xpose.msrb.mxu2 %v3499_v46  ;;  %v3509_v30 = vsub.f32 %v98_v43, %v3499_v46  ;;  %v96_v43 = vld [vmem:[%s4359_s0 + $0xa0] sm:$0xff] }
  0xb0   :  { %4604 = vst [vmem:[#allocation88_spill] sm:$0xff] %v3489_v17  ;;  %2216 = vmatpush.xpose.msra.mxu1 %v3499_v46 }
  0xb1   :  { %4607 = vst [vmem:[#allocation90_spill] sm:$0xff] %v3509_v30  ;;  %v3522_v27 = vand.u32 4294901760, %v3509_v30  ;;  %2017 = vmatpush.xpose.msra.mxu0 %v3509_v30 }
  0xb3   :  { %321 = vmatmul.f32.gmra.mxu0 %v4603_v9  ;;  %610 = vmatmul.f32.gmra.mxu1 %v2932_v5  ;;  %v3502_v9 = vand.u32 4294901760, %v3489_v17  ;;  %v3504_v5 = vand.u32 4294901760, %v93_v15  ;;  %4610 = vst [vmem:[#allocation92_spill] sm:$0xff] %v3522_v27 }
  0xb5   :  { %806 = vmatmul.f32.gmra.mxu2 %v4605_v14  ;;  %4606 = vst [vmem:[#allocation89_spill] sm:$0xff] %v3502_v9  ;;  %v335_v14 = vsub.f32 %v3489_v17, %v3502_v9  ;;  %v3516_v21 = vsub.f32 %v93_v15, %v3504_v5  ;;  %v383_v15 = vsub.f32 %v3509_v30, %v3522_v27 }
  0xb6   :  { %1014 = vmatmul.f32.gmra.mxu3 %v2958_v13  ;;  %v4608_v13 = vld [vmem:[#allocation14_spill] sm:$0xff] }
  0xb7   :  { %4609 = vst [vmem:[#allocation91_spill] sm:$0xff] %v3516_v21  ;;  %v3534_v58 = vand.u32 4294901760, %v335_v14  ;;  %v3537_v36 = vand.u32 4294901760, %v3516_v21  ;;  %v3539_v0 = vand.u32 4294901760, %v383_v15 }
  0xb9   :  { %4612 = vst [vmem:[#allocation93_spill] sm:$0xff] %v3537_v36  ;;  %1822 = vmatpush.xpose.msrb.mxu3 %v3539_v0  ;;  %v343_v15 = vsub.f32 %v3516_v21, %v3537_v36 }
  0xbb   :  { %329 = vmatmul.f32.gmra.mxu0 %v4608_v13  ;;  %614 = vmatmul.f32.gmra.mxu1 %v2930_v4  ;;  %v4611_v13 = vld [vmem:[#allocation5_spill] sm:$0xff]  ;;  %v3532_v4 = vand.u32 4294901760, %v94_v52  ;;  %v3578_v2 = vand.u32 4294901760, %v343_v15 }
  0xbd   :  { %811 = vmatmul.f32.gmra.mxu2 %v4611_v13  ;;  %v97_v13 = vld [vmem:[%s4359_s0 + $0xa8] sm:$0xff]  ;;  %v3553_v47 = vsub.f32 %v94_v52, %v3532_v4 }
  0xbe   :  { %1020 = vmatmul.f32.gmra.mxu3 %v2955_v12  ;;  %v3541_v12 = vand.u32 4294901760, %v96_v43  ;;  %v3550_v14 = vand.u32 4294901760, %v97_v13 }
  0xbf   :  { %4613 = vst [vmem:[#allocation94_spill] sm:$0xff] %v3553_v47 }
  0xc0   :  { %v210_v42 = vpop.f32.mrf.mxu0  ;;  %v3562_v51 = vsub.f32 %v96_v43, %v3541_v12  ;;  %v3565_v60 = vsub.f32 %v97_v13, %v3550_v14  ;;  %1495 = vmatpush.xpose.msrb.mxu2 %v3550_v14  ;;  %2218 = vmatpush.xpose.msra.mxu1 %v3550_v14  ;;  %v3581_v13 = vsub.f32 %v95_v19, %v3559_v41 }
  0xc2   :  { %4614 = vst [vmem:[#allocation95_spill] sm:$0xff] %v3562_v51  ;;  %v3571_v52 = vand.u32 4294901760, %v3565_v60  ;;  %2020 = vmatpush.xpose.msra.mxu0 %v3565_v60  ;;  %v3584_v23 = vand.u32 4294901760, %v3562_v51  ;;  %v3596_v28 = vand.u32 4294901760, %v3581_v13 }
  0xc3   :  { %337 = vmatmul.f32.gmra.mxu0 %v3534_v58  ;;  %618 = vmatmul.f32.gmra.mxu1 %v2928_v3  ;;  %4615 = vst [vmem:[#allocation96_spill] sm:$0xff] %v3565_v60  ;;  %v3575_v3 = vand.u32 4294901760, %v3553_v47 }
  0xc4   :  { %4616 = vst [vmem:[#allocation97_spill] sm:$0xff] %v3571_v52  ;;  %v375_v50 = vsub.f32 %v3565_v60, %v3571_v52  ;;  %1497 = vmatpush.xpose.msrb.mxu2 %v3541_v12  ;;  %2220 = vmatpush.xpose.msra.mxu1 %v3541_v12  ;;  %v367_v16 = vsub.f32 %v3562_v51, %v3584_v23 }
  0xc5   :  { %816 = vmatmul.f32.gmra.mxu2 %v3489_v17  ;;  %4617 = vst [vmem:[#allocation98_spill] sm:$0xff] %v3575_v3  ;;  %v351_v15 = vsub.f32 %v3553_v47, %v3575_v3 }
  0xc6   :  { %1026 = vmatmul.f32.gmra.mxu3 %v3502_v9  ;;  %4618 = vst [vmem:[#allocation99_spill] sm:$0xff] %v3581_v13  ;;  %2023 = vmatpush.xpose.msra.mxu0 %v3562_v51  ;;  %v3614_v11 = vand.u32 4294901760, %v367_v16 }
  0xc7   :  { %4619 = vst [vmem:[#allocation100_spill] sm:$0xff] %v3584_v23 }
  0xc8   :  { %v218_v44 = vpop.f32.mrf.mxu0  ;;  %v559_v59 = vpop.f32.mrf.mxu1  ;;  %4620 = vst [vmem:[#allocation101_spill] sm:$0xff] %v3596_v28  ;;  %1499 = vmatpush.xpose.msrb.mxu2 %v3559_v41  ;;  %2222 = vmatpush.xpose.msra.mxu1 %v3559_v41 }
  0xc9   :  { %v931_v43 = vpop.f32.mrf.mxu3  ;;  %v560_v32 = vadd.f32 %v559_v59, %v210_v42  ;;  %v737_v10 = vpop.f32.mrf.mxu2  ;;  %v3600_v42 = vand.u32 4294901760, %v375_v50  ;;  %v359_v50 = vsub.f32 %v3581_v13, %v3596_v28 }
  0xca   :  { %2026 = vmatpush.xpose.msra.mxu0 %v3581_v13 }
  0xcb   :  { %v738_v19 = vadd.f32 %v737_v10, %v560_v32  ;;  %345 = vmatmul.f32.gmra.mxu0 %v3578_v2  ;;  %622 = vmatmul.f32.gmra.mxu1 %v3481_v31  ;;  %v3610_v32 = vand.u32 4294901760, %v351_v15  ;;  %v3622_v15 = vand.u32 4294901760, %v359_v50 }
  0xcc   :  { %1828 = vmatpush.xpose.msrb.mxu3 %v3600_v42  ;;  %1501 = vmatpush.xpose.msrb.mxu2 %v3532_v4 }
  0xcd   :  { %v3604_v59 = vadd.f32 %v931_v43, %v738_v19  ;;  %821 = vmatmul.f32.gmra.mxu2 %v3516_v21  ;;  %2224 = vmatpush.xpose.msra.mxu1 %v3532_v4 }
  0xce   :  { %1032 = vmatmul.f32.gmra.mxu3 %v3537_v36  ;;  %2029 = vmatpush.xpose.msra.mxu0 %v3553_v47 }
  0xcf   :  { %4621 = vst [vmem:[#allocation102_spill] sm:$0xff] %v3604_v59 }
  0xd0   :  { %v226_v34 = vpop.f32.mrf.mxu0  ;;  %v563_v40 = vpop.f32.mrf.mxu1  ;;  %1834 = vmatpush.xpose.msrb.mxu3 %v3614_v11  ;;  %1503 = vmatpush.xpose.msrb.mxu2 %v3504_v5 }
  0xd1   :  { %v937_v10 = vpop.f32.mrf.mxu3  ;;  %v564_v43 = vadd.f32 %v563_v40, %v218_v44  ;;  %v742_v19 = vpop.f32.mrf.mxu2  ;;  %2226 = vmatpush.xpose.msra.mxu1 %v3504_v5 }
  0xd2   :  { %2032 = vmatpush.xpose.msra.mxu0 %v3516_v21 }
  0xd3   :  { %v743_v59 = vadd.f32 %v742_v19, %v564_v43  ;;  %353 = vmatmul.f32.gmra.mxu0 %v3610_v32  ;;  %626 = vmatmul.f32.gmra.mxu1 %v3504_v5 }
  0xd4   :  { %1840 = vmatpush.xpose.msrb.mxu3 %v3622_v15  ;;  %1505 = vmatpush.xpose.msrb.mxu2 %v3481_v31 }
  0xd5   :  { %v3626_v16 = vadd.f32 %v937_v10, %v743_v59  ;;  %826 = vmatmul.f32.gmra.mxu2 %v3553_v47  ;;  %2228 = vmatpush.xpose.msra.mxu1 %v3481_v31 }
  0xd6   :  { %1038 = vmatmul.f32.gmra.mxu3 %v3575_v3  ;;  %2035 = vmatpush.xpose.msra.mxu0 %v3489_v17 }
  0xd8   :  { %v234_v40 = vpop.f32.mrf.mxu0  ;;  %v567_v43 = vpop.f32.mrf.mxu1  ;;  %1846 = vmatpush.xpose.msrb.mxu3 %v3610_v32  ;;  %2425 = vmatpush.xpose.msra.mxu2 %v4622_v1 }
  0xd9   :  { %v943_v44 = vpop.f32.mrf.mxu3  ;;  %v568_v50 = vadd.f32 %v567_v43, %v226_v34  ;;  %v747_v19 = vpop.f32.mrf.mxu2 }
  0xdb   :  { %v748_v59 = vadd.f32 %v747_v19, %v568_v50  ;;  %361 = vmatmul.f32.gmra.mxu0 %v3622_v15  ;;  %630 = vmatmul.f32.gmra.mxu1 %v3532_v4 }
  0xdc   :  { %1852 = vmatpush.xpose.msrb.mxu3 %v3578_v2  ;;  %2429 = vmatpush.xpose.msra.mxu2 %v3225_v18 }
  0xdd   :  { %v3640_v10 = vadd.f32 %v943_v44, %v748_v59  ;;  %831 = vmatmul.f32.gmra.mxu2 %v3581_v13 }
  0xde   :  { %1044 = vmatmul.f32.gmra.mxu3 %v3596_v28 }
  0xe0   :  { %v242_v43 = vpop.f32.mrf.mxu0  ;;  %v571_v47 = vpop.f32.mrf.mxu1  ;;  %1858 = vmatpush.xpose.msrb.mxu3 %v3534_v58  ;;  %2433 = vmatpush.xpose.msra.mxu2 %v3273_v62 }
  0xe1   :  { %v949_v34 = vpop.f32.mrf.mxu3  ;;  %v572_v21 = vadd.f32 %v571_v47, %v234_v40  ;;  %v752_v17 = vpop.f32.mrf.mxu2 }
  0xe3   :  { %v753_v50 = vadd.f32 %v752_v17, %v572_v21  ;;  %369 = vmatmul.f32.gmra.mxu0 %v3614_v11  ;;  %634 = vmatmul.f32.gmra.mxu1 %v3559_v41 }
  0xe4   :  { %2616 = vmatpush.xpose.msra.mxu3 %v3157_v38  ;;  %2437 = vmatpush.xpose.msra.mxu2 %v3306_v8 }
  0xe5   :  { %v3651_v44 = vadd.f32 %v949_v34, %v753_v50  ;;  %836 = vmatmul.f32.gmra.mxu2 %v3562_v51 }
  0xe6   :  { %1050 = vmatmul.f32.gmra.mxu3 %v3584_v23 }
  0xe8   :  { %2618 = vmatpush.xpose.msra.mxu3 %v3203_v45  ;;  %v250_v40 = vpop.f32.mrf.mxu0  ;;  %v575_v19 = vpop.f32.mrf.mxu1  ;;  %2441 = vmatpush.xpose.msra.mxu2 %v3339_v35 }
  0xe9   :  { %v955_v47 = vpop.f32.mrf.mxu3  ;;  %v576_v59 = vadd.f32 %v575_v19, %v242_v43  ;;  %v757_v13 = vpop.f32.mrf.mxu2 }
  0xeb   :  { %v758_v17 = vadd.f32 %v757_v13, %v576_v59  ;;  %377 = vmatmul.f32.gmra.mxu0 %v3600_v42  ;;  %638 = vmatmul.f32.gmra.mxu1 %v3541_v12 }
  0xec   :  { %2620 = vmatpush.xpose.msra.mxu3 %v3263_v25  ;;  %2445 = vmatpush.xpose.msra.mxu2 %v3372_v61 }
  0xed   :  { %v3661_v21 = vadd.f32 %v955_v47, %v758_v17  ;;  %841 = vmatmul.f32.gmra.mxu2 %v3565_v60 }
  0xee   :  { %1056 = vmatmul.f32.gmra.mxu3 %v3571_v52 }
  0xf0   :  { %2622 = vmatpush.xpose.msra.mxu3 %v3297_v7  ;;  %v258_v43 = vpop.f32.mrf.mxu0  ;;  %v579_v50 = vpop.f32.mrf.mxu1  ;;  %2449 = vmatpush.xpose.msra.mxu2 %v3406_v48 }
  0xf1   :  { %v961_v34 = vpop.f32.mrf.mxu3  ;;  %v580_v19 = vadd.f32 %v579_v50, %v250_v40  ;;  %v762_v51 = vpop.f32.mrf.mxu2 }
  0xf3   :  { %v763_v13 = vadd.f32 %v762_v51, %v580_v19  ;;  %385 = vmatmul.f32.gmra.mxu0 %v3539_v0  ;;  %642 = vmatmul.f32.gmra.mxu1 %v3550_v14 }
  0xf4   :  { %2624 = vmatpush.xpose.msra.mxu3 %v3330_v29  ;;  %2453 = vmatpush.xpose.msra.mxu2 %v3439_v37 }
  0xf5   :  { %v3671_v47 = vadd.f32 %v961_v34, %v763_v13  ;;  %846 = vmatmul.f32.gmra.mxu2 %v3509_v30 }
  0xf6   :  { %1062 = vmatmul.f32.gmra.mxu3 %v3522_v27 }
  0xf8   :  { %2626 = vmatpush.xpose.msra.mxu3 %v3363_v63  ;;  %v266_v59 = vpop.f32.mrf.mxu0  ;;  %v583_v17 = vpop.f32.mrf.mxu1  ;;  %2457 = vmatpush.xpose.msra.mxu2 %v3471_v24 }
  0xf9   :  { %v967_v40 = vpop.f32.mrf.mxu3  ;;  %v584_v50 = vadd.f32 %v583_v17, %v258_v43  ;;  %v767_v60 = vpop.f32.mrf.mxu2 }
  0xfb   :  { %v768_v51 = vadd.f32 %v767_v60, %v584_v50  ;;  %393 = vmatmul.f32.gmra.mxu0 %v3483_v20  ;;  %646 = vmatmul.f32.gmra.mxu1 %v3499_v46 }
  0xfc   :  { %2628 = vmatpush.xpose.msra.mxu3 %v3397_v54  ;;  %2461 = vmatpush.xpose.msra.mxu2 %v3522_v27 }
  0xfd   :  { %v3681_v34 = vadd.f32 %v967_v40, %v768_v51  ;;  %851 = vmatmul.f32.gmra.mxu2 %v3466_v22 }
  0xfe   :  { %1068 = vmatmul.f32.gmra.mxu3 %v3471_v24 }
 0x100   :  { %2630 = vmatpush.xpose.msra.mxu3 %v3430_v39  ;;  %v274_v19 = vpop.f32.mrf.mxu0  ;;  %v587_v13 = vpop.f32.mrf.mxu1  ;;  %2465 = vmatpush.xpose.msra.mxu2 %v3571_v52  ;;  %v4626_v52 = vld [vmem:[#allocation74_spill] sm:$0xff] }
 0x101   :  { %v973_v43 = vpop.f32.mrf.mxu3  ;;  %v588_v17 = vadd.f32 %v587_v13, %v266_v59  ;;  %v772_v30 = vpop.f32.mrf.mxu2 }
 0x103   :  { %v773_v60 = vadd.f32 %v772_v30, %v588_v17  ;;  %401 = vmatmul.f32.gmra.mxu0 %v3449_v53  ;;  %650 = vmatmul.f32.gmra.mxu1 %v3461_v57 }
 0x104   :  { %2632 = vmatpush.xpose.msra.mxu3 %v3461_v57  ;;  %2469 = vmatpush.xpose.msra.mxu2 %v3584_v23  ;;  %v4628_v23 = vld [vmem:[#allocation71_spill] sm:$0xff] }
 0x105   :  { %v3691_v40 = vadd.f32 %v973_v43, %v773_v60  ;;  %856 = vmatmul.f32.gmra.mxu2 %v3435_v33  ;;  %v4624_v33 = vld [vmem:[#allocation77_spill] sm:$0xff] }
 0x106   :  { %1074 = vmatmul.f32.gmra.mxu3 %v3439_v37 }
 0x108   :  { %2634 = vmatpush.xpose.msra.mxu3 %v3499_v46  ;;  %v282_v50 = vpop.f32.mrf.mxu0  ;;  %v591_v51 = vpop.f32.mrf.mxu1  ;;  %2473 = vmatpush.xpose.msra.mxu2 %v3596_v28  ;;  %v4630_v28 = vld [vmem:[#allocation68_spill] sm:$0xff] }
 0x109   :  { %v979_v59 = vpop.f32.mrf.mxu3  ;;  %v592_v13 = vadd.f32 %v591_v51, %v274_v19  ;;  %v777_v24 = vpop.f32.mrf.mxu2 }
 0x10b   :  { %v778_v30 = vadd.f32 %v777_v24, %v592_v13  ;;  %409 = vmatmul.f32.gmra.mxu0 %v3416_v55  ;;  %654 = vmatmul.f32.gmra.mxu1 %v3430_v39 }
 0x10c   :  { %2636 = vmatpush.xpose.msra.mxu3 %v3550_v14  ;;  %2477 = vmatpush.xpose.msra.mxu2 %v3575_v3 }
 0x10d   :  { %v3701_v43 = vadd.f32 %v979_v59, %v778_v30  ;;  %861 = vmatmul.f32.gmra.mxu2 %v3402_v49 }
 0x10e   :  { %1080 = vmatmul.f32.gmra.mxu3 %v3406_v48 }
 0x110   :  { %2638 = vmatpush.xpose.msra.mxu3 %v3541_v12  ;;  %v290_v17 = vpop.f32.mrf.mxu0  ;;  %v595_v60 = vpop.f32.mrf.mxu1  ;;  %2481 = vmatpush.xpose.msra.mxu2 %v3537_v36  ;;  %v4635_v36 = vld [vmem:[#allocation53_spill] sm:$0xff] }
 0x111   :  { %v985_v19 = vpop.f32.mrf.mxu3  ;;  %v596_v51 = vadd.f32 %v595_v60, %v282_v50  ;;  %v782_v37 = vpop.f32.mrf.mxu2 }
 0x113   :  { %v783_v24 = vadd.f32 %v782_v37, %v596_v51  ;;  %417 = vmatmul.f32.gmra.mxu0 %v3382_v6  ;;  %658 = vmatmul.f32.gmra.mxu1 %v3397_v54  ;;  %v4623_v51 = vld [vmem:[#allocation78_spill] sm:$0xff] }
 0x114   :  { %2640 = vmatpush.xpose.msra.mxu3 %v3559_v41  ;;  %2485 = vmatpush.xpose.msra.mxu2 %v3502_v9 }
 0x115   :  { %v3711_v59 = vadd.f32 %v985_v19, %v783_v24  ;;  %866 = vmatmul.f32.gmra.mxu2 %v3368_v26 }
 0x116   :  { %1086 = vmatmul.f32.gmra.mxu3 %v3372_v61 }
 0x118   :  { %2642 = vmatpush.xpose.msra.mxu3 %v3532_v4  ;;  %v298_v13 = vpop.f32.mrf.mxu0  ;;  %v599_v30 = vpop.f32.mrf.mxu1 }
 0x119   :  { %v991_v50 = vpop.f32.mrf.mxu3  ;;  %v600_v60 = vadd.f32 %v599_v30, %v290_v17  ;;  %v787_v48 = vpop.f32.mrf.mxu2 }
 0x11b   :  { %v788_v37 = vadd.f32 %v787_v48, %v600_v60  ;;  %425 = vmatmul.f32.gmra.mxu0 %v3349_v56  ;;  %662 = vmatmul.f32.gmra.mxu1 %v3363_v63 }
 0x11c   :  { %2644 = vmatpush.xpose.msra.mxu3 %v3504_v5 }
 0x11d   :  { %v3720_v19 = vadd.f32 %v991_v50, %v788_v37  ;;  %871 = vmatmul.f32.gmra.mxu2 %v4623_v51  ;;  %v4625_v50 = vld [vmem:[#allocation75_spill] sm:$0xff] }
 0x11e   :  { %1092 = vmatmul.f32.gmra.mxu3 %v3339_v35 }
 0x120   :  { %2646 = vmatpush.xpose.msra.mxu3 %v3481_v31  ;;  %v306_v61 = vpop.f32.mrf.mxu0  ;;  %v603_v26 = vpop.f32.mrf.mxu1 }
 0x121   :  { %v997_v24 = vpop.f32.mrf.mxu3  ;;  %v604_v17 = vadd.f32 %v603_v26, %v298_v13  ;;  %v792_v30 = vpop.f32.mrf.mxu2  ;;  %v4627_v13 = vld [vmem:[#allocation72_spill] sm:$0xff] }
 0x123   :  { %v793_v49 = vadd.f32 %v792_v30, %v604_v17  ;;  %433 = vmatmul.f32.gmra.mxu0 %v4624_v33  ;;  %666 = vmatmul.f32.gmra.mxu1 %v3330_v29 }
 0x125   :  { %v3727_v48 = vadd.f32 %v997_v24, %v793_v49  ;;  %876 = vmatmul.f32.gmra.mxu2 %v4625_v50 }
 0x126   :  { %1098 = vmatmul.f32.gmra.mxu3 %v3306_v8 }
 0x128   :  { %v314_v37 = vpop.f32.mrf.mxu0  ;;  %v607_v35 = vpop.f32.mrf.mxu1 }
 0x129   :  { %v1003_v60 = vpop.f32.mrf.mxu3  ;;  %v608_v51 = vadd.f32 %v607_v35, %v306_v61  ;;  %v797_v27 = vpop.f32.mrf.mxu2  ;;  %v4629_v61 = vld [vmem:[#allocation65_spill] sm:$0xff] }
 0x12b   :  { %v798_v22 = vadd.f32 %v797_v27, %v608_v51  ;;  %441 = vmatmul.f32.gmra.mxu0 %v4626_v52  ;;  %670 = vmatmul.f32.gmra.mxu1 %v3297_v7 }
 0x12d   :  { %v3733_v26 = vadd.f32 %v1003_v60, %v798_v22  ;;  %881 = vmatmul.f32.gmra.mxu2 %v4627_v13 }
 0x12e   :  { %1104 = vmatmul.f32.gmra.mxu3 %v3273_v62 }
 0x130   :  { %v322_v24 = vpop.f32.mrf.mxu0  ;;  %v611_v17 = vpop.f32.mrf.mxu1 }
 0x131   :  { %v1009_v49 = vpop.f32.mrf.mxu3  ;;  %v612_v30 = vadd.f32 %v611_v17, %v314_v37  ;;  %v802_v8 = vpop.f32.mrf.mxu2  ;;  %v4631_v37 = vld [vmem:[#allocation56_spill] sm:$0xff] }
 0x133   :  { %v803_v50 = vadd.f32 %v802_v8, %v612_v30  ;;  %449 = vmatmul.f32.gmra.mxu0 %v4628_v23  ;;  %674 = vmatmul.f32.gmra.mxu1 %v3263_v25 }
 0x135   :  { %v3739_v27 = vadd.f32 %v1009_v49, %v803_v50  ;;  %886 = vmatmul.f32.gmra.mxu2 %v4629_v61 }
 0x136   :  { %1110 = vmatmul.f32.gmra.mxu3 %v3225_v18 }
 0x138   :  { %v330_v35 = vpop.f32.mrf.mxu0  ;;  %v615_v51 = vpop.f32.mrf.mxu1 }
 0x139   :  { %v1015_v22 = vpop.f32.mrf.mxu3  ;;  %v616_v60 = vadd.f32 %v615_v51, %v322_v24  ;;  %v807_v62 = vpop.f32.mrf.mxu2  ;;  %v4632_v24 = vld [vmem:[#allocation52_spill] sm:$0xff]  ;;  %v4634_v51 = vld [vmem:[#allocation69_spill] sm:$0xff] }
 0x13b   :  { %v808_v13 = vadd.f32 %v807_v62, %v616_v60  ;;  %457 = vmatmul.f32.gmra.mxu0 %v4630_v28  ;;  %678 = vmatmul.f32.gmra.mxu1 %v3203_v45 }
 0x13d   :  { %v3745_v8 = vadd.f32 %v1015_v22, %v808_v13  ;;  %891 = vmatmul.f32.gmra.mxu2 %v4631_v37 }
 0x13e   :  { %1116 = vmatmul.f32.gmra.mxu3 %v4622_v1 }
 0x140   :  { %v338_v49 = vpop.f32.mrf.mxu0  ;;  %v619_v17 = vpop.f32.mrf.mxu1 }
 0x141   :  { %v1021_v50 = vpop.f32.mrf.mxu3  ;;  %v620_v30 = vadd.f32 %v619_v17, %v330_v35  ;;  %v812_v18 = vpop.f32.mrf.mxu2  ;;  %v4637_v35 = vld [vmem:[#allocation70_spill] sm:$0xff] }
 0x143   :  { %v813_v61 = vadd.f32 %v812_v18, %v620_v30  ;;  %682 = vmatmul.f32.gmra.mxu1 %v3157_v38  ;;  %1185 = vmatmul.f32.vlgmr.msrb.gmra.mxu0 %v4632_v24 }
 0x145   :  { %v3751_v62 = vadd.f32 %v1021_v50, %v813_v61  ;;  %1511 = vmatmul.f32.vlgmr.msrb.gmra.mxu2 %v4634_v51 }
 0x146   :  { %1860 = vmatmul.f32.vlgmr.msrb.gmra.mxu3 %v4632_v24 }
 0x147   :  { %4633 = vst [vmem:[#allocation77_spill] sm:$0xff] %v3751_v62  ;;  %v4638_v62 = vld [vmem:[#allocation48_spill] sm:$0xff] }
 0x148   :  { %v346_v22 = vpop.f32.mrf.mxu0  ;;  %v623_v60 = vpop.f32.mrf.mxu1 }
 0x149   :  { %v1027_v13 = vpop.f32.mrf.mxu3  ;;  %v624_v1 = vadd.f32 %v623_v60, %v338_v49  ;;  %v817_v37 = vpop.f32.mrf.mxu2 }
 0x14b   :  { %v818_v3 = vadd.f32 %v817_v37, %v624_v1  ;;  %1189 = vmatmul.f32.gmra.mxu0 %v4635_v36  ;;  %1346 = vmatmul.f32.vlgmr.msrb.gmra.mxu1 %v4632_v24  ;;  %v4640_v37 = vld [vmem:[#allocation67_spill] sm:$0xff]  ;;  %v4641_v24 = vld [vmem:[#allocation45_spill] sm:$0xff] }
 0x14d   :  { %v3757_v18 = vadd.f32 %v1027_v13, %v818_v3  ;;  %1519 = vmatmul.f32.gmra.mxu2 %v4637_v35 }
 0x14e   :  { %1864 = vmatmul.f32.gmra.mxu3 %v4635_v36 }
 0x14f   :  { %4636 = vst [vmem:[#allocation74_spill] sm:$0xff] %v3757_v18 }
 0x150   :  { %v354_v50 = vpop.f32.mrf.mxu0  ;;  %v627_v17 = vpop.f32.mrf.mxu1 }
 0x151   :  { %v1033_v61 = vpop.f32.mrf.mxu3  ;;  %v628_v30 = vadd.f32 %v627_v17, %v346_v22  ;;  %v822_v51 = vpop.f32.mrf.mxu2  ;;  %v4643_v17 = vld [vmem:[#allocation63_spill] sm:$0xff] }
 0x153   :  { %v823_v9 = vadd.f32 %v822_v51, %v628_v30  ;;  %1193 = vmatmul.f32.gmra.mxu0 %v4638_v62  ;;  %1350 = vmatmul.f32.gmra.mxu1 %v4635_v36  ;;  %v4644_v36 = vld [vmem:[#allocation41_spill] sm:$0xff] }
 0x155   :  { %v3763_v1 = vadd.f32 %v1033_v61, %v823_v9  ;;  %1527 = vmatmul.f32.gmra.mxu2 %v4640_v37 }
 0x156   :  { %1868 = vmatmul.f32.gmra.mxu3 %v4638_v62 }
 0x157   :  { %4639 = vst [vmem:[#allocation71_spill] sm:$0xff] %v3763_v1 }
 0x158   :  { %v362_v49 = vpop.f32.mrf.mxu0  ;;  %v631_v13 = vpop.f32.mrf.mxu1 }
 0x159   :  { %v1039_v3 = vpop.f32.mrf.mxu3  ;;  %v632_v60 = vadd.f32 %v631_v13, %v354_v50  ;;  %v827_v35 = vpop.f32.mrf.mxu2  ;;  %v4646_v13 = vld [vmem:[#allocation58_spill] sm:$0xff] }
 0x15b   :  { %v828_v18 = vadd.f32 %v827_v35, %v632_v60  ;;  %1197 = vmatmul.f32.gmra.mxu0 %v4641_v24  ;;  %1354 = vmatmul.f32.gmra.mxu1 %v4638_v62  ;;  %v4647_v62 = vld [vmem:[#allocation35_spill] sm:$0xff] }
 0x15d   :  { %v3769_v22 = vadd.f32 %v1039_v3, %v828_v18  ;;  %1535 = vmatmul.f32.gmra.mxu2 %v4643_v17 }
 0x15e   :  { %1872 = vmatmul.f32.gmra.mxu3 %v4641_v24 }
 0x15f   :  { %4642 = vst [vmem:[#allocation68_spill] sm:$0xff] %v3769_v22 }
 0x160   :  { %v370_v61 = vpop.f32.mrf.mxu0  ;;  %v635_v30 = vpop.f32.mrf.mxu1 }
 0x161   :  { %v1045_v9 = vpop.f32.mrf.mxu3  ;;  %v636_v51 = vadd.f32 %v635_v30, %v362_v49  ;;  %v832_v37 = vpop.f32.mrf.mxu2  ;;  %v4649_v30 = vld [vmem:[#allocation51_spill] sm:$0xff] }
 0x163   :  { %v833_v1 = vadd.f32 %v832_v37, %v636_v51  ;;  %1201 = vmatmul.f32.gmra.mxu0 %v4644_v36  ;;  %1358 = vmatmul.f32.gmra.mxu1 %v4641_v24  ;;  %v4650_v24 = vld [vmem:[#allocation32_spill] sm:$0xff] }
 0x165   :  { %v3775_v50 = vadd.f32 %v1045_v9, %v833_v1  ;;  %1543 = vmatmul.f32.gmra.mxu2 %v4646_v13 }
 0x166   :  { %1876 = vmatmul.f32.gmra.mxu3 %v4644_v36 }
 0x167   :  { %4645 = vst [vmem:[#allocation69_spill] sm:$0xff] %v3775_v50 }
 0x168   :  { %v378_v3 = vpop.f32.mrf.mxu0  ;;  %v639_v60 = vpop.f32.mrf.mxu1 }
 0x169   :  { %v1051_v18 = vpop.f32.mrf.mxu3  ;;  %v640_v35 = vadd.f32 %v639_v60, %v370_v61  ;;  %v837_v17 = vpop.f32.mrf.mxu2  ;;  %v4652_v60 = vld [vmem:[#allocation47_spill] sm:$0xff] }
 0x16b   :  { %v838_v22 = vadd.f32 %v837_v17, %v640_v35  ;;  %1205 = vmatmul.f32.gmra.mxu0 %v4647_v62  ;;  %1362 = vmatmul.f32.gmra.mxu1 %v4644_v36  ;;  %v4653_v36 = vld [vmem:[#allocation29_spill] sm:$0xff] }
 0x16d   :  { %v3781_v49 = vadd.f32 %v1051_v18, %v838_v22  ;;  %1551 = vmatmul.f32.gmra.mxu2 %v4649_v30 }
 0x16e   :  { %1880 = vmatmul.f32.gmra.mxu3 %v4647_v62 }
 0x16f   :  { %4648 = vst [vmem:[#allocation70_spill] sm:$0xff] %v3781_v49 }
 0x170   :  { %v386_v9 = vpop.f32.mrf.mxu0  ;;  %v643_v51 = vpop.f32.mrf.mxu1 }
 0x171   :  { %v1057_v1 = vpop.f32.mrf.mxu3  ;;  %v644_v37 = vadd.f32 %v643_v51, %v378_v3  ;;  %v842_v13 = vpop.f32.mrf.mxu2  ;;  %v4655_v51 = vld [vmem:[#allocation44_spill] sm:$0xff] }
 0x173   :  { %v843_v50 = vadd.f32 %v842_v13, %v644_v37  ;;  %1209 = vmatmul.f32.gmra.mxu0 %v4650_v24  ;;  %1366 = vmatmul.f32.gmra.mxu1 %v4647_v62  ;;  %v4656_v62 = vld [vmem:[#allocation25_spill] sm:$0xff] }
 0x175   :  { %v3787_v61 = vadd.f32 %v1057_v1, %v843_v50  ;;  %1559 = vmatmul.f32.gmra.mxu2 %v4652_v60 }
 0x176   :  { %1884 = vmatmul.f32.gmra.mxu3 %v4650_v24 }
 0x177   :  { %4651 = vst [vmem:[#allocation67_spill] sm:$0xff] %v3787_v61 }
 0x178   :  { %v394_v18 = vpop.f32.mrf.mxu0  ;;  %v647_v35 = vpop.f32.mrf.mxu1 }
 0x179   :  { %v1063_v22 = vpop.f32.mrf.mxu3  ;;  %v648_v17 = vadd.f32 %v647_v35, %v386_v9  ;;  %v847_v30 = vpop.f32.mrf.mxu2  ;;  %v4658_v35 = vld [vmem:[#allocation40_spill] sm:$0xff] }
 0x17b   :  { %v848_v49 = vadd.f32 %v847_v30, %v648_v17  ;;  %1213 = vmatmul.f32.gmra.mxu0 %v4653_v36  ;;  %1370 = vmatmul.f32.gmra.mxu1 %v4650_v24  ;;  %v4659_v24 = vld [vmem:[#allocation19_spill] sm:$0xff] }
 0x17d   :  { %v3793_v3 = vadd.f32 %v1063_v22, %v848_v49  ;;  %1567 = vmatmul.f32.gmra.mxu2 %v4655_v51 }
 0x17e   :  { %1888 = vmatmul.f32.gmra.mxu3 %v4653_v36 }
 0x17f   :  { %4654 = vst [vmem:[#allocation63_spill] sm:$0xff] %v3793_v3 }
 0x180   :  { %v402_v1 = vpop.f32.mrf.mxu0  ;;  %v651_v37 = vpop.f32.mrf.mxu1 }
 0x181   :  { %v1069_v50 = vpop.f32.mrf.mxu3  ;;  %v652_v13 = vadd.f32 %v651_v37, %v394_v18  ;;  %v852_v60 = vpop.f32.mrf.mxu2  ;;  %v4661_v37 = vld [vmem:[#allocation36_spill] sm:$0xff] }
 0x183   :  { %v853_v61 = vadd.f32 %v852_v60, %v652_v13  ;;  %1217 = vmatmul.f32.gmra.mxu0 %v4656_v62  ;;  %1374 = vmatmul.f32.gmra.mxu1 %v4653_v36  ;;  %v4662_v36 = vld [vmem:[#allocation15_spill] sm:$0xff] }
 0x185   :  { %v3799_v9 = vadd.f32 %v1069_v50, %v853_v61  ;;  %1575 = vmatmul.f32.gmra.mxu2 %v4658_v35 }
 0x186   :  { %1892 = vmatmul.f32.gmra.mxu3 %v4656_v62 }
 0x187   :  { %4657 = vst [vmem:[#allocation58_spill] sm:$0xff] %v3799_v9 }
 0x188   :  { %v410_v22 = vpop.f32.mrf.mxu0  ;;  %v655_v17 = vpop.f32.mrf.mxu1 }
 0x189   :  { %v1075_v49 = vpop.f32.mrf.mxu3  ;;  %v656_v30 = vadd.f32 %v655_v17, %v402_v1  ;;  %v857_v51 = vpop.f32.mrf.mxu2  ;;  %v4664_v17 = vld [vmem:[#allocation31_spill] sm:$0xff] }
 0x18b   :  { %v858_v3 = vadd.f32 %v857_v51, %v656_v30  ;;  %1221 = vmatmul.f32.gmra.mxu0 %v4659_v24  ;;  %1378 = vmatmul.f32.gmra.mxu1 %v4656_v62  ;;  %v4665_v62 = vld [vmem:[#allocation11_spill] sm:$0xff] }
 0x18d   :  { %v3805_v18 = vadd.f32 %v1075_v49, %v858_v3  ;;  %1583 = vmatmul.f32.gmra.mxu2 %v4661_v37 }
 0x18e   :  { %1896 = vmatmul.f32.gmra.mxu3 %v4659_v24 }
 0x18f   :  { %4660 = vst [vmem:[#allocation51_spill] sm:$0xff] %v3805_v18 }
 0x190   :  { %v418_v50 = vpop.f32.mrf.mxu0  ;;  %v659_v13 = vpop.f32.mrf.mxu1 }
 0x191   :  { %v1081_v61 = vpop.f32.mrf.mxu3  ;;  %v660_v60 = vadd.f32 %v659_v13, %v410_v22  ;;  %v862_v35 = vpop.f32.mrf.mxu2  ;;  %v4667_v13 = vld [vmem:[#allocation28_spill] sm:$0xff] }
 0x193   :  { %v863_v9 = vadd.f32 %v862_v35, %v660_v60  ;;  %1225 = vmatmul.f32.gmra.mxu0 %v4662_v36  ;;  %1382 = vmatmul.f32.gmra.mxu1 %v4659_v24  ;;  %v4668_v24 = vld [vmem:[#allocation7_spill] sm:$0xff] }
 0x195   :  { %v3811_v1 = vadd.f32 %v1081_v61, %v863_v9  ;;  %1591 = vmatmul.f32.gmra.mxu2 %v4664_v17 }
 0x196   :  { %1900 = vmatmul.f32.gmra.mxu3 %v4662_v36 }
 0x197   :  { %4663 = vst [vmem:[#allocation47_spill] sm:$0xff] %v3811_v1 }
 0x198   :  { %v426_v49 = vpop.f32.mrf.mxu0  ;;  %v663_v30 = vpop.f32.mrf.mxu1 }
 0x199   :  { %v1087_v3 = vpop.f32.mrf.mxu3  ;;  %v664_v51 = vadd.f32 %v663_v30, %v418_v50  ;;  %v867_v37 = vpop.f32.mrf.mxu2  ;;  %v4670_v30 = vld [vmem:[#allocation24_spill] sm:$0xff] }
 0x19b   :  { %v868_v18 = vadd.f32 %v867_v37, %v664_v51  ;;  %1229 = vmatmul.f32.gmra.mxu0 %v4665_v62  ;;  %1386 = vmatmul.f32.gmra.mxu1 %v4662_v36  ;;  %v4671_v36 = vld [vmem:[#allocation4_spill] sm:$0xff] }
 0x19d   :  { %v3817_v22 = vadd.f32 %v1087_v3, %v868_v18  ;;  %1599 = vmatmul.f32.gmra.mxu2 %v4667_v13 }
 0x19e   :  { %1904 = vmatmul.f32.gmra.mxu3 %v4665_v62 }
 0x19f   :  { %4666 = vst [vmem:[#allocation44_spill] sm:$0xff] %v3817_v22 }
 0x1a0   :  { %v434_v61 = vpop.f32.mrf.mxu0  ;;  %v667_v60 = vpop.f32.mrf.mxu1 }
 0x1a1   :  { %v1093_v9 = vpop.f32.mrf.mxu3  ;;  %v668_v35 = vadd.f32 %v667_v60, %v426_v49  ;;  %v872_v17 = vpop.f32.mrf.mxu2  ;;  %v4673_v60 = vld [vmem:[#allocation20_spill] sm:$0xff] }
 0x1a3   :  { %v873_v1 = vadd.f32 %v872_v17, %v668_v35  ;;  %1233 = vmatmul.f32.gmra.mxu0 %v4668_v24  ;;  %1390 = vmatmul.f32.gmra.mxu1 %v4665_v62  ;;  %v4674_v62 = vld [vmem:[#allocation3_spill] sm:$0xff] }
 0x1a5   :  { %v3823_v50 = vadd.f32 %v1093_v9, %v873_v1  ;;  %1607 = vmatmul.f32.gmra.mxu2 %v4670_v30 }
 0x1a6   :  { %1908 = vmatmul.f32.gmra.mxu3 %v4668_v24 }
 0x1a7   :  { %4669 = vst [vmem:[#allocation40_spill] sm:$0xff] %v3823_v50 }
 0x1a8   :  { %v442_v3 = vpop.f32.mrf.mxu0  ;;  %v671_v51 = vpop.f32.mrf.mxu1 }
 0x1a9   :  { %v1099_v18 = vpop.f32.mrf.mxu3  ;;  %v672_v37 = vadd.f32 %v671_v51, %v434_v61  ;;  %v877_v13 = vpop.f32.mrf.mxu2  ;;  %v4676_v51 = vld [vmem:[#allocation16_spill] sm:$0xff] }
 0x1ab   :  { %v878_v22 = vadd.f32 %v877_v13, %v672_v37  ;;  %1237 = vmatmul.f32.gmra.mxu0 %v4671_v36  ;;  %1394 = vmatmul.f32.gmra.mxu1 %v4668_v24  ;;  %v4677_v24 = vld [vmem:[#allocation2_spill] sm:$0xff] }
 0x1ad   :  { %v3829_v49 = vadd.f32 %v1099_v18, %v878_v22  ;;  %1615 = vmatmul.f32.gmra.mxu2 %v4673_v60 }
 0x1ae   :  { %1912 = vmatmul.f32.gmra.mxu3 %v4671_v36 }
 0x1af   :  { %4672 = vst [vmem:[#allocation36_spill] sm:$0xff] %v3829_v49 }
 0x1b0   :  { %v450_v9 = vpop.f32.mrf.mxu0  ;;  %v675_v35 = vpop.f32.mrf.mxu1 }
 0x1b1   :  { %v1105_v1 = vpop.f32.mrf.mxu3  ;;  %v676_v17 = vadd.f32 %v675_v35, %v442_v3  ;;  %v882_v30 = vpop.f32.mrf.mxu2  ;;  %v4679_v35 = vld [vmem:[#allocation14_spill] sm:$0xff] }
 0x1b3   :  { %v883_v50 = vadd.f32 %v882_v30, %v676_v17  ;;  %1241 = vmatmul.f32.gmra.mxu0 %v4674_v62  ;;  %1398 = vmatmul.f32.gmra.mxu1 %v4671_v36 }
 0x1b5   :  { %v3835_v61 = vadd.f32 %v1105_v1, %v883_v50  ;;  %1623 = vmatmul.f32.gmra.mxu2 %v4676_v51 }
 0x1b6   :  { %1916 = vmatmul.f32.gmra.mxu3 %v4674_v62 }
 0x1b7   :  { %4675 = vst [vmem:[#allocation31_spill] sm:$0xff] %v3835_v61 }
 0x1b8   :  { %v458_v18 = vpop.f32.mrf.mxu0  ;;  %v679_v37 = vpop.f32.mrf.mxu1 }
 0x1b9   :  { %v1111_v22 = vpop.f32.mrf.mxu3  ;;  %v680_v13 = vadd.f32 %v679_v37, %v450_v9  ;;  %v887_v60 = vpop.f32.mrf.mxu2 }
 0x1bb   :  { %v888_v49 = vadd.f32 %v887_v60, %v680_v13  ;;  %1245 = vmatmul.f32.gmra.mxu0 %v4677_v24  ;;  %1402 = vmatmul.f32.gmra.mxu1 %v4674_v62 }
 0x1bd   :  { %v3841_v3 = vadd.f32 %v1111_v22, %v888_v49  ;;  %1631 = vmatmul.f32.gmra.mxu2 %v4679_v35  ;;  %v4680_v49 = vld [vmem:[#allocation102_spill] sm:$0xff] }
 0x1be   :  { %1920 = vmatmul.f32.gmra.mxu3 %v4677_v24 }
 0x1bf   :  { %4678 = vst [vmem:[#allocation28_spill] sm:$0xff] %v3841_v3 }
 0x1c0   :  { %v683_v1 = vpop.f32.mrf.mxu1  ;;  %v1186_v17 = vpop.f32.mrf.mxu0 }
 0x1c1   :  { %v1117_v50 = vpop.f32.mrf.mxu3  ;;  %v684_v30 = vadd.f32 %v683_v1, %v458_v18  ;;  %v892_v51 = vpop.f32.mrf.mxu2  ;;  %v1187_v22 = vadd.f32 %v1186_v17, %v4680_v49 }
 0x1c3   :  { %v893_v61 = vadd.f32 %v892_v51, %v684_v30  ;;  %1249 = vmatmul.f32.gmra.mxu0 %v3481_v31  ;;  %1406 = vmatmul.f32.gmra.mxu1 %v4677_v24 }
 0x1c5   :  { %v3847_v9 = vadd.f32 %v1117_v50, %v893_v61  ;;  %1639 = vmatmul.f32.gmra.mxu2 %v3534_v58 }
 0x1c6   :  { %1924 = vmatmul.f32.gmra.mxu3 %v3481_v31 }
 0x1c8   :  { %v1190_v13 = vpop.f32.mrf.mxu0  ;;  %v1347_v60 = vpop.f32.mrf.mxu1 }
 0x1c9   :  { %v1861_v37 = vpop.f32.mrf.mxu3  ;;  %v1348_v35 = vadd.f32 %v1347_v60, %v1187_v22  ;;  %v1512_v3 = vpop.f32.mrf.mxu2  ;;  %v1191_v58 = vadd.f32 %v1190_v13, %v3626_v16 }
 0x1ca   :  { %v3851_v18 = vadd.f32 %v1861_v37, %v1512_v3 }
 0x1cb   :  { %1253 = vmatmul.f32.gmra.mxu0 %v3504_v5  ;;  %1410 = vmatmul.f32.gmra.mxu1 %v3481_v31  ;;  %2840 = vst [vmem:[%s4360_s1] sm:$0xff] %v1348_v35 }
 0x1cd   :  { %1647 = vmatmul.f32.gmra.mxu2 %v3578_v2 }
 0x1ce   :  { %1928 = vmatmul.f32.gmra.mxu3 %v3504_v5 }
 0x1d0   :  { %v1194_v50 = vpop.f32.mrf.mxu0  ;;  %v1351_v1 = vpop.f32.mrf.mxu1 }
 0x1d1   :  { %v1865_v61 = vpop.f32.mrf.mxu3  ;;  %v1352_v17 = vadd.f32 %v1351_v1, %v1191_v58  ;;  %v1520_v3 = vpop.f32.mrf.mxu2  ;;  %v1195_v2 = vadd.f32 %v1194_v50, %v3640_v10 }
 0x1d2   :  { %v3861_v30 = vadd.f32 %v1865_v61, %v1520_v3 }
 0x1d3   :  { %1257 = vmatmul.f32.gmra.mxu0 %v3532_v4  ;;  %1414 = vmatmul.f32.gmra.mxu1 %v3504_v5  ;;  %2842 = vst [vmem:[%s4360_s1 + $0x10] sm:$0xff] %v1352_v17 }
 0x1d5   :  { %1655 = vmatmul.f32.gmra.mxu2 %v3610_v32 }
 0x1d6   :  { %1932 = vmatmul.f32.gmra.mxu3 %v3532_v4 }
 0x1d8   :  { %v1198_v51 = vpop.f32.mrf.mxu0  ;;  %v1355_v49 = vpop.f32.mrf.mxu1 }
 0x1d9   :  { %v1869_v16 = vpop.f32.mrf.mxu3  ;;  %v1356_v22 = vadd.f32 %v1355_v49, %v1195_v2  ;;  %v1528_v37 = vpop.f32.mrf.mxu2  ;;  %v1199_v32 = vadd.f32 %v1198_v51, %v3651_v44 }
 0x1da   :  { %v3871_v13 = vadd.f32 %v1869_v16, %v1528_v37 }
 0x1db   :  { %1261 = vmatmul.f32.gmra.mxu0 %v3559_v41  ;;  %1418 = vmatmul.f32.gmra.mxu1 %v3532_v4  ;;  %2844 = vst [vmem:[%s4360_s1 + $0x20] sm:$0xff] %v1356_v22 }
 0x1dd   :  { %1663 = vmatmul.f32.gmra.mxu2 %v3622_v15 }
 0x1de   :  { %1936 = vmatmul.f32.gmra.mxu3 %v3559_v41 }
 0x1e0   :  { %v1202_v60 = vpop.f32.mrf.mxu0  ;;  %v1359_v35 = vpop.f32.mrf.mxu1 }
 0x1e1   :  { %v1873_v10 = vpop.f32.mrf.mxu3  ;;  %v1360_v58 = vadd.f32 %v1359_v35, %v1199_v32  ;;  %v1536_v61 = vpop.f32.mrf.mxu2  ;;  %v1203_v15 = vadd.f32 %v1202_v60, %v3661_v21 }
 0x1e2   :  { %v3881_v50 = vadd.f32 %v1873_v10, %v1536_v61 }
 0x1e3   :  { %1265 = vmatmul.f32.gmra.mxu0 %v3541_v12  ;;  %1422 = vmatmul.f32.gmra.mxu1 %v3559_v41  ;;  %2846 = vst [vmem:[%s4360_s1 + $0x30] sm:$0xff] %v1360_v58 }
 0x1e5   :  { %1671 = vmatmul.f32.gmra.mxu2 %v3614_v11 }
 0x1e6   :  { %1940 = vmatmul.f32.gmra.mxu3 %v3541_v12 }
 0x1e8   :  { %v1206_v1 = vpop.f32.mrf.mxu0  ;;  %v1363_v17 = vpop.f32.mrf.mxu1 }
 0x1e9   :  { %v1877_v44 = vpop.f32.mrf.mxu3  ;;  %v1364_v3 = vadd.f32 %v1363_v17, %v1203_v15  ;;  %v1544_v2 = vpop.f32.mrf.mxu2  ;;  %v1207_v11 = vadd.f32 %v1206_v1, %v3671_v47 }
 0x1ea   :  { %v3891_v16 = vadd.f32 %v1877_v44, %v1544_v2 }
 0x1eb   :  { %1269 = vmatmul.f32.gmra.mxu0 %v3550_v14  ;;  %1426 = vmatmul.f32.gmra.mxu1 %v3541_v12  ;;  %2848 = vst [vmem:[%s4360_s1 + $0x40] sm:$0xff] %v1364_v3 }
 0x1ed   :  { %1679 = vmatmul.f32.gmra.mxu2 %v3600_v42 }
 0x1ee   :  { %1944 = vmatmul.f32.gmra.mxu3 %v3550_v14 }
 0x1f0   :  { %v1210_v51 = vpop.f32.mrf.mxu0  ;;  %v1367_v49 = vpop.f32.mrf.mxu1 }
 0x1f1   :  { %v1881_v21 = vpop.f32.mrf.mxu3  ;;  %v1368_v22 = vadd.f32 %v1367_v49, %v1207_v11  ;;  %v1552_v37 = vpop.f32.mrf.mxu2  ;;  %v1211_v42 = vadd.f32 %v1210_v51, %v3681_v34 }
 0x1f2   :  { %v3901_v32 = vadd.f32 %v1881_v21, %v1552_v37 }
 0x1f3   :  { %1273 = vmatmul.f32.gmra.mxu0 %v3499_v46  ;;  %1430 = vmatmul.f32.gmra.mxu1 %v3550_v14  ;;  %2850 = vst [vmem:[%s4360_s1 + $0x50] sm:$0xff] %v1368_v22 }
 0x1f5   :  { %1687 = vmatmul.f32.gmra.mxu2 %v3539_v0 }
 0x1f6   :  { %1948 = vmatmul.f32.gmra.mxu3 %v3499_v46 }
 0x1f8   :  { %v1214_v10 = vpop.f32.mrf.mxu0  ;;  %v1371_v60 = vpop.f32.mrf.mxu1 }
 0x1f9   :  { %v1885_v47 = vpop.f32.mrf.mxu3  ;;  %v1372_v35 = vadd.f32 %v1371_v60, %v1211_v42  ;;  %v1560_v58 = vpop.f32.mrf.mxu2  ;;  %v1215_v0 = vadd.f32 %v1214_v10, %v3691_v40 }
 0x1fa   :  { %v3911_v61 = vadd.f32 %v1885_v47, %v1560_v58 }
 0x1fb   :  { %1277 = vmatmul.f32.gmra.mxu0 %v3461_v57  ;;  %1434 = vmatmul.f32.gmra.mxu1 %v3499_v46  ;;  %2852 = vst [vmem:[%s4360_s1 + $0x60] sm:$0xff] %v1372_v35 }
 0x1fd   :  { %1695 = vmatmul.f32.gmra.mxu2 %v3483_v20 }
 0x1fe   :  { %1952 = vmatmul.f32.gmra.mxu3 %v3461_v57 }
 0x200   :  { %v1218_v15 = vpop.f32.mrf.mxu0  ;;  %v1375_v44 = vpop.f32.mrf.mxu1 }
 0x201   :  { %v1889_v34 = vpop.f32.mrf.mxu3  ;;  %v1376_v1 = vadd.f32 %v1375_v44, %v1215_v0  ;;  %v1568_v17 = vpop.f32.mrf.mxu2  ;;  %v1219_v20 = vadd.f32 %v1218_v15, %v3701_v43 }
 0x202   :  { %v3921_v3 = vadd.f32 %v1889_v34, %v1568_v17 }
 0x203   :  { %1281 = vmatmul.f32.gmra.mxu0 %v3430_v39  ;;  %1438 = vmatmul.f32.gmra.mxu1 %v3461_v57  ;;  %2854 = vst [vmem:[%s4360_s1 + $0x70] sm:$0xff] %v1376_v1 }
 0x205   :  { %1703 = vmatmul.f32.gmra.mxu2 %v3449_v53 }
 0x206   :  { %1956 = vmatmul.f32.gmra.mxu3 %v3430_v39 }
 0x208   :  { %v1222_v2 = vpop.f32.mrf.mxu0  ;;  %v1379_v11 = vpop.f32.mrf.mxu1 }
 0x209   :  { %v1893_v40 = vpop.f32.mrf.mxu3  ;;  %v1380_v21 = vadd.f32 %v1379_v11, %v1219_v20  ;;  %v1576_v51 = vpop.f32.mrf.mxu2  ;;  %v1223_v53 = vadd.f32 %v1222_v2, %v3711_v59 }
 0x20a   :  { %v3931_v49 = vadd.f32 %v1893_v40, %v1576_v51 }
 0x20b   :  { %1285 = vmatmul.f32.gmra.mxu0 %v3397_v54  ;;  %1442 = vmatmul.f32.gmra.mxu1 %v3430_v39  ;;  %2856 = vst [vmem:[%s4360_s1 + $0x80] sm:$0xff] %v1380_v21 }
 0x20d   :  { %1711 = vmatmul.f32.gmra.mxu2 %v3416_v55 }
 0x20e   :  { %1960 = vmatmul.f32.gmra.mxu3 %v3397_v54 }
 0x210   :  { %v1226_v22 = vpop.f32.mrf.mxu0  ;;  %v1383_v37 = vpop.f32.mrf.mxu1 }
 0x211   :  { %v1897_v43 = vpop.f32.mrf.mxu3  ;;  %v1384_v42 = vadd.f32 %v1383_v37, %v1223_v53  ;;  %v1584_v47 = vpop.f32.mrf.mxu2  ;;  %v1227_v55 = vadd.f32 %v1226_v22, %v3720_v19 }
 0x212   :  { %v3941_v10 = vadd.f32 %v1897_v43, %v1584_v47 }
 0x213   :  { %1289 = vmatmul.f32.gmra.mxu0 %v3363_v63  ;;  %1446 = vmatmul.f32.gmra.mxu1 %v3397_v54  ;;  %2858 = vst [vmem:[%s4360_s1 + $0x90] sm:$0xff] %v1384_v42 }
 0x215   :  { %1719 = vmatmul.f32.gmra.mxu2 %v3382_v6 }
 0x216   :  { %1964 = vmatmul.f32.gmra.mxu3 %v3363_v63 }
 0x218   :  { %v1230_v60 = vpop.f32.mrf.mxu0  ;;  %v1387_v35 = vpop.f32.mrf.mxu1 }
 0x219   :  { %v1901_v59 = vpop.f32.mrf.mxu3  ;;  %v1388_v58 = vadd.f32 %v1387_v35, %v1227_v55  ;;  %v1592_v0 = vpop.f32.mrf.mxu2  ;;  %v1231_v6 = vadd.f32 %v1230_v60, %v3727_v48 }
 0x21a   :  { %v3951_v34 = vadd.f32 %v1901_v59, %v1592_v0 }
 0x21b   :  { %1293 = vmatmul.f32.gmra.mxu0 %v3330_v29  ;;  %1450 = vmatmul.f32.gmra.mxu1 %v3363_v63  ;;  %2860 = vst [vmem:[%s4360_s1 + $0xa0] sm:$0xff] %v1388_v58 }
 0x21d   :  { %1727 = vmatmul.f32.gmra.mxu2 %v3349_v56 }
 0x21e   :  { %1968 = vmatmul.f32.gmra.mxu3 %v3330_v29 }
 0x220   :  { %v1234_v15 = vpop.f32.mrf.mxu0  ;;  %v1391_v44 = vpop.f32.mrf.mxu1 }
 0x221   :  { %v1905_v19 = vpop.f32.mrf.mxu3  ;;  %v1392_v1 = vadd.f32 %v1391_v44, %v1231_v6  ;;  %v1600_v17 = vpop.f32.mrf.mxu2  ;;  %v1235_v56 = vadd.f32 %v1234_v15, %v3733_v26 }
 0x222   :  { %v3961_v20 = vadd.f32 %v1905_v19, %v1600_v17  ;;  %v4683_v17 = vld [vmem:[#allocation52_spill] sm:$0xff] }
 0x223   :  { %1297 = vmatmul.f32.gmra.mxu0 %v3297_v7  ;;  %1454 = vmatmul.f32.gmra.mxu1 %v3330_v29  ;;  %2862 = vst [vmem:[%s4360_s1 + $0xb0] sm:$0xff] %v1392_v1  ;;  %v4682_v1 = vld [vmem:[#allocation57_spill] sm:$0xff] }
 0x225   :  { %1735 = vmatmul.f32.gmra.mxu2 %v4624_v33 }
 0x226   :  { %1972 = vmatmul.f32.gmra.mxu3 %v3297_v7 }
 0x228   :  { %v1238_v40 = vpop.f32.mrf.mxu0  ;;  %v1395_v2 = vpop.f32.mrf.mxu1 }
 0x229   :  { %v1909_v48 = vpop.f32.mrf.mxu3  ;;  %v1396_v11 = vadd.f32 %v1395_v2, %v1235_v56  ;;  %v1608_v21 = vpop.f32.mrf.mxu2  ;;  %v1239_v33 = vadd.f32 %v1238_v40, %v3739_v27 }
 0x22a   :  { %v3971_v51 = vadd.f32 %v1909_v48, %v1608_v21 }
 0x22b   :  { %1301 = vmatmul.f32.gmra.mxu0 %v3263_v25  ;;  %1458 = vmatmul.f32.gmra.mxu1 %v3297_v7  ;;  %2864 = vst [vmem:[%s4360_s1 + $0xc0] sm:$0xff] %v1396_v11 }
 0x22d   :  { %1743 = vmatmul.f32.gmra.mxu2 %v4626_v52 }
 0x22e   :  { %1976 = vmatmul.f32.gmra.mxu3 %v3263_v25 }
 0x230   :  { %v1242_v53 = vpop.f32.mrf.mxu0  ;;  %v1399_v43 = vpop.f32.mrf.mxu1 }
 0x231   :  { %v1913_v26 = vpop.f32.mrf.mxu3  ;;  %v1400_v22 = vadd.f32 %v1399_v43, %v1239_v33  ;;  %v1616_v37 = vpop.f32.mrf.mxu2  ;;  %v1243_v52 = vadd.f32 %v1242_v53, %v3745_v8  ;;  %v4686_v53 = vld [vmem:[#allocation62_spill] sm:$0xff]  ;;  %v4687_v43 = vld [vmem:[#allocation53_spill] sm:$0xff] }
 0x232   :  { %v3981_v42 = vadd.f32 %v1913_v26, %v1616_v37  ;;  %v4685_v26 = vld [vmem:[#allocation60_spill] sm:$0xff] }
 0x233   :  { %1305 = vmatmul.f32.gmra.mxu0 %v3203_v45  ;;  %1462 = vmatmul.f32.gmra.mxu1 %v3263_v25  ;;  %2866 = vst [vmem:[%s4360_s1 + $0xd0] sm:$0xff] %v1400_v22  ;;  %v4688_v22 = vld [vmem:[#allocation71_spill] sm:$0xff] }
 0x235   :  { %1751 = vmatmul.f32.gmra.mxu2 %v4628_v23  ;;  %v4681_v23 = vld [vmem:[#allocation77_spill] sm:$0xff] }
 0x236   :  { %1980 = vmatmul.f32.gmra.mxu3 %v3203_v45 }
 0x238   :  { %v1246_v47 = vpop.f32.mrf.mxu0  ;;  %v1403_v55 = vpop.f32.mrf.mxu1 }
 0x239   :  { %v1917_v27 = vpop.f32.mrf.mxu3  ;;  %v1404_v59 = vadd.f32 %v1403_v55, %v1243_v52  ;;  %v1624_v60 = vpop.f32.mrf.mxu2  ;;  %v1247_v8 = vadd.f32 %v1246_v47, %v4681_v23  ;;  %v4689_v23 = vld [vmem:[#allocation55_spill] sm:$0xff] }
 0x23a   :  { %v3991_v35 = vadd.f32 %v1917_v27, %v1624_v60 }
 0x23b   :  { %1309 = vmatmul.f32.gmra.mxu0 %v3157_v38  ;;  %1466 = vmatmul.f32.gmra.mxu1 %v3203_v45  ;;  %2868 = vst [vmem:[%s4360_s1 + $0xe0] sm:$0xff] %v1404_v59 }
 0x23d   :  { %1759 = vmatmul.f32.gmra.mxu2 %v4630_v28  ;;  %v4684_v28 = vld [vmem:[#allocation74_spill] sm:$0xff] }
 0x23e   :  { %1984 = vmatmul.f32.gmra.mxu3 %v3157_v38 }
 0x240   :  { %v1250_v0 = vpop.f32.mrf.mxu0  ;;  %v1407_v6 = vpop.f32.mrf.mxu1 }
 0x241   :  { %v1921_v58 = vpop.f32.mrf.mxu3  ;;  %v1408_v19 = vadd.f32 %v1407_v6, %v1247_v8  ;;  %v1632_v15 = vpop.f32.mrf.mxu2  ;;  %v1251_v56 = vadd.f32 %v1250_v0, %v4684_v28  ;;  %v4690_v8 = vld [vmem:[#allocation64_spill] sm:$0xff] }
 0x242   :  { %v4001_v44 = vadd.f32 %v1921_v58, %v1632_v15  ;;  %v4691_v58 = vld [vmem:[#allocation48_spill] sm:$0xff] }
 0x243   :  { %1470 = vmatmul.f32.gmra.mxu1 %v3157_v38  ;;  %2038 = vmatmul.f32.vlgmr.msra.gmra.mxu0 %v4682_v1  ;;  %2870 = vst [vmem:[%s4360_s1 + $0xf0] sm:$0xff] %v1408_v19  ;;  %v4692_v0 = vld [vmem:[#allocation68_spill] sm:$0xff] }
 0x245   :  { %2487 = vmatmul.f32.vlgmr.msra.gmra.mxu2 %v4683_v17 }
 0x246   :  { %2648 = vmatmul.f32.vlgmr.msra.gmra.mxu3 %v4683_v17 }
 0x248   :  { %v1254_v40 = vpop.f32.mrf.mxu0  ;;  %v1411_v2 = vpop.f32.mrf.mxu1 }
 0x249   :  { %v1925_v48 = vpop.f32.mrf.mxu3  ;;  %v1412_v11 = vadd.f32 %v1411_v2, %v1251_v56  ;;  %v1640_v21 = vpop.f32.mrf.mxu2  ;;  %v1255_v37 = vadd.f32 %v1254_v40, %v4688_v22  ;;  %v4694_v40 = vld [vmem:[#allocation59_spill] sm:$0xff]  ;;  %v4695_v2 = vld [vmem:[#allocation45_spill] sm:$0xff] }
 0x24a   :  { %v4011_v33 = vadd.f32 %v1925_v48, %v1640_v21  ;;  %v4693_v48 = vld [vmem:[#allocation50_spill] sm:$0xff] }
 0x24b   :  { %2043 = vmatmul.f32.gmra.mxu0 %v4685_v26  ;;  %2232 = vmatmul.f32.vlgmr.msra.gmra.mxu1 %v4686_v53  ;;  %2872 = vst [vmem:[%s4360_s1 + $0x100] sm:$0xff] %v1412_v11  ;;  %v4696_v11 = vld [vmem:[#allocation69_spill] sm:$0xff] }
 0x24d   :  { %2491 = vmatmul.f32.gmra.mxu2 %v4687_v43 }
 0x24e   :  { %2652 = vmatmul.f32.gmra.mxu3 %v4687_v43 }
 0x250   :  { %v1258_v27 = vpop.f32.mrf.mxu0  ;;  %v1415_v47 = vpop.f32.mrf.mxu1 }
 0x251   :  { %v1929_v52 = vpop.f32.mrf.mxu3  ;;  %v1416_v55 = vadd.f32 %v1415_v47, %v1255_v37  ;;  %v1648_v59 = vpop.f32.mrf.mxu2  ;;  %v1259_v6 = vadd.f32 %v1258_v27, %v4692_v0  ;;  %v4697_v27 = vld [vmem:[#allocation46_spill] sm:$0xff] }
 0x252   :  { %v4021_v60 = vadd.f32 %v1929_v52, %v1648_v59  ;;  %v4698_v47 = vld [vmem:[#allocation54_spill] sm:$0xff] }
 0x253   :  { %2048 = vmatmul.f32.gmra.mxu0 %v4689_v23  ;;  %2238 = vmatmul.f32.gmra.mxu1 %v4690_v8  ;;  %2874 = vst [vmem:[%s4360_s1 + $0x110] sm:$0xff] %v1416_v55  ;;  %v4699_v55 = vld [vmem:[#allocation41_spill] sm:$0xff]  ;;  %v4700_v59 = vld [vmem:[#allocation70_spill] sm:$0xff] }
 0x255   :  { %2495 = vmatmul.f32.gmra.mxu2 %v4691_v58 }
 0x256   :  { %2656 = vmatmul.f32.gmra.mxu3 %v4691_v58 }
 0x258   :  { %v1262_v15 = vpop.f32.mrf.mxu0  ;;  %v1419_v1 = vpop.f32.mrf.mxu1 }
 0x259   :  { %v1933_v19 = vpop.f32.mrf.mxu3  ;;  %v1420_v17 = vadd.f32 %v1419_v1, %v1259_v6  ;;  %v1656_v28 = vpop.f32.mrf.mxu2  ;;  %v1263_v21 = vadd.f32 %v1262_v15, %v4696_v11  ;;  %v4701_v1 = vld [vmem:[#allocation39_spill] sm:$0xff] }
 0x25a   :  { %v4031_v56 = vadd.f32 %v1933_v19, %v1656_v28  ;;  %v4703_v28 = vld [vmem:[#allocation35_spill] sm:$0xff] }
 0x25b   :  { %2053 = vmatmul.f32.gmra.mxu0 %v4693_v48  ;;  %2244 = vmatmul.f32.gmra.mxu1 %v4694_v40  ;;  %2876 = vst [vmem:[%s4360_s1 + $0x120] sm:$0xff] %v1420_v17  ;;  %v4702_v17 = vld [vmem:[#allocation49_spill] sm:$0xff]  ;;  %v4704_v48 = vld [vmem:[#allocation67_spill] sm:$0xff] }
 0x25d   :  { %2499 = vmatmul.f32.gmra.mxu2 %v4695_v2 }
 0x25e   :  { %2660 = vmatmul.f32.gmra.mxu3 %v4695_v2 }
 0x260   :  { %v1266_v53 = vpop.f32.mrf.mxu0  ;;  %v1423_v43 = vpop.f32.mrf.mxu1 }
 0x261   :  { %v1937_v26 = vpop.f32.mrf.mxu3  ;;  %v1424_v22 = vadd.f32 %v1423_v43, %v1263_v21  ;;  %v1664_v37 = vpop.f32.mrf.mxu2  ;;  %v1267_v23 = vadd.f32 %v1266_v53, %v4700_v59 }
 0x262   :  { %v4041_v52 = vadd.f32 %v1937_v26, %v1664_v37  ;;  %v4706_v37 = vld [vmem:[#allocation43_spill] sm:$0xff] }
 0x263   :  { %2058 = vmatmul.f32.gmra.mxu0 %v4697_v27  ;;  %2250 = vmatmul.f32.gmra.mxu1 %v4698_v47  ;;  %2878 = vst [vmem:[%s4360_s1 + $0x130] sm:$0xff] %v1424_v22  ;;  %v4705_v22 = vld [vmem:[#allocation38_spill] sm:$0xff]  ;;  %v4707_v27 = vld [vmem:[#allocation32_spill] sm:$0xff]  ;;  %v4708_v47 = vld [vmem:[#allocation63_spill] sm:$0xff] }
 0x265   :  { %2503 = vmatmul.f32.gmra.mxu2 %v4699_v55 }
 0x266   :  { %2664 = vmatmul.f32.gmra.mxu3 %v4699_v55 }
 0x268   :  { %v1270_v58 = vpop.f32.mrf.mxu0  ;;  %v1427_v0 = vpop.f32.mrf.mxu1 }
 0x269   :  { %v1941_v8 = vpop.f32.mrf.mxu3  ;;  %v1428_v6 = vadd.f32 %v1427_v0, %v1267_v23  ;;  %v1672_v19 = vpop.f32.mrf.mxu2  ;;  %v1271_v40 = vadd.f32 %v1270_v58, %v4704_v48 }
 0x26a   :  { %v4051_v15 = vadd.f32 %v1941_v8, %v1672_v19  ;;  %v4709_v19 = vld [vmem:[#allocation34_spill] sm:$0xff] }
 0x26b   :  { %2063 = vmatmul.f32.gmra.mxu0 %v4701_v1  ;;  %2256 = vmatmul.f32.gmra.mxu1 %v4702_v17  ;;  %2880 = vst [vmem:[%s4360_s1 + $0x140] sm:$0xff] %v1428_v6  ;;  %v4710_v1 = vld [vmem:[#allocation42_spill] sm:$0xff]  ;;  %v4711_v17 = vld [vmem:[#allocation29_spill] sm:$0xff] }
 0x26d   :  { %2507 = vmatmul.f32.gmra.mxu2 %v4703_v28 }
 0x26e   :  { %2668 = vmatmul.f32.gmra.mxu3 %v4703_v28  ;;  %v4712_v28 = vld [vmem:[#allocation58_spill] sm:$0xff] }
 0x270   :  { %v1274_v11 = vpop.f32.mrf.mxu0  ;;  %v1431_v21 = vpop.f32.mrf.mxu1 }
 0x271   :  { %v1945_v2 = vpop.f32.mrf.mxu3  ;;  %v1432_v26 = vadd.f32 %v1431_v21, %v1271_v40  ;;  %v1680_v53 = vpop.f32.mrf.mxu2  ;;  %v1275_v55 = vadd.f32 %v1274_v11, %v4708_v47  ;;  %v4716_v47 = vld [vmem:[#allocation51_spill] sm:$0xff] }
 0x272   :  { %v4061_v43 = vadd.f32 %v1945_v2, %v1680_v53 }
 0x273   :  { %2068 = vmatmul.f32.gmra.mxu0 %v4705_v22  ;;  %2262 = vmatmul.f32.gmra.mxu1 %v4706_v37  ;;  %2882 = vst [vmem:[%s4360_s1 + $0x150] sm:$0xff] %v1432_v26  ;;  %v4713_v22 = vld [vmem:[#allocation30_spill] sm:$0xff]  ;;  %v4714_v37 = vld [vmem:[#allocation37_spill] sm:$0xff] }
 0x275   :  { %2511 = vmatmul.f32.gmra.mxu2 %v4707_v27 }
 0x276   :  { %2672 = vmatmul.f32.gmra.mxu3 %v4707_v27  ;;  %v4715_v27 = vld [vmem:[#allocation25_spill] sm:$0xff] }
 0x278   :  { %v1278_v23 = vpop.f32.mrf.mxu0  ;;  %v1435_v8 = vpop.f32.mrf.mxu1 }
 0x279   :  { %v1949_v59 = vpop.f32.mrf.mxu3  ;;  %v1436_v58 = vadd.f32 %v1435_v8, %v1275_v55  ;;  %v1688_v0 = vpop.f32.mrf.mxu2  ;;  %v1279_v48 = vadd.f32 %v1278_v23, %v4712_v28  ;;  %v4719_v28 = vld [vmem:[#allocation19_spill] sm:$0xff] }
 0x27a   :  { %v4071_v6 = vadd.f32 %v1949_v59, %v1688_v0 }
 0x27b   :  { %2073 = vmatmul.f32.gmra.mxu0 %v4709_v19  ;;  %2268 = vmatmul.f32.gmra.mxu1 %v4710_v1  ;;  %2884 = vst [vmem:[%s4360_s1 + $0x160] sm:$0xff] %v1436_v58  ;;  %v4717_v1 = vld [vmem:[#allocation23_spill] sm:$0xff] }
 0x27d   :  { %2515 = vmatmul.f32.gmra.mxu2 %v4711_v17 }
 0x27e   :  { %2676 = vmatmul.f32.gmra.mxu3 %v4711_v17  ;;  %v4718_v17 = vld [vmem:[#allocation33_spill] sm:$0xff] }
 0x280   :  { %v1282_v2 = vpop.f32.mrf.mxu0  ;;  %v1439_v11 = vpop.f32.mrf.mxu1 }
 0x281   :  { %v1953_v40 = vpop.f32.mrf.mxu3  ;;  %v1440_v21 = vadd.f32 %v1439_v11, %v1279_v48  ;;  %v1696_v26 = vpop.f32.mrf.mxu2  ;;  %v1283_v55 = vadd.f32 %v1282_v2, %v4716_v47  ;;  %v4720_v48 = vld [vmem:[#allocation47_spill] sm:$0xff] }
 0x282   :  { %v4081_v53 = vadd.f32 %v1953_v40, %v1696_v26  ;;  %v4722_v47 = vld [vmem:[#allocation27_spill] sm:$0xff] }
 0x283   :  { %2078 = vmatmul.f32.gmra.mxu0 %v4713_v22  ;;  %2274 = vmatmul.f32.gmra.mxu1 %v4714_v37  ;;  %2886 = vst [vmem:[%s4360_s1 + $0x170] sm:$0xff] %v1440_v21 }
 0x285   :  { %2519 = vmatmul.f32.gmra.mxu2 %v4715_v27 }
 0x286   :  { %2680 = vmatmul.f32.gmra.mxu3 %v4715_v27  ;;  %v4721_v27 = vld [vmem:[#allocation22_spill] sm:$0xff] }
 0x288   :  { %v1286_v23 = vpop.f32.mrf.mxu0  ;;  %v1443_v8 = vpop.f32.mrf.mxu1 }
 0x289   :  { %v1957_v59 = vpop.f32.mrf.mxu3  ;;  %v1444_v58 = vadd.f32 %v1443_v8, %v1283_v55  ;;  %v1704_v0 = vpop.f32.mrf.mxu2  ;;  %v1287_v40 = vadd.f32 %v1286_v23, %v4720_v48  ;;  %v4723_v55 = vld [vmem:[#allocation15_spill] sm:$0xff]  ;;  %v4725_v48 = vld [vmem:[#allocation18_spill] sm:$0xff] }
 0x28a   :  { %v4091_v19 = vadd.f32 %v1957_v59, %v1704_v0  ;;  %v4724_v59 = vld [vmem:[#allocation44_spill] sm:$0xff] }
 0x28b   :  { %2083 = vmatmul.f32.gmra.mxu0 %v4717_v1  ;;  %2280 = vmatmul.f32.gmra.mxu1 %v4718_v17  ;;  %2888 = vst [vmem:[%s4360_s1 + $0x180] sm:$0xff] %v1444_v58 }
 0x28d   :  { %2523 = vmatmul.f32.gmra.mxu2 %v4719_v28 }
 0x28e   :  { %2684 = vmatmul.f32.gmra.mxu3 %v4719_v28 }
 0x290   :  { %v1290_v11 = vpop.f32.mrf.mxu0  ;;  %v1447_v21 = vpop.f32.mrf.mxu1 }
 0x291   :  { %v1961_v2 = vpop.f32.mrf.mxu3  ;;  %v1448_v26 = vadd.f32 %v1447_v21, %v1287_v40  ;;  %v1712_v22 = vpop.f32.mrf.mxu2  ;;  %v1291_v23 = vadd.f32 %v1290_v11, %v4724_v59  ;;  %v4726_v40 = vld [vmem:[#allocation26_spill] sm:$0xff]  ;;  %v4728_v11 = vld [vmem:[#allocation40_spill] sm:$0xff] }
 0x292   :  { %v4101_v37 = vadd.f32 %v1961_v2, %v1712_v22  ;;  %v4727_v2 = vld [vmem:[#allocation11_spill] sm:$0xff] }
 0x293   :  { %2088 = vmatmul.f32.gmra.mxu0 %v4721_v27  ;;  %2286 = vmatmul.f32.gmra.mxu1 %v4722_v47  ;;  %2890 = vst [vmem:[%s4360_s1 + $0x190] sm:$0xff] %v1448_v26 }
 0x295   :  { %2527 = vmatmul.f32.gmra.mxu2 %v4723_v55 }
 0x296   :  { %2688 = vmatmul.f32.gmra.mxu3 %v4723_v55 }
 0x298   :  { %v1294_v58 = vpop.f32.mrf.mxu0  ;;  %v1451_v0 = vpop.f32.mrf.mxu1 }
 0x299   :  { %v1965_v8 = vpop.f32.mrf.mxu3  ;;  %v1452_v1 = vadd.f32 %v1451_v0, %v1291_v23  ;;  %v1720_v17 = vpop.f32.mrf.mxu2  ;;  %v1295_v21 = vadd.f32 %v1294_v58, %v4728_v11  ;;  %v4729_v23 = vld [vmem:[#allocation13_spill] sm:$0xff]  ;;  %v4731_v0 = vld [vmem:[#allocation7_spill] sm:$0xff]  ;;  %v4732_v58 = vld [vmem:[#allocation36_spill] sm:$0xff] }
 0x29a   :  { %v4111_v28 = vadd.f32 %v1965_v8, %v1720_v17  ;;  %v4730_v8 = vld [vmem:[#allocation21_spill] sm:$0xff] }
 0x29b   :  { %2093 = vmatmul.f32.gmra.mxu0 %v4725_v48  ;;  %2292 = vmatmul.f32.gmra.mxu1 %v4726_v40  ;;  %2892 = vst [vmem:[%s4360_s1 + $0x1a0] sm:$0xff] %v1452_v1 }
 0x29d   :  { %2531 = vmatmul.f32.gmra.mxu2 %v4727_v2 }
 0x29e   :  { %2692 = vmatmul.f32.gmra.mxu3 %v4727_v2 }
 0x2a0   :  { %v1298_v22 = vpop.f32.mrf.mxu0  ;;  %v1455_v27 = vpop.f32.mrf.mxu1 }
 0x2a1   :  { %v1969_v26 = vpop.f32.mrf.mxu3  ;;  %v1456_v47 = vadd.f32 %v1455_v27, %v1295_v21  ;;  %v1728_v55 = vpop.f32.mrf.mxu2  ;;  %v1299_v1 = vadd.f32 %v1298_v22, %v4732_v58  ;;  %v4734_v27 = vld [vmem:[#allocation17_spill] sm:$0xff]  ;;  %v4735_v22 = vld [vmem:[#allocation31_spill] sm:$0xff] }
 0x2a2   :  { %v4121_v59 = vadd.f32 %v1969_v26, %v1728_v55  ;;  %v4733_v26 = vld [vmem:[#allocation8_spill] sm:$0xff] }
 0x2a3   :  { %2098 = vmatmul.f32.gmra.mxu0 %v4729_v23  ;;  %2298 = vmatmul.f32.gmra.mxu1 %v4730_v8  ;;  %2894 = vst [vmem:[%s4360_s1 + $0x1b0] sm:$0xff] %v1456_v47 }
 0x2a5   :  { %2535 = vmatmul.f32.gmra.mxu2 %v4731_v0 }
 0x2a6   :  { %2696 = vmatmul.f32.gmra.mxu3 %v4731_v0 }
 0x2a8   :  { %v1302_v48 = vpop.f32.mrf.mxu0  ;;  %v1459_v40 = vpop.f32.mrf.mxu1 }
 0x2a9   :  { %v1973_v17 = vpop.f32.mrf.mxu3  ;;  %v1460_v2 = vadd.f32 %v1459_v40, %v1299_v1  ;;  %v1736_v11 = vpop.f32.mrf.mxu2  ;;  %v1303_v47 = vadd.f32 %v1302_v48, %v4735_v22  ;;  %v4737_v40 = vld [vmem:[#allocation12_spill] sm:$0xff] }
 0x2aa   :  { %v4131_v21 = vadd.f32 %v1973_v17, %v1736_v11  ;;  %v4736_v17 = vld [vmem:[#allocation6_spill] sm:$0xff] }
 0x2ab   :  { %2103 = vmatmul.f32.gmra.mxu0 %v4733_v26  ;;  %2304 = vmatmul.f32.gmra.mxu1 %v4734_v27  ;;  %2896 = vst [vmem:[%s4360_s1 + $0x1c0] sm:$0xff] %v1460_v2 }
 0x2ad   :  { %2539 = vmatmul.f32.gmra.mxu2 %v4671_v36 }
 0x2ae   :  { %2700 = vmatmul.f32.gmra.mxu3 %v4671_v36  ;;  %v4738_v36 = vld [vmem:[#allocation28_spill] sm:$0xff] }
 0x2b0   :  { %v1306_v23 = vpop.f32.mrf.mxu0  ;;  %v1463_v8 = vpop.f32.mrf.mxu1 }
 0x2b1   :  { %v1977_v55 = vpop.f32.mrf.mxu3  ;;  %v1464_v0 = vadd.f32 %v1463_v8, %v1303_v47  ;;  %v1744_v58 = vpop.f32.mrf.mxu2  ;;  %v1307_v48 = vadd.f32 %v1306_v23, %v4738_v36  ;;  %v4740_v8 = vld [vmem:[#allocation10_spill] sm:$0xff] }
 0x2b2   :  { %v4141_v1 = vadd.f32 %v1977_v55, %v1744_v58  ;;  %v4739_v55 = vld [vmem:[#allocation5_spill] sm:$0xff] }
 0x2b3   :  { %2108 = vmatmul.f32.gmra.mxu0 %v4736_v17  ;;  %2310 = vmatmul.f32.gmra.mxu1 %v4737_v40  ;;  %2898 = vst [vmem:[%s4360_s1 + $0x1d0] sm:$0xff] %v1464_v0 }
 0x2b5   :  { %2543 = vmatmul.f32.gmra.mxu2 %v4674_v62 }
 0x2b6   :  { %2704 = vmatmul.f32.gmra.mxu3 %v4674_v62 }
 0x2b8   :  { %v1310_v11 = vpop.f32.mrf.mxu0  ;;  %v1467_v26 = vpop.f32.mrf.mxu1 }
 0x2b9   :  { %v1981_v2 = vpop.f32.mrf.mxu3  ;;  %v1468_v27 = vadd.f32 %v1467_v26, %v1307_v48  ;;  %v1752_v22 = vpop.f32.mrf.mxu2  ;;  %v1311_v62 = vadd.f32 %v1310_v11, %v3847_v9  ;;  %v4741_v48 = vld [vmem:[#allocation88_spill] sm:$0xff] }
 0x2ba   :  { %v4151_v47 = vadd.f32 %v1981_v2, %v1752_v22  ;;  %v4742_v2 = vld [vmem:[#allocation9_spill] sm:$0xff] }
 0x2bb   :  { %2113 = vmatmul.f32.gmra.mxu0 %v4739_v55  ;;  %2316 = vmatmul.f32.gmra.mxu1 %v4740_v8  ;;  %2900 = vst [vmem:[%s4360_s1 + $0x1e0] sm:$0xff] %v1468_v27  ;;  %v4743_v8 = vld [vmem:[#allocation91_spill] sm:$0xff] }
 0x2bd   :  { %2547 = vmatmul.f32.gmra.mxu2 %v4677_v24 }
 0x2be   :  { %2708 = vmatmul.f32.gmra.mxu3 %v4677_v24 }
 0x2c0   :  { %v1471_v0 = vpop.f32.mrf.mxu1  ;;  %v2039_v58 = vpop.f32.mrf.mxu0 }
 0x2c1   :  { %v1985_v23 = vpop.f32.mrf.mxu3  ;;  %v1472_v17 = vadd.f32 %v1471_v0, %v1311_v62  ;;  %v1760_v40 = vpop.f32.mrf.mxu2  ;;  %v2040_v24 = vadd.f32 %v2039_v58, %v3851_v18  ;;  %v4744_v62 = vld [vmem:[#allocation89_spill] sm:$0xff] }
 0x2c2   :  { %v4161_v36 = vadd.f32 %v1985_v23, %v1760_v40 }
 0x2c3   :  { %2118 = vmatmul.f32.gmra.mxu0 %v4741_v48  ;;  %2322 = vmatmul.f32.gmra.mxu1 %v4742_v2  ;;  %2902 = vst [vmem:[%s4360_s1 + $0x1f0] sm:$0xff] %v1472_v17  ;;  %v4745_v2 = vld [vmem:[#allocation94_spill] sm:$0xff] }
 0x2c5   :  { %2551 = vmatmul.f32.gmra.mxu2 %v3481_v31 }
 0x2c6   :  { %2712 = vmatmul.f32.gmra.mxu3 %v3481_v31 }
 0x2c8   :  { %v2044_v11 = vpop.f32.mrf.mxu0  ;;  %v2233_v26 = vpop.f32.mrf.mxu1 }
 0x2c9   :  { %v2649_v9 = vpop.f32.mrf.mxu3  ;;  %v2234_v27 = vadd.f32 %v2233_v26, %v2040_v24  ;;  %v2488_v22 = vpop.f32.mrf.mxu2  ;;  %v2045_v0 = vadd.f32 %v2044_v11, %v3861_v30  ;;  %v4746_v24 = vld [vmem:[#allocation93_spill] sm:$0xff] }
 0x2cb   :  { %v2489_v55 = vadd.f32 %v2488_v22, %v2234_v27  ;;  %2123 = vmatmul.f32.gmra.mxu0 %v4743_v8  ;;  %2328 = vmatmul.f32.gmra.mxu1 %v4744_v62  ;;  %v4747_v8 = vld [vmem:[#allocation99_spill] sm:$0xff]  ;;  %v4748_v62 = vld [vmem:[#allocation98_spill] sm:$0xff] }
 0x2cd   :  { %v2650_v23 = vadd.f32 %v2649_v9, %v2489_v55  ;;  %2555 = vmatmul.f32.gmra.mxu2 %v3504_v5 }
 0x2ce   :  { %2716 = vmatmul.f32.gmra.mxu3 %v3504_v5 }
 0x2cf   :  { %2841 = vst [vmem:[%s4360_s1 + $0x8] sm:$0xff] %v2650_v23 }
 0x2d0   :  { %v2049_v17 = vpop.f32.mrf.mxu0  ;;  %v2239_v18 = vpop.f32.mrf.mxu1 }
 0x2d1   :  { %v2653_v31 = vpop.f32.mrf.mxu3  ;;  %v2240_v58 = vadd.f32 %v2239_v18, %v2045_v0  ;;  %v2492_v40 = vpop.f32.mrf.mxu2  ;;  %v2050_v5 = vadd.f32 %v2049_v17, %v3871_v13 }
 0x2d3   :  { %v2493_v48 = vadd.f32 %v2492_v40, %v2240_v58  ;;  %2128 = vmatmul.f32.gmra.mxu0 %v4745_v2  ;;  %2334 = vmatmul.f32.gmra.mxu1 %v4746_v24  ;;  %v4749_v40 = vld [vmem:[#allocation95_spill] sm:$0xff] }
 0x2d5   :  { %v2654_v9 = vadd.f32 %v2653_v31, %v2493_v48  ;;  %2559 = vmatmul.f32.gmra.mxu2 %v3532_v4  ;;  %v4750_v48 = vld [vmem:[#allocation101_spill] sm:$0xff] }
 0x2d6   :  { %2720 = vmatmul.f32.gmra.mxu3 %v3532_v4 }
 0x2d7   :  { %2843 = vst [vmem:[%s4360_s1 + $0x18] sm:$0xff] %v2654_v9 }
 0x2d8   :  { %v2054_v11 = vpop.f32.mrf.mxu0  ;;  %v2245_v26 = vpop.f32.mrf.mxu1 }
 0x2d9   :  { %v2657_v30 = vpop.f32.mrf.mxu3  ;;  %v2246_v27 = vadd.f32 %v2245_v26, %v2050_v5  ;;  %v2496_v22 = vpop.f32.mrf.mxu2  ;;  %v2055_v4 = vadd.f32 %v2054_v11, %v3881_v50  ;;  %v4751_v26 = vld [vmem:[#allocation96_spill] sm:$0xff] }
 0x2db   :  { %v2497_v55 = vadd.f32 %v2496_v22, %v2246_v27  ;;  %2133 = vmatmul.f32.gmra.mxu0 %v4747_v8  ;;  %2340 = vmatmul.f32.gmra.mxu1 %v4748_v62  ;;  %v4752_v27 = vld [vmem:[#allocation100_spill] sm:$0xff] }
 0x2dd   :  { %v2658_v23 = vadd.f32 %v2657_v30, %v2497_v55  ;;  %2563 = vmatmul.f32.gmra.mxu2 %v3559_v41 }
 0x2de   :  { %2724 = vmatmul.f32.gmra.mxu3 %v3559_v41 }
 0x2df   :  { %2845 = vst [vmem:[%s4360_s1 + $0x28] sm:$0xff] %v2658_v23 }
 0x2e0   :  { %v2059_v0 = vpop.f32.mrf.mxu0  ;;  %v2251_v31 = vpop.f32.mrf.mxu1 }
 0x2e1   :  { %v2661_v13 = vpop.f32.mrf.mxu3  ;;  %v2252_v17 = vadd.f32 %v2251_v31, %v2055_v4  ;;  %v2500_v18 = vpop.f32.mrf.mxu2  ;;  %v2060_v41 = vadd.f32 %v2059_v0, %v3891_v16  ;;  %v4754_v0 = vld [vmem:[#allocation97_spill] sm:$0xff] }
 0x2e3   :  { %v2501_v58 = vadd.f32 %v2500_v18, %v2252_v17  ;;  %2138 = vmatmul.f32.gmra.mxu0 %v4749_v40  ;;  %2346 = vmatmul.f32.gmra.mxu1 %v4750_v48 }
 0x2e5   :  { %v2662_v2 = vadd.f32 %v2661_v13, %v2501_v58  ;;  %2567 = vmatmul.f32.gmra.mxu2 %v3541_v12  ;;  %v4753_v13 = vld [vmem:[#allocation90_spill] sm:$0xff] }
 0x2e6   :  { %2728 = vmatmul.f32.gmra.mxu3 %v3541_v12 }
 0x2e7   :  { %2847 = vst [vmem:[%s4360_s1 + $0x38] sm:$0xff] %v2662_v2  ;;  %v4755_v2 = vld [vmem:[#allocation86_spill] sm:$0xff] }
 0x2e8   :  { %v2064_v24 = vpop.f32.mrf.mxu0  ;;  %v2257_v9 = vpop.f32.mrf.mxu1 }
 0x2e9   :  { %v2665_v50 = vpop.f32.mrf.mxu3  ;;  %v2258_v5 = vadd.f32 %v2257_v9, %v2060_v41  ;;  %v2504_v30 = vpop.f32.mrf.mxu2  ;;  %v2065_v12 = vadd.f32 %v2064_v24, %v3901_v32  ;;  %v4756_v41 = vld [vmem:[#allocation92_spill] sm:$0xff] }
 0x2eb   :  { %v2505_v11 = vadd.f32 %v2504_v30, %v2258_v5  ;;  %2143 = vmatmul.f32.gmra.mxu0 %v4751_v26  ;;  %2352 = vmatmul.f32.gmra.mxu1 %v4752_v27  ;;  %v4757_v26 = vld [vmem:[#allocation84_spill] sm:$0xff]  ;;  %v4758_v27 = vld [vmem:[#allocation87_spill] sm:$0xff] }
 0x2ed   :  { %v2666_v22 = vadd.f32 %v2665_v50, %v2505_v11  ;;  %2571 = vmatmul.f32.gmra.mxu2 %v3550_v14 }
 0x2ee   :  { %2732 = vmatmul.f32.gmra.mxu3 %v3550_v14 }
 0x2ef   :  { %2849 = vst [vmem:[%s4360_s1 + $0x48] sm:$0xff] %v2666_v22 }
 0x2f0   :  { %v2069_v55 = vpop.f32.mrf.mxu0  ;;  %v2263_v8 = vpop.f32.mrf.mxu1 }
 0x2f1   :  { %v2669_v16 = vpop.f32.mrf.mxu3  ;;  %v2264_v62 = vadd.f32 %v2263_v8, %v2065_v12  ;;  %v2508_v23 = vpop.f32.mrf.mxu2  ;;  %v2070_v14 = vadd.f32 %v2069_v55, %v3911_v61 }
 0x2f3   :  { %v2509_v4 = vadd.f32 %v2508_v23, %v2264_v62  ;;  %2148 = vmatmul.f32.gmra.mxu0 %v4753_v13  ;;  %2358 = vmatmul.f32.gmra.mxu1 %v4754_v0  ;;  %v4759_v23 = vld [vmem:[#allocation82_spill] sm:$0xff] }
 0x2f5   :  { %v2670_v31 = vadd.f32 %v2669_v16, %v2509_v4  ;;  %2575 = vmatmul.f32.gmra.mxu2 %v3499_v46  ;;  %v4760_v4 = vld [vmem:[#allocation85_spill] sm:$0xff] }
 0x2f6   :  { %2736 = vmatmul.f32.gmra.mxu3 %v3499_v46 }
 0x2f7   :  { %2851 = vst [vmem:[%s4360_s1 + $0x58] sm:$0xff] %v2670_v31 }
 0x2f8   :  { %v2074_v17 = vpop.f32.mrf.mxu0  ;;  %v2269_v18 = vpop.f32.mrf.mxu1 }
 0x2f9   :  { %v2673_v32 = vpop.f32.mrf.mxu3  ;;  %v2270_v58 = vadd.f32 %v2269_v18, %v2070_v14  ;;  %v2512_v40 = vpop.f32.mrf.mxu2  ;;  %v2075_v46 = vadd.f32 %v2074_v17, %v3921_v3  ;;  %v4761_v18 = vld [vmem:[#allocation80_spill] sm:$0xff] }
 0x2fb   :  { %v2513_v48 = vadd.f32 %v2512_v40, %v2270_v58  ;;  %2153 = vmatmul.f32.gmra.mxu0 %v4755_v2  ;;  %2364 = vmatmul.f32.gmra.mxu1 %v4756_v41  ;;  %v4762_v58 = vld [vmem:[#allocation83_spill] sm:$0xff] }
 0x2fd   :  { %v2674_v50 = vadd.f32 %v2673_v32, %v2513_v48  ;;  %2579 = vmatmul.f32.gmra.mxu2 %v3461_v57 }
 0x2fe   :  { %2740 = vmatmul.f32.gmra.mxu3 %v3461_v57 }
 0x2ff   :  { %2853 = vst [vmem:[%s4360_s1 + $0x68] sm:$0xff] %v2674_v50 }
 0x300   :  { %v2079_v24 = vpop.f32.mrf.mxu0  ;;  %v2275_v9 = vpop.f32.mrf.mxu1 }
 0x301   :  { %v2677_v61 = vpop.f32.mrf.mxu3  ;;  %v2276_v5 = vadd.f32 %v2275_v9, %v2075_v46  ;;  %v2516_v30 = vpop.f32.mrf.mxu2  ;;  %v2080_v57 = vadd.f32 %v2079_v24, %v3931_v49  ;;  %v4764_v24 = vld [vmem:[#allocation81_spill] sm:$0xff] }
 0x303   :  { %v2517_v11 = vadd.f32 %v2516_v30, %v2276_v5  ;;  %2158 = vmatmul.f32.gmra.mxu0 %v4757_v26  ;;  %2370 = vmatmul.f32.gmra.mxu1 %v4758_v27 }
 0x305   :  { %v2678_v22 = vadd.f32 %v2677_v61, %v2517_v11  ;;  %2583 = vmatmul.f32.gmra.mxu2 %v3430_v39  ;;  %v4763_v61 = vld [vmem:[#allocation78_spill] sm:$0xff] }
 0x306   :  { %2744 = vmatmul.f32.gmra.mxu3 %v3430_v39 }
 0x307   :  { %2855 = vst [vmem:[%s4360_s1 + $0x78] sm:$0xff] %v2678_v22  ;;  %v4765_v22 = vld [vmem:[#allocation75_spill] sm:$0xff] }
 0x308   :  { %v2084_v12 = vpop.f32.mrf.mxu0  ;;  %v2281_v16 = vpop.f32.mrf.mxu1 }
 0x309   :  { %v2681_v3 = vpop.f32.mrf.mxu3  ;;  %v2282_v55 = vadd.f32 %v2281_v16, %v2080_v57  ;;  %v2520_v8 = vpop.f32.mrf.mxu2  ;;  %v2085_v39 = vadd.f32 %v2084_v12, %v3941_v10  ;;  %v4766_v57 = vld [vmem:[#allocation79_spill] sm:$0xff] }
 0x30b   :  { %v2521_v62 = vadd.f32 %v2520_v8, %v2282_v55  ;;  %2163 = vmatmul.f32.gmra.mxu0 %v4759_v23  ;;  %2376 = vmatmul.f32.gmra.mxu1 %v4760_v4  ;;  %v4767_v23 = vld [vmem:[#allocation72_spill] sm:$0xff] }
 0x30c   :  { %v4768_v4 = vld [vmem:[#allocation76_spill] sm:$0xff] }
 0x30d   :  { %v2682_v13 = vadd.f32 %v2681_v3, %v2521_v62  ;;  %2587 = vmatmul.f32.gmra.mxu2 %v3397_v54 }
 0x30e   :  { %2748 = vmatmul.f32.gmra.mxu3 %v3397_v54 }
 0x30f   :  { %2857 = vst [vmem:[%s4360_s1 + $0x88] sm:$0xff] %v2682_v13 }
 0x310   :  { %v2089_v0 = vpop.f32.mrf.mxu0  ;;  %v2287_v31 = vpop.f32.mrf.mxu1 }
 0x311   :  { %v2685_v49 = vpop.f32.mrf.mxu3  ;;  %v2288_v14 = vadd.f32 %v2287_v31, %v2085_v39  ;;  %v2524_v32 = vpop.f32.mrf.mxu2  ;;  %v2090_v54 = vadd.f32 %v2089_v0, %v3951_v34 }
 0x313   :  { %v2525_v17 = vadd.f32 %v2524_v32, %v2288_v14  ;;  %2168 = vmatmul.f32.gmra.mxu0 %v4761_v18  ;;  %2382 = vmatmul.f32.gmra.mxu1 %v4762_v58  ;;  %v4769_v32 = vld [vmem:[#allocation65_spill] sm:$0xff] }
 0x315   :  { %v2686_v40 = vadd.f32 %v2685_v49, %v2525_v17  ;;  %2591 = vmatmul.f32.gmra.mxu2 %v3363_v63  ;;  %v4770_v17 = vld [vmem:[#allocation73_spill] sm:$0xff] }
 0x316   :  { %2752 = vmatmul.f32.gmra.mxu3 %v3363_v63 }
 0x317   :  { %2859 = vst [vmem:[%s4360_s1 + $0x98] sm:$0xff] %v2686_v40 }
 0x318   :  { %v2094_v48 = vpop.f32.mrf.mxu0  ;;  %v2293_v2 = vpop.f32.mrf.mxu1 }
 0x319   :  { %v2689_v10 = vpop.f32.mrf.mxu3  ;;  %v2294_v41 = vadd.f32 %v2293_v2, %v2090_v54  ;;  %v2528_v50 = vpop.f32.mrf.mxu2  ;;  %v2095_v63 = vadd.f32 %v2094_v48, %v3961_v20  ;;  %v4771_v2 = vld [vmem:[#allocation56_spill] sm:$0xff] }
 0x31b   :  { %v2529_v46 = vadd.f32 %v2528_v50, %v2294_v41  ;;  %2173 = vmatmul.f32.gmra.mxu0 %v4763_v61  ;;  %2388 = vmatmul.f32.gmra.mxu1 %v4764_v24  ;;  %v4772_v41 = vld [vmem:[#allocation66_spill] sm:$0xff] }
 0x31d   :  { %v2690_v9 = vadd.f32 %v2689_v10, %v2529_v46  ;;  %2595 = vmatmul.f32.gmra.mxu2 %v3330_v29 }
 0x31e   :  { %2756 = vmatmul.f32.gmra.mxu3 %v3330_v29 }
 0x31f   :  { %2861 = vst [vmem:[%s4360_s1 + $0xa8] sm:$0xff] %v2690_v9 }
 0x320   :  { %v2099_v5 = vpop.f32.mrf.mxu0  ;;  %v2299_v30 = vpop.f32.mrf.mxu1 }
 0x321   :  { %v2693_v34 = vpop.f32.mrf.mxu3  ;;  %v2300_v11 = vadd.f32 %v2299_v30, %v2095_v63  ;;  %v2532_v26 = vpop.f32.mrf.mxu2  ;;  %v2100_v29 = vadd.f32 %v2099_v5, %v3971_v51 }
 0x323   :  { %v2533_v27 = vadd.f32 %v2532_v26, %v2300_v11  ;;  %2178 = vmatmul.f32.gmra.mxu0 %v4765_v22  ;;  %2394 = vmatmul.f32.gmra.mxu1 %v4766_v57 }
 0x325   :  { %v2694_v3 = vadd.f32 %v2693_v34, %v2533_v27  ;;  %2599 = vmatmul.f32.gmra.mxu2 %v3297_v7  ;;  %v4773_v34 = vld [vmem:[#allocation61_spill] sm:$0xff] }
 0x326   :  { %2760 = vmatmul.f32.gmra.mxu3 %v3297_v7 }
 0x327   :  { %2863 = vst [vmem:[%s4360_s1 + $0xb8] sm:$0xff] %v2694_v3 }
 0x328   :  { %v2104_v12 = vpop.f32.mrf.mxu0  ;;  %v2305_v16 = vpop.f32.mrf.mxu1 }
 0x329   :  { %v2697_v20 = vpop.f32.mrf.mxu3  ;;  %v2306_v55 = vadd.f32 %v2305_v16, %v2100_v29  ;;  %v2536_v8 = vpop.f32.mrf.mxu2  ;;  %v2105_v7 = vadd.f32 %v2104_v12, %v3981_v42 }
 0x32b   :  { %v2537_v62 = vadd.f32 %v2536_v8, %v2306_v55  ;;  %2183 = vmatmul.f32.gmra.mxu0 %v4767_v23  ;;  %2400 = vmatmul.f32.gmra.mxu1 %v4768_v4 }
 0x32d   :  { %v2698_v13 = vadd.f32 %v2697_v20, %v2537_v62  ;;  %2603 = vmatmul.f32.gmra.mxu2 %v3263_v25 }
 0x32e   :  { %2764 = vmatmul.f32.gmra.mxu3 %v3263_v25 }
 0x32f   :  { %2865 = vst [vmem:[%s4360_s1 + $0xc8] sm:$0xff] %v2698_v13 }
 0x330   :  { %v2109_v39 = vpop.f32.mrf.mxu0  ;;  %v2311_v49 = vpop.f32.mrf.mxu1 }
 0x331   :  { %v2701_v51 = vpop.f32.mrf.mxu3  ;;  %v2312_v0 = vadd.f32 %v2311_v49, %v2105_v7  ;;  %v2540_v31 = vpop.f32.mrf.mxu2  ;;  %v2110_v25 = vadd.f32 %v2109_v39, %v3991_v35 }
 0x333   :  { %v2541_v14 = vadd.f32 %v2540_v31, %v2312_v0  ;;  %2188 = vmatmul.f32.gmra.mxu0 %v4769_v32  ;;  %2406 = vmatmul.f32.gmra.mxu1 %v4770_v17 }
 0x335   :  { %v2702_v18 = vadd.f32 %v2701_v51, %v2541_v14  ;;  %2607 = vmatmul.f32.gmra.mxu2 %v3203_v45 }
 0x336   :  { %2768 = vmatmul.f32.gmra.mxu3 %v3203_v45 }
 0x337   :  { %2867 = vst [vmem:[%s4360_s1 + $0xd8] sm:$0xff] %v2702_v18 }
 0x338   :  { %v2114_v58 = vpop.f32.mrf.mxu0  ;;  %v2317_v40 = vpop.f32.mrf.mxu1 }
 0x339   :  { %v2705_v42 = vpop.f32.mrf.mxu3  ;;  %v2318_v54 = vadd.f32 %v2317_v40, %v2110_v25  ;;  %v2544_v10 = vpop.f32.mrf.mxu2  ;;  %v2115_v45 = vadd.f32 %v2114_v58, %v4001_v44 }
 0x33b   :  { %v2545_v48 = vadd.f32 %v2544_v10, %v2318_v54  ;;  %2193 = vmatmul.f32.gmra.mxu0 %v4771_v2  ;;  %2412 = vmatmul.f32.gmra.mxu1 %v4772_v41 }
 0x33d   :  { %v2706_v50 = vadd.f32 %v2705_v42, %v2545_v48  ;;  %2611 = vmatmul.f32.gmra.mxu2 %v3157_v38 }
 0x33e   :  { %2772 = vmatmul.f32.gmra.mxu3 %v3157_v38 }
 0x33f   :  { %2869 = vst [vmem:[%s4360_s1 + $0xe8] sm:$0xff] %v2706_v50 }
 0x340   :  { %v2119_v46 = vpop.f32.mrf.mxu0  ;;  %v2323_v61 = vpop.f32.mrf.mxu1 }
 0x341   :  { %v2709_v35 = vpop.f32.mrf.mxu3  ;;  %v2324_v24 = vadd.f32 %v2323_v61, %v2115_v45  ;;  %v2548_v9 = vpop.f32.mrf.mxu2  ;;  %v2120_v30 = vadd.f32 %v2119_v46, %v4011_v33 }
 0x343   :  { %v2549_v63 = vadd.f32 %v2548_v9, %v2324_v24  ;;  %2418 = vmatmul.f32.gmra.mxu1 %v4773_v34 }
 0x345   :  { %v2710_v5 = vadd.f32 %v2709_v35, %v2549_v63 }
 0x347   :  { %2871 = vst [vmem:[%s4360_s1 + $0xf8] sm:$0xff] %v2710_v5 }
 0x348   :  { %v2124_v26 = vpop.f32.mrf.mxu0  ;;  %v2329_v38 = vpop.f32.mrf.mxu1 }
 0x349   :  { %v2713_v11 = vpop.f32.mrf.mxu3  ;;  %v2330_v44 = vadd.f32 %v2329_v38, %v2120_v30  ;;  %v2552_v27 = vpop.f32.mrf.mxu2  ;;  %v2125_v3 = vadd.f32 %v2124_v26, %v4021_v60 }
 0x34b   :  { %v2553_v22 = vadd.f32 %v2552_v27, %v2330_v44 }
 0x34d   :  { %v2714_v57 = vadd.f32 %v2713_v11, %v2553_v22 }
 0x34f   :  { %2873 = vst [vmem:[%s4360_s1 + $0x108] sm:$0xff] %v2714_v57 }
 0x350   :  { %v2129_v20 = vpop.f32.mrf.mxu0  ;;  %v2335_v12 = vpop.f32.mrf.mxu1 }
 0x351   :  { %v2717_v29 = vpop.f32.mrf.mxu3  ;;  %v2336_v33 = vadd.f32 %v2335_v12, %v2125_v3  ;;  %v2556_v16 = vpop.f32.mrf.mxu2  ;;  %v2130_v62 = vadd.f32 %v2129_v20, %v4031_v56 }
 0x353   :  { %v2557_v55 = vadd.f32 %v2556_v16, %v2336_v33 }
 0x355   :  { %v2718_v8 = vadd.f32 %v2717_v29, %v2557_v55 }
 0x357   :  { %2875 = vst [vmem:[%s4360_s1 + $0x118] sm:$0xff] %v2718_v8 }
 0x358   :  { %v2134_v4 = vpop.f32.mrf.mxu0  ;;  %v2341_v13 = vpop.f32.mrf.mxu1 }
 0x359   :  { %v2721_v23 = vpop.f32.mrf.mxu3  ;;  %v2342_v60 = vadd.f32 %v2341_v13, %v2130_v62  ;;  %v2560_v7 = vpop.f32.mrf.mxu2  ;;  %v2135_v49 = vadd.f32 %v2134_v4, %v4041_v52 }
 0x35b   :  { %v2561_v51 = vadd.f32 %v2560_v7, %v2342_v60 }
 0x35d   :  { %v2722_v39 = vadd.f32 %v2721_v23, %v2561_v51 }
 0x35f   :  { %2877 = vst [vmem:[%s4360_s1 + $0x128] sm:$0xff] %v2722_v39 }
 0x360   :  { %v2139_v31 = vpop.f32.mrf.mxu0  ;;  %v2347_v14 = vpop.f32.mrf.mxu1 }
 0x361   :  { %v2725_v0 = vpop.f32.mrf.mxu3  ;;  %v2348_v56 = vadd.f32 %v2347_v14, %v2135_v49  ;;  %v2564_v32 = vpop.f32.mrf.mxu2  ;;  %v2140_v25 = vadd.f32 %v2139_v31, %v4051_v15 }
 0x363   :  { %v2565_v17 = vadd.f32 %v2564_v32, %v2348_v56 }
 0x365   :  { %v2726_v18 = vadd.f32 %v2725_v0, %v2565_v17 }
 0x367   :  { %2879 = vst [vmem:[%s4360_s1 + $0x138] sm:$0xff] %v2726_v18 }
 0x368   :  { %v2144_v58 = vpop.f32.mrf.mxu0  ;;  %v2353_v40 = vpop.f32.mrf.mxu1 }
 0x369   :  { %v2729_v42 = vpop.f32.mrf.mxu3  ;;  %v2354_v52 = vadd.f32 %v2353_v40, %v2140_v25  ;;  %v2568_v54 = vpop.f32.mrf.mxu2  ;;  %v2145_v2 = vadd.f32 %v2144_v58, %v4061_v43 }
 0x36b   :  { %v2569_v10 = vadd.f32 %v2568_v54, %v2354_v52 }
 0x36d   :  { %v2730_v48 = vadd.f32 %v2729_v42, %v2569_v10 }
 0x36f   :  { %2881 = vst [vmem:[%s4360_s1 + $0x148] sm:$0xff] %v2730_v48 }
 0x370   :  { %v2149_v50 = vpop.f32.mrf.mxu0  ;;  %v2359_v45 = vpop.f32.mrf.mxu1 }
 0x371   :  { %v2733_v41 = vpop.f32.mrf.mxu3  ;;  %v2360_v15 = vadd.f32 %v2359_v45, %v2145_v2  ;;  %v2572_v35 = vpop.f32.mrf.mxu2  ;;  %v2150_v24 = vadd.f32 %v2149_v50, %v4071_v6 }
 0x373   :  { %v2573_v46 = vadd.f32 %v2572_v35, %v2360_v15 }
 0x375   :  { %v2734_v61 = vadd.f32 %v2733_v41, %v2573_v46 }
 0x377   :  { %2883 = vst [vmem:[%s4360_s1 + $0x158] sm:$0xff] %v2734_v61 }
 0x378   :  { %v2154_v63 = vpop.f32.mrf.mxu0  ;;  %v2365_v34 = vpop.f32.mrf.mxu1 }
 0x379   :  { %v2737_v9 = vpop.f32.mrf.mxu3  ;;  %v2366_v43 = vadd.f32 %v2365_v34, %v2150_v24  ;;  %v2576_v5 = vpop.f32.mrf.mxu2  ;;  %v2155_v26 = vadd.f32 %v2154_v63, %v4081_v53 }
 0x37b   :  { %v2577_v30 = vadd.f32 %v2576_v5, %v2366_v43 }
 0x37d   :  { %v2738_v11 = vadd.f32 %v2737_v9, %v2577_v30 }
 0x37f   :  { %2885 = vst [vmem:[%s4360_s1 + $0x168] sm:$0xff] %v2738_v11 }
 0x380   :  { %v2159_v44 = vpop.f32.mrf.mxu0  ;;  %v2371_v27 = vpop.f32.mrf.mxu1 }
 0x381   :  { %v2741_v38 = vpop.f32.mrf.mxu3  ;;  %v2372_v6 = vadd.f32 %v2371_v27, %v2155_v26  ;;  %v2580_v22 = vpop.f32.mrf.mxu2  ;;  %v2160_v29 = vadd.f32 %v2159_v44, %v4091_v19 }
 0x383   :  { %v2581_v57 = vadd.f32 %v2580_v22, %v2372_v6 }
 0x385   :  { %v2742_v3 = vadd.f32 %v2741_v38, %v2581_v57 }
 0x387   :  { %2887 = vst [vmem:[%s4360_s1 + $0x178] sm:$0xff] %v2742_v3 }
 0x388   :  { %v2164_v12 = vpop.f32.mrf.mxu0  ;;  %v2377_v33 = vpop.f32.mrf.mxu1 }
 0x389   :  { %v2745_v20 = vpop.f32.mrf.mxu3  ;;  %v2378_v53 = vadd.f32 %v2377_v33, %v2160_v29  ;;  %v2584_v16 = vpop.f32.mrf.mxu2  ;;  %v2165_v62 = vadd.f32 %v2164_v12, %v4101_v37 }
 0x38b   :  { %v2585_v55 = vadd.f32 %v2584_v16, %v2378_v53 }
 0x38d   :  { %v2746_v8 = vadd.f32 %v2745_v20, %v2585_v55 }
 0x38f   :  { %2889 = vst [vmem:[%s4360_s1 + $0x188] sm:$0xff] %v2746_v8 }
 0x390   :  { %v2169_v4 = vpop.f32.mrf.mxu0  ;;  %v2383_v13 = vpop.f32.mrf.mxu1 }
 0x391   :  { %v2749_v23 = vpop.f32.mrf.mxu3  ;;  %v2384_v19 = vadd.f32 %v2383_v13, %v2165_v62  ;;  %v2588_v60 = vpop.f32.mrf.mxu2  ;;  %v2170_v39 = vadd.f32 %v2169_v4, %v4111_v28 }
 0x393   :  { %v2589_v7 = vadd.f32 %v2588_v60, %v2384_v19 }
 0x395   :  { %v2750_v51 = vadd.f32 %v2749_v23, %v2589_v7 }
 0x397   :  { %2891 = vst [vmem:[%s4360_s1 + $0x198] sm:$0xff] %v2750_v51 }
 0x398   :  { %v2174_v0 = vpop.f32.mrf.mxu0  ;;  %v2389_v31 = vpop.f32.mrf.mxu1 }
 0x399   :  { %v2753_v49 = vpop.f32.mrf.mxu3  ;;  %v2390_v37 = vadd.f32 %v2389_v31, %v2170_v39  ;;  %v2592_v14 = vpop.f32.mrf.mxu2  ;;  %v2175_v17 = vadd.f32 %v2174_v0, %v4121_v59 }
 0x39b   :  { %v2593_v56 = vadd.f32 %v2592_v14, %v2390_v37 }
 0x39d   :  { %v2754_v32 = vadd.f32 %v2753_v49, %v2593_v56 }
 0x39f   :  { %2893 = vst [vmem:[%s4360_s1 + $0x1a8] sm:$0xff] %v2754_v32 }
 0x3a0   :  { %v2179_v25 = vpop.f32.mrf.mxu0  ;;  %v2395_v42 = vpop.f32.mrf.mxu1 }
 0x3a1   :  { %v2757_v18 = vpop.f32.mrf.mxu3  ;;  %v2396_v28 = vadd.f32 %v2395_v42, %v2175_v17  ;;  %v2596_v58 = vpop.f32.mrf.mxu2  ;;  %v2180_v54 = vadd.f32 %v2179_v25, %v4131_v21 }
 0x3a3   :  { %v2597_v40 = vadd.f32 %v2596_v58, %v2396_v28 }
 0x3a5   :  { %v2758_v52 = vadd.f32 %v2757_v18, %v2597_v40 }
 0x3a7   :  { %2895 = vst [vmem:[%s4360_s1 + $0x1b8] sm:$0xff] %v2758_v52 }
 0x3a8   :  { %v2184_v48 = vpop.f32.mrf.mxu0  ;;  %v2401_v2 = vpop.f32.mrf.mxu1 }
 0x3a9   :  { %v2761_v10 = vpop.f32.mrf.mxu3  ;;  %v2402_v59 = vadd.f32 %v2401_v2, %v2180_v54  ;;  %v2600_v41 = vpop.f32.mrf.mxu2  ;;  %v2185_v15 = vadd.f32 %v2184_v48, %v4141_v1 }
 0x3ab   :  { %v2601_v50 = vadd.f32 %v2600_v41, %v2402_v59 }
 0x3ad   :  { %v2762_v45 = vadd.f32 %v2761_v10, %v2601_v50 }
 0x3af   :  { %2897 = vst [vmem:[%s4360_s1 + $0x1c8] sm:$0xff] %v2762_v45 }
 0x3b0   :  { %v2407_v46 = vpop.f32.mrf.mxu1  ;;  %v2189_v24 = vpop.f32.mrf.mxu0 }
 0x3b1   :  { %v2765_v35 = vpop.f32.mrf.mxu3  ;;  %v2408_v21 = vadd.f32 %v2407_v46, %v2185_v15  ;;  %v2604_v61 = vpop.f32.mrf.mxu2  ;;  %v2190_v34 = vadd.f32 %v2189_v24, %v4151_v47 }
 0x3b3   :  { %v2605_v9 = vadd.f32 %v2604_v61, %v2408_v21 }
 0x3b5   :  { %v2766_v63 = vadd.f32 %v2765_v35, %v2605_v9 }
 0x3b7   :  { %2899 = vst [vmem:[%s4360_s1 + $0x1d8] sm:$0xff] %v2766_v63 }
 0x3b8   :  { %v2413_v43 = vpop.f32.mrf.mxu1  ;;  %v2194_v26 = vpop.f32.mrf.mxu0 }
 0x3b9   :  { %v2769_v5 = vpop.f32.mrf.mxu3  ;;  %v2414_v1 = vadd.f32 %v2413_v43, %v2190_v34  ;;  %v2608_v30 = vpop.f32.mrf.mxu2  ;;  %v2195_v44 = vadd.f32 %v2194_v26, %v4161_v36 }
 0x3bb   :  { %v2609_v11 = vadd.f32 %v2608_v30, %v2414_v1 }
 0x3bd   :  { %v2770_v38 = vadd.f32 %v2769_v5, %v2609_v11 }
 0x3bf   :  { %2901 = vst [vmem:[%s4360_s1 + $0x1e8] sm:$0xff] %v2770_v38 }
 0x3c0   :  { %v2419_v27 = vpop.f32.mrf.mxu1 }
 0x3c1   :  { %v2420_v6 = vadd.f32 %v2419_v27, %v2195_v44  ;;  %v2612_v47 = vpop.f32.mrf.mxu2  ;;  %v2773_v22 = vpop.f32.mrf.mxu3 }
 0x3c3   :  { %v2613_v57 = vadd.f32 %v2612_v47, %v2420_v6 }
 0x3c5   :  { %v2774_v3 = vadd.f32 %v2773_v22, %v2613_v57 }
 0x3c7   :  { %2903 = vst [vmem:[%s4360_s1 + $0x1f8] sm:$0xff] %v2774_v3 }

// kernel: _music_spectrum_impl.3
= control target key start
LH: loop header
LB: loop body
LE: loop exit
PB: predicated region body
PF: predicated region fallthrough
CT: control target
= control target key end

     0   :  { %vm45_vm0 = vcmask 130048   ;;  %vm1662_vm7 = vcmask 1041409   ;;  %vm1664_vm14 = vcmask 1042434   ;;  %s2664_s1 = inlined_call_operand.vmem [shape: f32[16,128], index: 1, kind: input, shape index: {}]   ;;  %s2665_s0 = inlined_call_operand.vmem [shape: f32[256,16], index: 0, kind: input, shape index: {}]   ;;  %s2666_s2 = inlined_call_operand.vmem [shape: f32[16,128], index: 2, kind: output, shape index: {}]  }
   0x1   :  { %v44_v0 = vld [vmem:[%s2664_s1 + $0x8] sm:$0xff]  ;;  %v43_v1 = vld [vmem:[%s2664_s1] sm:$0xff]  ;;  %v29_v8 = vld [vmem:[%s2665_s0 + $0x90] sm:$0xff] }
   0x2   :  { %v27_v2 = vld [vmem:[%s2665_s0 + $0x80] sm:$0xff]  ;;  %v1751_v3 = vand.u32 4294901760, %v44_v0  ;;  %v1753_v4 = vand.u32 4294901760, %v43_v1  ;;  %v28_v6 = vld [vmem:[%s2665_s0 + $0x88] sm:$0xff]  ;;  %v101_v18 = vsel %vm45_vm0, %v29_v8, 0  ;;  %v13_v33 = vld [vmem:[%s2665_s0 + $0x10] sm:$0xff] }
   0x3   :  { %v95_v5 = vsel %vm45_vm0, %v27_v2, 0  ;;  %v11_v7 = vld [vmem:[%s2665_s0] sm:$0xff]  ;;  %v98_v10 = vsel %vm45_vm0, %v28_v6, 0  ;;  %v12_v12 = vld [vmem:[%s2665_s0 + $0x8] sm:$0xff]  ;;  %v1801_v31 = vand.u32 4294901760, %v101_v18  ;;  %v30_v39 = vld [vmem:[%s2665_s0 + $0x98] sm:$0xff] }
   0x4   :  { %v1765_v9 = vand.u32 4294901760, %v95_v5  ;;  %v47_v11 = vsel %vm45_vm0, %v11_v7, 0  ;;  %1691 = vmatpush.msra.mxu2 %v1751_v3  ;;  %v432_v13 = vsub.f32 %v44_v0, %v1751_v3  ;;  %v438_v14 = vsub.f32 %v43_v1, %v1753_v4  ;;  %157 = vmatpush.msra.mxu0 %v1751_v3  ;;  %v14_v45 = vld [vmem:[%s2665_s0 + $0x18] sm:$0xff]  ;;  %v31_v55 = vld [vmem:[%s2665_s0 + $0xa0] sm:$0xff] }
   0x5   :  { %v1776_v15 = vand.u32 4294901760, %v98_v10  ;;  %v1778_v16 = vand.u32 4294901760, %v47_v11  ;;  %v50_v19 = vsel %vm45_vm0, %v12_v12, 0  ;;  %v53_v41 = vsel %vm45_vm0, %v13_v33, 0  ;;  %v15_v59 = vld [vmem:[%s2665_s0 + $0x20] sm:$0xff] }
   0x6   :  { %v1781_v17 = vsub.f32 %v95_v5, %v1765_v9  ;;  %1692 = vmatpush.msra.mxu2 %v1753_v4  ;;  %v433_v20 = vand.u32 4294901760, %v432_v13  ;;  %v439_v21 = vand.u32 4294901760, %v438_v14  ;;  %159 = vmatpush.msra.mxu0 %v1753_v4  ;;  %v1794_v25 = vand.u32 4294901760, %v50_v19  ;;  %v32_v5 = vld [vmem:[%s2665_s0 + $0xa8] sm:$0xff] }
   0x7   :  { %v1787_v22 = vsub.f32 %v98_v10, %v1776_v15  ;;  %v1791_v23 = vsub.f32 %v47_v11, %v1778_v16  ;;  %v1821_v43 = vsub.f32 %v101_v18, %v1801_v31  ;;  %v1823_v44 = vand.u32 4294901760, %v53_v41  ;;  %v16_v10 = vld [vmem:[%s2665_s0 + $0x28] sm:$0xff] }
   0x8   :  { %v2676_v24 = vand.u32 4294901760, %v1781_v17  ;;  %588 = vmatpush.msrb.mxu2 %v432_v13  ;;  %v434_v26 = vsub.f32 %v432_v13, %v433_v20  ;;  %v440_v27 = vsub.f32 %v438_v14, %v439_v21  ;;  %981 = vmatpush.msrb.mxu0 %v433_v20  ;;  %v1804_v32 = vsub.f32 %v50_v19, %v1794_v25 }
   0x9   :  { %v2689_v28 = vand.u32 4294901760, %v1791_v23  ;;  %v2674_v30 = vand.u32 4294901760, %v1787_v22  ;;  %v104_v46 = vsel %vm45_vm0, %v30_v39, 0  ;;  %v1834_v48 = vsub.f32 %v53_v41, %v1823_v44 }
   0xa   :  { %v291_v29 = vsub.f32 %v1781_v17, %v2676_v24  ;;  %591 = vmatpush.msrb.mxu2 %v438_v14  ;;  %v435_v34 = vand.u32 4294901760, %v434_v26  ;;  %v441_v35 = vand.u32 4294901760, %v440_v27  ;;  %985 = vmatpush.msrb.mxu0 %v439_v21  ;;  %v2688_v38 = vand.u32 4294901760, %v1804_v32  ;;  %v33_v27 = vld [vmem:[%s2665_s0 + $0xb0] sm:$0xff] }
   0xb   :  { %v163_v36 = vsub.f32 %v1791_v23, %v2689_v28  ;;  %v299_v42 = vsub.f32 %v1787_v22, %v2674_v30  ;;  %v56_v49 = vsel %vm45_vm0, %v14_v45, 0  ;;  %v2673_v51 = vand.u32 4294901760, %v1821_v43 }
   0xc   :  { %v292_v37 = vand.u32 4294901760, %v291_v29  ;;  %1693 = vmatpush.msra.mxu3 %v435_v34  ;;  %436 = vmatpush.msra.mxu1 %v435_v34  ;;  %v171_v47 = vsub.f32 %v1804_v32, %v2688_v38  ;;  %v1841_v52 = vand.u32 4294901760, %v104_v46  ;;  %v2686_v54 = vand.u32 4294901760, %v1834_v48 }
   0xd   :  { %v164_v40 = vand.u32 4294901760, %v163_v36  ;;  %v300_v50 = vand.u32 4294901760, %v299_v42  ;;  %v1848_v56 = vand.u32 4294901760, %v56_v49  ;;  %v307_v57 = vsub.f32 %v1821_v43, %v2673_v51 }
   0xe   :  { %293 = vmatmul.f32.vlgmr.msra.gmra.mxu2 %v292_v37  ;;  %1694 = vmatpush.msra.mxu3 %v441_v35  ;;  %v172_v53 = vand.u32 4294901760, %v171_v47  ;;  %v1855_v58 = vsub.f32 %v104_v46, %v1841_v52  ;;  %v107_v60 = vsel %vm45_vm0, %v31_v55, 0  ;;  %v179_v61 = vsub.f32 %v1834_v48, %v2686_v54 }
   0xf   :  { %442 = vmatpush.msra.mxu1 %v441_v35  ;;  %508 = vmatmul.f32.vlgmr.msra.gmra.mxu3 %v1765_v9  ;;  %v1866_v62 = vsub.f32 %v56_v49, %v1848_v56  ;;  %v59_v63 = vsel %vm45_vm0, %v15_v59, 0  ;;  %v308_v0 = vand.u32 4294901760, %v307_v57  ;;  %v1871_v2 = vand.u32 4294901760, %v107_v60  ;;  %v17_v35 = vld [vmem:[%s2665_s0 + $0x30] sm:$0xff]  ;;  %v34_v49 = vld [vmem:[%s2665_s0 + $0xb8] sm:$0xff] }
  0x10   :  { %165 = vmatmul.f32.vlgmr.msra.gmra.mxu0 %v164_v40  ;;  %768 = vmatpush.msrb.mxu3 %v1751_v3  ;;  %v2672_v1 = vand.u32 4294901760, %v1855_v58  ;;  %v1877_v6 = vand.u32 4294901760, %v59_v63  ;;  %v110_v11 = vsel %vm45_vm0, %v32_v5, 0  ;;  %v62_v14 = vsel %vm45_vm0, %v16_v10, 0  ;;  %v18_v57 = vld [vmem:[%s2665_s0 + $0x38] sm:$0xff] }
  0x11   :  { %444 = vmatmul.f32.vlgmr.msra.gmra.mxu1 %v1778_v16  ;;  %v1883_v8 = vsub.f32 %v107_v60, %v1871_v2  ;;  %v1899_v20 = vand.u32 4294901760, %v110_v11  ;;  %v1905_v29 = vand.u32 4294901760, %v62_v14  ;;  %v113_v36 = vsel %vm45_vm0, %v33_v27, 0 }
  0x12   :  { %1130 = vmatpush.msrb.mxu1 %v1751_v3  ;;  %770 = vmatpush.msrb.mxu3 %v1753_v4  ;;  %v180_v3 = vand.u32 4294901760, %v179_v61  ;;  %v315_v7 = vsub.f32 %v1855_v58, %v2672_v1  ;;  %v1894_v13 = vsub.f32 %v59_v63, %v1877_v6  ;;  %v65_v40 = vsel %vm45_vm0, %v17_v35, 0 }
  0x13   :  { %v2671_v19 = vand.u32 4294901760, %v1883_v8  ;;  %v1911_v34 = vsub.f32 %v110_v11, %v1899_v20  ;;  %v1922_v39 = vsub.f32 %v62_v14, %v1905_v29  ;;  %v1927_v45 = vand.u32 4294901760, %v113_v36  ;;  %v35_v11 = vld [vmem:[%s2665_s0 + $0xc0] sm:$0xff] }
  0x14   :  { %1132 = vmatpush.msrb.mxu1 %v1753_v4  ;;  %v2684_v4 = vand.u32 4294901760, %v1866_v62  ;;  %v316_v18 = vand.u32 4294901760, %v315_v7  ;;  %v2683_v26 = vand.u32 4294901760, %v1894_v13  ;;  %v116_v59 = vsel %vm45_vm0, %v34_v49, 0 }
  0x15   :  { %v323_v33 = vsub.f32 %v1883_v8, %v2671_v19  ;;  %v2670_v42 = vand.u32 4294901760, %v1911_v34  ;;  %v2682_v47 = vand.u32 4294901760, %v1922_v39  ;;  %v1939_v55 = vsub.f32 %v113_v36, %v1927_v45 }
  0x16   :  { %301 = vmatmul.f32.gmra.mxu2 %v300_v50  ;;  %v187_v12 = vsub.f32 %v1866_v62, %v2684_v4  ;;  %v195_v37 = vsub.f32 %v1894_v13, %v2683_v26  ;;  %v1933_v50 = vand.u32 4294901760, %v65_v40  ;;  %v68_v63 = vsel %vm45_vm0, %v18_v57, 0 }
  0x17   :  { %512 = vmatmul.f32.gmra.mxu3 %v1776_v15  ;;  %v324_v41 = vand.u32 4294901760, %v323_v33  ;;  %v203_v60 = vsub.f32 %v1922_v39, %v2682_v47  ;;  %v1955_v5 = vand.u32 4294901760, %v116_v59  ;;  %v119_v27 = vsel %vm45_vm0, %v35_v11, 0 }
  0x18   :  { %173 = vmatmul.f32.gmra.mxu0 %v172_v53  ;;  %v188_v21 = vand.u32 4294901760, %v187_v12  ;;  %v196_v46 = vand.u32 4294901760, %v195_v37  ;;  %v331_v53 = vsub.f32 %v1911_v34, %v2670_v42  ;;  %v1950_v61 = vsub.f32 %v65_v40, %v1933_v50 }
  0x19   :  { %448 = vmatmul.f32.gmra.mxu1 %v1794_v25  ;;  %v204_v7 = vand.u32 4294901760, %v203_v60  ;;  %v1961_v12 = vand.u32 4294901760, %v68_v63 }
  0x1a   :  { %v2680_v10 = vand.u32 4294901760, %v1950_v61 }
  0x1b   :  { %v1978_v35 = vsub.f32 %v68_v63, %v1961_v12  ;;  %v20_v63 = vld [vmem:[%s2665_s0 + $0x48] sm:$0xff] }
  0x1c   :  { %v211_v33 = vsub.f32 %v1950_v61, %v2680_v10 }
  0x1d   :  { %v2678_v49 = vand.u32 4294901760, %v1978_v35 }
  0x1e   :  { %309 = vmatmul.f32.gmra.mxu2 %v308_v0  ;;  %v332_v0 = vand.u32 4294901760, %v331_v53  ;;  %v36_v53 = vld [vmem:[%s2665_s0 + $0xc8] sm:$0xff] }
  0x1f   :  { %516 = vmatmul.f32.gmra.mxu3 %v1801_v31 }
  0x20   :  { %181 = vmatmul.f32.gmra.mxu0 %v180_v3  ;;  %v2668_v3 = vand.u32 4294901760, %v1939_v55 }
  0x21   :  { %452 = vmatmul.f32.gmra.mxu1 %v1823_v44 }
  0x22   :  { %v339_v14 = vsub.f32 %v1939_v55, %v2668_v3 }
  0x24   :  { %v340_v37 = vand.u32 4294901760, %v339_v14  ;;  %v74_v14 = vsel %vm45_vm0, %v20_v63, 0  ;;  %v21_v63 = vld [vmem:[%s2665_s0 + $0x50] sm:$0xff] }
  0x26   :  { %317 = vmatmul.f32.gmra.mxu2 %v316_v18  ;;  %v1967_v18 = vsub.f32 %v116_v59, %v1955_v5 }
  0x27   :  { %520 = vmatmul.f32.gmra.mxu3 %v1841_v52 }
  0x28   :  { %189 = vmatmul.f32.gmra.mxu0 %v188_v21  ;;  %v19_v21 = vld [vmem:[%s2665_s0 + $0x40] sm:$0xff]  ;;  %v2667_v40 = vand.u32 4294901760, %v1967_v18 }
  0x29   :  { %456 = vmatmul.f32.gmra.mxu1 %v1848_v56  ;;  %v71_v36 = vsel %vm45_vm0, %v19_v21, 0 }
  0x2a   :  { %v1989_v57 = vand.u32 4294901760, %v71_v36  ;;  %v347_v59 = vsub.f32 %v1967_v18, %v2667_v40  ;;  %v2017_v40 = vand.u32 4294901760, %v74_v14 }
  0x2c   :  { %v2006_v11 = vsub.f32 %v71_v36, %v1989_v57  ;;  %v348_v21 = vand.u32 4294901760, %v347_v59  ;;  %v2034_v3 = vsub.f32 %v74_v14, %v2017_v40 }
  0x2e   :  { %325 = vmatmul.f32.gmra.mxu2 %v324_v41  ;;  %v1983_v41 = vand.u32 4294901760, %v119_v27  ;;  %v2679_v1 = vand.u32 4294901760, %v2034_v3 }
  0x2f   :  { %524 = vmatmul.f32.gmra.mxu3 %v1871_v2 }
  0x30   :  { %197 = vmatmul.f32.gmra.mxu0 %v196_v46  ;;  %2721 = vst [vmem:[#allocation2_spill] sm:$0xff] %v1983_v41  ;;  %v212_v46 = vand.u32 4294901760, %v211_v33  ;;  %v1995_v60 = vsub.f32 %v119_v27, %v1983_v41 }
  0x31   :  { %460 = vmatmul.f32.gmra.mxu1 %v1877_v6 }
  0x32   :  { %v2669_v27 = vand.u32 4294901760, %v1995_v60 }
  0x34   :  { %v355_v36 = vsub.f32 %v1995_v60, %v2669_v27 }
  0x36   :  { %333 = vmatmul.f32.gmra.mxu2 %v332_v0  ;;  %v122_v0 = vsel %vm45_vm0, %v36_v53, 0  ;;  %v2677_v53 = vand.u32 4294901760, %v2006_v11  ;;  %v356_v27 = vand.u32 4294901760, %v355_v36 }
  0x37   :  { %528 = vmatmul.f32.gmra.mxu3 %v1899_v20  ;;  %v2011_v33 = vand.u32 4294901760, %v122_v0 }
  0x38   :  { %205 = vmatmul.f32.gmra.mxu0 %v204_v7  ;;  %v219_v7 = vsub.f32 %v1978_v35, %v2678_v49 }
  0x39   :  { %464 = vmatmul.f32.gmra.mxu1 %v1905_v29  ;;  %2722 = vst [vmem:[#allocation3_spill] sm:$0xff] %v2011_v33  ;;  %v2023_v59 = vsub.f32 %v122_v0, %v2011_v33  ;;  %v77_v0 = vsel %vm45_vm0, %v21_v63, 0  ;;  %v22_v63 = vld [vmem:[%s2665_s0 + $0x58] sm:$0xff] }
  0x3a   :  { %v2045_v51 = vand.u32 4294901760, %v77_v0 }
  0x3b   :  { %2723 = vst [vmem:[#allocation4_spill] sm:$0xff] %v2023_v59  ;;  %v2675_v42 = vand.u32 4294901760, %v2023_v59 }
  0x3c   :  { %v2062_v30 = vsub.f32 %v77_v0, %v2045_v51 }
  0x3d   :  { %v363_v14 = vsub.f32 %v2023_v59, %v2675_v42 }
  0x3e   :  { %341 = vmatmul.f32.gmra.mxu2 %v340_v37  ;;  %v220_v37 = vand.u32 4294901760, %v219_v7  ;;  %v2685_v49 = vand.u32 4294901760, %v2062_v30 }
  0x3f   :  { %532 = vmatmul.f32.gmra.mxu3 %v1927_v45  ;;  %v364_v42 = vand.u32 4294901760, %v363_v14 }
  0x40   :  { %213 = vmatmul.f32.gmra.mxu0 %v212_v46  ;;  %v37_v46 = vld [vmem:[%s2665_s0 + $0xd0] sm:$0xff] }
  0x41   :  { %468 = vmatmul.f32.gmra.mxu1 %v1933_v50  ;;  %v125_v7 = vsel %vm45_vm0, %v37_v46, 0 }
  0x42   :  { %v2039_v19 = vand.u32 4294901760, %v125_v7 }
  0x44   :  { %2724 = vst [vmem:[#allocation5_spill] sm:$0xff] %v2039_v19  ;;  %v2051_v36 = vsub.f32 %v125_v7, %v2039_v19  ;;  %v80_v7 = vsel %vm45_vm0, %v22_v63, 0  ;;  %v23_v63 = vld [vmem:[%s2665_s0 + $0x60] sm:$0xff] }
  0x46   :  { %349 = vmatmul.f32.gmra.mxu2 %v348_v21  ;;  %v227_v21 = vsub.f32 %v2006_v11, %v2677_v53  ;;  %2725 = vst [vmem:[#allocation6_spill] sm:$0xff] %v2051_v36  ;;  %v2681_v24 = vand.u32 4294901760, %v2051_v36 }
  0x47   :  { %536 = vmatmul.f32.gmra.mxu3 %v1955_v5 }
  0x48   :  { %221 = vmatmul.f32.gmra.mxu0 %v220_v37  ;;  %v228_v46 = vand.u32 4294901760, %v227_v21  ;;  %v38_v37 = vld [vmem:[%s2665_s0 + $0xd8] sm:$0xff]  ;;  %v371_v0 = vsub.f32 %v2051_v36, %v2681_v24 }
  0x49   :  { %472 = vmatmul.f32.gmra.mxu1 %v1961_v12  ;;  %v128_v21 = vsel %vm45_vm0, %v38_v37, 0 }
  0x4a   :  { %v2067_v53 = vand.u32 4294901760, %v128_v21  ;;  %v372_v24 = vand.u32 4294901760, %v371_v0 }
  0x4c   :  { %2726 = vst [vmem:[#allocation7_spill] sm:$0xff] %v2067_v53  ;;  %v2079_v14 = vsub.f32 %v128_v21, %v2067_v53  ;;  %v83_v21 = vsel %vm45_vm0, %v23_v63, 0  ;;  %v24_v63 = vld [vmem:[%s2665_s0 + $0x68] sm:$0xff] }
  0x4e   :  { %357 = vmatmul.f32.gmra.mxu2 %v356_v27  ;;  %v235_v27 = vsub.f32 %v2034_v3, %v2679_v1  ;;  %v2073_v1 = vand.u32 4294901760, %v80_v7  ;;  %2727 = vst [vmem:[#allocation8_spill] sm:$0xff] %v2079_v14  ;;  %v2687_v47 = vand.u32 4294901760, %v2079_v14 }
  0x4f   :  { %540 = vmatmul.f32.gmra.mxu3 %v1983_v41 }
  0x50   :  { %229 = vmatmul.f32.gmra.mxu0 %v228_v46  ;;  %v236_v37 = vand.u32 4294901760, %v235_v27  ;;  %v39_v46 = vld [vmem:[%s2665_s0 + $0xe0] sm:$0xff]  ;;  %v2090_v10 = vsub.f32 %v80_v7, %v2073_v1  ;;  %v379_v7 = vsub.f32 %v2079_v14, %v2687_v47 }
  0x51   :  { %476 = vmatmul.f32.gmra.mxu1 %v1989_v57  ;;  %v131_v27 = vsel %vm45_vm0, %v39_v46, 0 }
  0x52   :  { %v2095_v26 = vand.u32 4294901760, %v131_v27  ;;  %v2692_v4 = vand.u32 4294901760, %v2090_v10  ;;  %v380_v47 = vand.u32 4294901760, %v379_v7 }
  0x54   :  { %2728 = vst [vmem:[#allocation9_spill] sm:$0xff] %v2095_v26  ;;  %v2107_v0 = vsub.f32 %v131_v27, %v2095_v26  ;;  %v86_v27 = vsel %vm45_vm0, %v24_v63, 0  ;;  %v25_v63 = vld [vmem:[%s2665_s0 + $0x70] sm:$0xff] }
  0x56   :  { %365 = vmatmul.f32.gmra.mxu2 %v364_v42  ;;  %v243_v42 = vsub.f32 %v2062_v30, %v2685_v49  ;;  %v2101_v49 = vand.u32 4294901760, %v83_v21  ;;  %2729 = vst [vmem:[#allocation10_spill] sm:$0xff] %v2107_v0  ;;  %v2695_v38 = vand.u32 4294901760, %v2107_v0 }
  0x57   :  { %544 = vmatmul.f32.gmra.mxu3 %v2011_v33 }
  0x58   :  { %237 = vmatmul.f32.gmra.mxu0 %v236_v37  ;;  %v244_v46 = vand.u32 4294901760, %v243_v42  ;;  %v40_v37 = vld [vmem:[%s2665_s0 + $0xe8] sm:$0xff]  ;;  %v2118_v54 = vsub.f32 %v83_v21, %v2101_v49  ;;  %v387_v21 = vsub.f32 %v2107_v0, %v2695_v38 }
  0x59   :  { %480 = vmatmul.f32.gmra.mxu1 %v2017_v40  ;;  %v134_v42 = vsel %vm45_vm0, %v40_v37, 0 }
  0x5a   :  { %v2123_v28 = vand.u32 4294901760, %v134_v42  ;;  %v2702_v14 = vand.u32 4294901760, %v2118_v54  ;;  %v388_v38 = vand.u32 4294901760, %v387_v21 }
  0x5c   :  { %v2135_v7 = vsub.f32 %v134_v42, %v2123_v28  ;;  %v89_v42 = vsel %vm45_vm0, %v25_v63, 0  ;;  %v26_v63 = vld [vmem:[%s2665_s0 + $0x78] sm:$0xff] }
  0x5e   :  { %373 = vmatmul.f32.gmra.mxu2 %v372_v24  ;;  %v251_v24 = vsub.f32 %v2090_v10, %v2692_v4  ;;  %v2129_v4 = vand.u32 4294901760, %v86_v27  ;;  %2730 = vst [vmem:[#allocation11_spill] sm:$0xff] %v2135_v7  ;;  %v2705_v0 = vand.u32 4294901760, %v2135_v7 }
  0x5f   :  { %548 = vmatmul.f32.gmra.mxu3 %v2039_v19 }
  0x60   :  { %245 = vmatmul.f32.gmra.mxu0 %v244_v46  ;;  %v252_v37 = vand.u32 4294901760, %v251_v24  ;;  %v41_v46 = vld [vmem:[%s2665_s0 + $0xf0] sm:$0xff]  ;;  %v2146_v19 = vsub.f32 %v86_v27, %v2129_v4  ;;  %v395_v27 = vsub.f32 %v2135_v7, %v2705_v0 }
  0x61   :  { %484 = vmatmul.f32.gmra.mxu1 %v2045_v51  ;;  %v137_v24 = vsel %vm45_vm0, %v41_v46, 0 }
  0x62   :  { %v2151_v36 = vand.u32 4294901760, %v137_v24  ;;  %v396_v0 = vand.u32 4294901760, %v395_v27 }
  0x64   :  { %v2163_v21 = vsub.f32 %v137_v24, %v2151_v36  ;;  %v92_v24 = vsel %vm45_vm0, %v26_v63, 0 }
  0x66   :  { %381 = vmatmul.f32.gmra.mxu2 %v380_v47  ;;  %v259_v47 = vsub.f32 %v2118_v54, %v2702_v14  ;;  %v2157_v14 = vand.u32 4294901760, %v89_v42  ;;  %v2715_v7 = vand.u32 4294901760, %v2163_v21 }
  0x67   :  { %552 = vmatmul.f32.gmra.mxu3 %v2067_v53  ;;  %v2712_v53 = vand.u32 4294901760, %v2146_v19 }
  0x68   :  { %253 = vmatmul.f32.gmra.mxu0 %v252_v37  ;;  %v260_v46 = vand.u32 4294901760, %v259_v47  ;;  %v42_v37 = vld [vmem:[%s2665_s0 + $0xf8] sm:$0xff]  ;;  %v2174_v33 = vsub.f32 %v89_v42, %v2157_v14  ;;  %v403_v42 = vsub.f32 %v2163_v21, %v2715_v7 }
  0x69   :  { %488 = vmatmul.f32.gmra.mxu1 %v2073_v1  ;;  %v140_v47 = vsel %vm45_vm0, %v42_v37, 0 }
  0x6a   :  { %v2179_v59 = vand.u32 4294901760, %v140_v47 }
  0x6c   :  { %2731 = vst [vmem:[#allocation12_spill] sm:$0xff] %v2179_v59 }
  0x6e   :  { %389 = vmatmul.f32.gmra.mxu2 %v388_v38  ;;  %v267_v38 = vsub.f32 %v2146_v19, %v2712_v53  ;;  %v2188_v53 = vsub.f32 %v140_v47, %v2179_v59 }
  0x6f   :  { %556 = vmatmul.f32.gmra.mxu3 %v2095_v26  ;;  %v2718_v26 = vand.u32 4294901760, %v2174_v33 }
  0x70   :  { %261 = vmatmul.f32.gmra.mxu0 %v260_v46  ;;  %v268_v37 = vand.u32 4294901760, %v267_v38  ;;  %v2182_v46 = vand.u32 4294901760, %v92_v24  ;;  %v2716_v38 = vand.u32 4294901760, %v2188_v53 }
  0x71   :  { %492 = vmatmul.f32.gmra.mxu1 %v2101_v49  ;;  %v275_v27 = vsub.f32 %v2174_v33, %v2718_v26 }
  0x72   :  { %v2195_v63 = vsub.f32 %v92_v24, %v2182_v46  ;;  %v411_v47 = vsub.f32 %v2188_v53, %v2716_v38 }
  0x73   :  { %v276_v41 = vand.u32 4294901760, %v275_v27 }
  0x74   :  { %v2717_v7 = vand.u32 4294901760, %v2195_v63 }
  0x76   :  { %397 = vmatmul.f32.gmra.mxu2 %v396_v0  ;;  %v404_v0 = vand.u32 4294901760, %v403_v42  ;;  %v283_v24 = vsub.f32 %v2195_v63, %v2717_v7  ;;  %v2734_v7 = vand.u32 4294901760, %v1804_v32 }
  0x77   :  { %560 = vmatmul.f32.gmra.mxu3 %v2123_v28 }
  0x78   :  { %269 = vmatmul.f32.gmra.mxu0 %v268_v37  ;;  %v412_v37 = vand.u32 4294901760, %v411_v47  ;;  %v284_v42 = vand.u32 4294901760, %v283_v24 }
  0x79   :  { %496 = vmatmul.f32.gmra.mxu1 %v2129_v4 }
  0x7e   :  { %405 = vmatmul.f32.gmra.mxu2 %v404_v0 }
  0x7f   :  { %564 = vmatmul.f32.gmra.mxu3 %v2151_v36 }
  0x80   :  { %277 = vmatmul.f32.gmra.mxu0 %v276_v41  ;;  %v2732_v41 = vand.u32 4294901760, %v1791_v23 }
  0x81   :  { %500 = vmatmul.f32.gmra.mxu1 %v2157_v14 }
  0x86   :  { %413 = vmatmul.f32.gmra.mxu2 %v412_v37 }
  0x87   :  { %568 = vmatmul.f32.gmra.mxu3 %v2179_v59 }
  0x88   :  { %285 = vmatmul.f32.gmra.mxu0 %v284_v42 }
  0x89   :  { %504 = vmatmul.f32.gmra.mxu1 %v2182_v46 }
  0x8d   :  { %v2210_v27 = vpop.f32.mrf.mxu0 }
  0x8e   :  { %594 = vmatmul.f32.vlgmr.msrb.gmra.mxu2 %v1791_v23  ;;  %v2213_v0 = vpop.f32.mrf.mxu1 }
  0x8f   :  { %774 = vmatmul.f32.vlgmr.msrb.gmra.mxu3 %v2732_v41 }
  0x90   :  { %987 = vmatmul.f32.vlgmr.msrb.gmra.mxu0 %v1778_v16 }
  0x91   :  { %v294_v38 = vpop.f32.mrf.mxu2  ;;  %1134 = vmatmul.f32.vlgmr.msrb.gmra.mxu1 %v1778_v16 }
  0x92   :  { %v509_v47 = vpop.f32.mrf.mxu3 }
  0x93   :  { %v2219_v24 = vadd.f32 %v509_v47, %v294_v38  ;;  %v2736_v47 = vand.u32 4294901760, %v1834_v48 }
  0x95   :  { %2733 = vst [vmem:[#allocation13_spill] sm:$0xff] %v2219_v24  ;;  %v2221_v37 = vpop.f32.mrf.mxu0 }
  0x96   :  { %599 = vmatmul.f32.gmra.mxu2 %v1804_v32  ;;  %v2224_v42 = vpop.f32.mrf.mxu1 }
  0x97   :  { %780 = vmatmul.f32.gmra.mxu3 %v2734_v7 }
  0x98   :  { %991 = vmatmul.f32.gmra.mxu0 %v1794_v25 }
  0x99   :  { %v302_v23 = vpop.f32.mrf.mxu2  ;;  %1138 = vmatmul.f32.gmra.mxu1 %v1794_v25 }
  0x9a   :  { %v513_v41 = vpop.f32.mrf.mxu3 }
  0x9b   :  { %v2230_v26 = vadd.f32 %v513_v41, %v302_v23  ;;  %v2738_v41 = vand.u32 4294901760, %v1866_v62 }
  0x9d   :  { %2735 = vst [vmem:[#allocation14_spill] sm:$0xff] %v2230_v26  ;;  %v2232_v16 = vpop.f32.mrf.mxu0 }
  0x9e   :  { %604 = vmatmul.f32.gmra.mxu2 %v1834_v48  ;;  %v2235_v38 = vpop.f32.mrf.mxu1 }
  0x9f   :  { %786 = vmatmul.f32.gmra.mxu3 %v2736_v47 }
  0xa0   :  { %995 = vmatmul.f32.gmra.mxu0 %v1823_v44 }
  0xa1   :  { %v310_v32 = vpop.f32.mrf.mxu2  ;;  %1142 = vmatmul.f32.gmra.mxu1 %v1823_v44 }
  0xa2   :  { %v517_v7 = vpop.f32.mrf.mxu3 }
  0xa3   :  { %v2241_v24 = vadd.f32 %v517_v7, %v310_v32  ;;  %v2740_v7 = vand.u32 4294901760, %v1894_v13 }
  0xa5   :  { %2737 = vst [vmem:[#allocation15_spill] sm:$0xff] %v2241_v24  ;;  %v2243_v25 = vpop.f32.mrf.mxu0 }
  0xa6   :  { %609 = vmatmul.f32.gmra.mxu2 %v1866_v62  ;;  %v2246_v23 = vpop.f32.mrf.mxu1 }
  0xa7   :  { %792 = vmatmul.f32.gmra.mxu3 %v2738_v41 }
  0xa8   :  { %999 = vmatmul.f32.gmra.mxu0 %v1848_v56 }
  0xa9   :  { %v318_v48 = vpop.f32.mrf.mxu2  ;;  %1146 = vmatmul.f32.gmra.mxu1 %v1848_v56 }
  0xaa   :  { %v521_v47 = vpop.f32.mrf.mxu3 }
  0xab   :  { %v2252_v26 = vadd.f32 %v521_v47, %v318_v48  ;;  %v2742_v47 = vand.u32 4294901760, %v1922_v39 }
  0xad   :  { %2739 = vst [vmem:[#allocation16_spill] sm:$0xff] %v2252_v26  ;;  %v2254_v44 = vpop.f32.mrf.mxu0 }
  0xae   :  { %614 = vmatmul.f32.gmra.mxu2 %v1894_v13  ;;  %v2257_v32 = vpop.f32.mrf.mxu1 }
  0xaf   :  { %798 = vmatmul.f32.gmra.mxu3 %v2740_v7 }
  0xb0   :  { %1003 = vmatmul.f32.gmra.mxu0 %v1877_v6 }
  0xb1   :  { %v326_v62 = vpop.f32.mrf.mxu2  ;;  %1150 = vmatmul.f32.gmra.mxu1 %v1877_v6 }
  0xb2   :  { %v525_v41 = vpop.f32.mrf.mxu3 }
  0xb3   :  { %v2263_v24 = vadd.f32 %v525_v41, %v326_v62  ;;  %v2744_v41 = vand.u32 4294901760, %v1950_v61 }
  0xb5   :  { %2741 = vst [vmem:[#allocation17_spill] sm:$0xff] %v2263_v24  ;;  %v2265_v56 = vpop.f32.mrf.mxu0 }
  0xb6   :  { %619 = vmatmul.f32.gmra.mxu2 %v1922_v39  ;;  %v2268_v48 = vpop.f32.mrf.mxu1 }
  0xb7   :  { %804 = vmatmul.f32.gmra.mxu3 %v2742_v47 }
  0xb8   :  { %1007 = vmatmul.f32.gmra.mxu0 %v1905_v29 }
  0xb9   :  { %v334_v13 = vpop.f32.mrf.mxu2  ;;  %1154 = vmatmul.f32.gmra.mxu1 %v1905_v29 }
  0xba   :  { %v529_v7 = vpop.f32.mrf.mxu3 }
  0xbb   :  { %v2274_v26 = vadd.f32 %v529_v7, %v334_v13  ;;  %v2746_v7 = vand.u32 4294901760, %v1978_v35 }
  0xbd   :  { %2743 = vst [vmem:[#allocation18_spill] sm:$0xff] %v2274_v26  ;;  %v2276_v6 = vpop.f32.mrf.mxu0 }
  0xbe   :  { %624 = vmatmul.f32.gmra.mxu2 %v1950_v61  ;;  %v2279_v62 = vpop.f32.mrf.mxu1 }
  0xbf   :  { %810 = vmatmul.f32.gmra.mxu3 %v2744_v41 }
  0xc0   :  { %1011 = vmatmul.f32.gmra.mxu0 %v1933_v50 }
  0xc1   :  { %v342_v39 = vpop.f32.mrf.mxu2  ;;  %1158 = vmatmul.f32.gmra.mxu1 %v1933_v50 }
  0xc2   :  { %v533_v47 = vpop.f32.mrf.mxu3 }
  0xc3   :  { %v2285_v24 = vadd.f32 %v533_v47, %v342_v39  ;;  %v2748_v47 = vand.u32 4294901760, %v2006_v11 }
  0xc5   :  { %2745 = vst [vmem:[#allocation19_spill] sm:$0xff] %v2285_v24  ;;  %v2287_v29 = vpop.f32.mrf.mxu0 }
  0xc6   :  { %629 = vmatmul.f32.gmra.mxu2 %v1978_v35  ;;  %v2290_v13 = vpop.f32.mrf.mxu1 }
  0xc7   :  { %816 = vmatmul.f32.gmra.mxu3 %v2746_v7 }
  0xc8   :  { %1015 = vmatmul.f32.gmra.mxu0 %v1961_v12 }
  0xc9   :  { %v350_v61 = vpop.f32.mrf.mxu2  ;;  %1162 = vmatmul.f32.gmra.mxu1 %v1961_v12 }
  0xca   :  { %v537_v41 = vpop.f32.mrf.mxu3 }
  0xcb   :  { %v2296_v26 = vadd.f32 %v537_v41, %v350_v61  ;;  %v2750_v41 = vand.u32 4294901760, %v2034_v3 }
  0xcd   :  { %2747 = vst [vmem:[#allocation20_spill] sm:$0xff] %v2296_v26  ;;  %v2298_v50 = vpop.f32.mrf.mxu0 }
  0xce   :  { %634 = vmatmul.f32.gmra.mxu2 %v2006_v11  ;;  %v2301_v39 = vpop.f32.mrf.mxu1 }
  0xcf   :  { %822 = vmatmul.f32.gmra.mxu3 %v2748_v47 }
  0xd0   :  { %1019 = vmatmul.f32.gmra.mxu0 %v1989_v57 }
  0xd1   :  { %v358_v35 = vpop.f32.mrf.mxu2  ;;  %1166 = vmatmul.f32.gmra.mxu1 %v1989_v57 }
  0xd2   :  { %v541_v7 = vpop.f32.mrf.mxu3 }
  0xd3   :  { %v2307_v24 = vadd.f32 %v541_v7, %v358_v35  ;;  %v2752_v7 = vand.u32 4294901760, %v2062_v30 }
  0xd5   :  { %2749 = vst [vmem:[#allocation21_spill] sm:$0xff] %v2307_v24  ;;  %v2309_v12 = vpop.f32.mrf.mxu0 }
  0xd6   :  { %639 = vmatmul.f32.gmra.mxu2 %v2034_v3  ;;  %v2312_v61 = vpop.f32.mrf.mxu1 }
  0xd7   :  { %828 = vmatmul.f32.gmra.mxu3 %v2750_v41 }
  0xd8   :  { %1023 = vmatmul.f32.gmra.mxu0 %v2017_v40 }
  0xd9   :  { %v366_v11 = vpop.f32.mrf.mxu2  ;;  %1170 = vmatmul.f32.gmra.mxu1 %v2017_v40 }
  0xda   :  { %v545_v47 = vpop.f32.mrf.mxu3 }
  0xdb   :  { %v2318_v26 = vadd.f32 %v545_v47, %v366_v11  ;;  %v2754_v47 = vand.u32 4294901760, %v2090_v10 }
  0xdd   :  { %2751 = vst [vmem:[#allocation22_spill] sm:$0xff] %v2318_v26  ;;  %v2320_v57 = vpop.f32.mrf.mxu0 }
  0xde   :  { %644 = vmatmul.f32.gmra.mxu2 %v2062_v30  ;;  %v2323_v35 = vpop.f32.mrf.mxu1 }
  0xdf   :  { %834 = vmatmul.f32.gmra.mxu3 %v2752_v7 }
  0xe0   :  { %1027 = vmatmul.f32.gmra.mxu0 %v2045_v51 }
  0xe1   :  { %v374_v3 = vpop.f32.mrf.mxu2  ;;  %1174 = vmatmul.f32.gmra.mxu1 %v2045_v51 }
  0xe2   :  { %v549_v41 = vpop.f32.mrf.mxu3 }
  0xe3   :  { %v2329_v24 = vadd.f32 %v549_v41, %v374_v3  ;;  %v2756_v41 = vand.u32 4294901760, %v2118_v54 }
  0xe5   :  { %2753 = vst [vmem:[#allocation23_spill] sm:$0xff] %v2329_v24  ;;  %v2331_v40 = vpop.f32.mrf.mxu0 }
  0xe6   :  { %649 = vmatmul.f32.gmra.mxu2 %v2090_v10  ;;  %v2334_v11 = vpop.f32.mrf.mxu1 }
  0xe7   :  { %840 = vmatmul.f32.gmra.mxu3 %v2754_v47 }
  0xe8   :  { %1031 = vmatmul.f32.gmra.mxu0 %v2073_v1 }
  0xe9   :  { %v382_v30 = vpop.f32.mrf.mxu2  ;;  %1178 = vmatmul.f32.gmra.mxu1 %v2073_v1 }
  0xea   :  { %v553_v7 = vpop.f32.mrf.mxu3 }
  0xeb   :  { %v2340_v26 = vadd.f32 %v553_v7, %v382_v30  ;;  %v2758_v7 = vand.u32 4294901760, %v2146_v19 }
  0xed   :  { %2755 = vst [vmem:[#allocation24_spill] sm:$0xff] %v2340_v26  ;;  %v2342_v51 = vpop.f32.mrf.mxu0 }
  0xee   :  { %654 = vmatmul.f32.gmra.mxu2 %v2118_v54  ;;  %v2345_v3 = vpop.f32.mrf.mxu1 }
  0xef   :  { %846 = vmatmul.f32.gmra.mxu3 %v2756_v41 }
  0xf0   :  { %1035 = vmatmul.f32.gmra.mxu0 %v2101_v49 }
  0xf1   :  { %v390_v10 = vpop.f32.mrf.mxu2  ;;  %1182 = vmatmul.f32.gmra.mxu1 %v2101_v49 }
  0xf2   :  { %v557_v47 = vpop.f32.mrf.mxu3 }
  0xf3   :  { %v2351_v24 = vadd.f32 %v557_v47, %v390_v10  ;;  %v2760_v47 = vand.u32 4294901760, %v2174_v33 }
  0xf5   :  { %2757 = vst [vmem:[#allocation25_spill] sm:$0xff] %v2351_v24  ;;  %v2353_v1 = vpop.f32.mrf.mxu0 }
  0xf6   :  { %659 = vmatmul.f32.gmra.mxu2 %v2146_v19  ;;  %v2356_v30 = vpop.f32.mrf.mxu1 }
  0xf7   :  { %852 = vmatmul.f32.gmra.mxu3 %v2758_v7 }
  0xf8   :  { %1039 = vmatmul.f32.gmra.mxu0 %v2129_v4 }
  0xf9   :  { %v398_v54 = vpop.f32.mrf.mxu2  ;;  %1186 = vmatmul.f32.gmra.mxu1 %v2129_v4 }
  0xfa   :  { %v561_v41 = vpop.f32.mrf.mxu3 }
  0xfb   :  { %v2362_v26 = vadd.f32 %v561_v41, %v398_v54  ;;  %v2763_v41 = vand.u32 4294901760, %v2195_v63 }
  0xfd   :  { %2759 = vst [vmem:[#allocation26_spill] sm:$0xff] %v2362_v26  ;;  %v2364_v49 = vpop.f32.mrf.mxu0 }
  0xfe   :  { %664 = vmatmul.f32.gmra.mxu2 %v2174_v33  ;;  %v2367_v10 = vpop.f32.mrf.mxu1 }
  0xff   :  { %858 = vmatmul.f32.gmra.mxu3 %v2760_v47 }
 0x100   :  { %1043 = vmatmul.f32.gmra.mxu0 %v2157_v14 }
 0x101   :  { %v406_v19 = vpop.f32.mrf.mxu2  ;;  %1190 = vmatmul.f32.gmra.mxu1 %v2157_v14 }
 0x102   :  { %v565_v7 = vpop.f32.mrf.mxu3 }
 0x103   :  { %v2373_v24 = vadd.f32 %v565_v7, %v406_v19  ;;  %v446_v7 = vadd.f32 %v2213_v0, %v2210_v27 }
 0x105   :  { %2761 = vst [vmem:[#allocation27_spill] sm:$0xff] %v2373_v24  ;;  %v2375_v4 = vpop.f32.mrf.mxu0  ;;  %v2765_v24 = vand.u32 4294901760, %v1781_v17 }
 0x106   :  { %669 = vmatmul.f32.gmra.mxu2 %v2195_v63  ;;  %v2378_v54 = vpop.f32.mrf.mxu1 }
 0x107   :  { %2762 = vst [vmem:[#allocation28_spill] sm:$0xff] %v2378_v54  ;;  %864 = vmatmul.f32.gmra.mxu3 %v2763_v41  ;;  %v450_v54 = vadd.f32 %v2224_v42, %v2221_v37  ;;  %v454_v37 = vadd.f32 %v2235_v38, %v2232_v16 }
 0x108   :  { %1047 = vmatmul.f32.gmra.mxu0 %v2182_v46 }
 0x109   :  { %v414_v33 = vpop.f32.mrf.mxu2  ;;  %1194 = vmatmul.f32.gmra.mxu1 %v2182_v46 }
 0x10a   :  { %v569_v47 = vpop.f32.mrf.mxu3 }
 0x10b   :  { %v2384_v26 = vadd.f32 %v569_v47, %v414_v33 }
 0x10d   :  { %2764 = vst [vmem:[#allocation29_spill] sm:$0xff] %v2384_v26  ;;  %v988_v14 = vpop.f32.mrf.mxu0 }
 0x10e   :  { %674 = vmatmul.f32.gmra.mxu2 %v1781_v17  ;;  %v1135_v19 = vpop.f32.mrf.mxu1  ;;  %v2766_v17 = vand.u32 4294901760, %v1787_v22 }
 0x10f   :  { %870 = vmatmul.f32.gmra.mxu3 %v2765_v24 }
 0x110   :  { %1051 = vmatmul.f32.gmra.mxu0 %v1765_v9 }
 0x111   :  { %v595_v63 = vpop.f32.mrf.mxu2  ;;  %1198 = vmatmul.f32.gmra.mxu1 %v1765_v9 }
 0x112   :  { %v596_v41 = vadd.f32 %v595_v63, %v446_v7  ;;  %v775_v46 = vpop.f32.mrf.mxu3 }
 0x114   :  { %v776_v59 = vadd.f32 %v775_v46, %v596_v41 }
 0x115   :  { %v992_v33 = vpop.f32.mrf.mxu0 }
 0x116   :  { %v989_v47 = vadd.f32 %v988_v14, %v776_v59  ;;  %679 = vmatmul.f32.gmra.mxu2 %v1787_v22  ;;  %v1139_v26 = vpop.f32.mrf.mxu1  ;;  %v2767_v22 = vand.u32 4294901760, %v1821_v43 }
 0x117   :  { %876 = vmatmul.f32.gmra.mxu3 %v2766_v17 }
 0x118   :  { %v1136_v27 = vadd.f32 %v1135_v19, %v989_v47  ;;  %1055 = vmatmul.f32.gmra.mxu0 %v1776_v15 }
 0x119   :  { %v600_v0 = vpop.f32.mrf.mxu2  ;;  %1202 = vmatmul.f32.gmra.mxu1 %v1776_v15 }
 0x11a   :  { %v601_v9 = vadd.f32 %v600_v0, %v450_v54  ;;  %v781_v24 = vpop.f32.mrf.mxu3  ;;  %v1262_v15 = vmul.f32 %v1136_v27, %v1136_v27 }
 0x11c   :  { %v782_v7 = vadd.f32 %v781_v24, %v601_v9  ;;  %v2768_v24 = vand.u32 4294901760, %v1855_v58 }
 0x11d   :  { %v996_v63 = vpop.f32.mrf.mxu0 }
 0x11e   :  { %v993_v59 = vadd.f32 %v992_v33, %v782_v7  ;;  %684 = vmatmul.f32.gmra.mxu2 %v1821_v43  ;;  %v1143_v14 = vpop.f32.mrf.mxu1  ;;  %v458_v43 = vadd.f32 %v2246_v23, %v2243_v25 }
 0x11f   :  { %882 = vmatmul.f32.gmra.mxu3 %v2767_v22 }
 0x120   :  { %v1140_v42 = vadd.f32 %v1139_v26, %v993_v59  ;;  %1059 = vmatmul.f32.gmra.mxu0 %v1801_v31 }
 0x121   :  { %v605_v19 = vpop.f32.mrf.mxu2  ;;  %1206 = vmatmul.f32.gmra.mxu1 %v1801_v31 }
 0x122   :  { %v1263_v54 = vmul.f32 %v1140_v42, %v1140_v42  ;;  %v606_v41 = vadd.f32 %v605_v19, %v454_v37  ;;  %v787_v46 = vpop.f32.mrf.mxu3 }
 0x124   :  { %v1294_v33 = vadd.f32 %v1263_v54, %v1262_v15  ;;  %v788_v47 = vadd.f32 %v787_v46, %v606_v41  ;;  %v2769_v15 = vand.u32 4294901760, %v1883_v8 }
 0x125   :  { %v1000_v17 = vpop.f32.mrf.mxu0 }
 0x126   :  { %v1295_v0 = vrot.slane %v1294_v33, 4  ;;  %v997_v9 = vadd.f32 %v996_v63, %v788_v47  ;;  %689 = vmatmul.f32.gmra.mxu2 %v1855_v58  ;;  %v1147_v26 = vpop.f32.mrf.mxu1  ;;  %v462_v58 = vadd.f32 %v2257_v32, %v2254_v44 }
 0x127   :  { %888 = vmatmul.f32.gmra.mxu3 %v2768_v24 }
 0x128   :  { %v1296_v16 = vadd.f32 %v1295_v0, %v1294_v33  ;;  %v1144_v38 = vadd.f32 %v1143_v14, %v997_v9  ;;  %1063 = vmatmul.f32.gmra.mxu0 %v1841_v52 }
 0x129   :  { %v610_v31 = vpop.f32.mrf.mxu2  ;;  %1210 = vmatmul.f32.gmra.mxu1 %v1841_v52 }
 0x12a   :  { %v1297_v27 = vrot.slane %v1296_v16, 2  ;;  %v611_v7 = vadd.f32 %v610_v31, %v458_v43  ;;  %v793_v59 = vpop.f32.mrf.mxu3  ;;  %v1264_v46 = vmul.f32 %v1144_v38, %v1144_v38 }
 0x12c   :  { %v1298_v63 = vadd.f32 %v1297_v27, %v1296_v16  ;;  %v794_v37 = vadd.f32 %v793_v59, %v611_v7 }
 0x12d   :  { %v1004_v42 = vpop.f32.mrf.mxu0 }
 0x12e   :  { %v1299_v22 = vrot.slane %v1298_v63, 1  ;;  %v1001_v19 = vadd.f32 %v1000_v17, %v794_v37  ;;  %694 = vmatmul.f32.gmra.mxu2 %v1883_v8  ;;  %v1151_v25 = vpop.f32.mrf.mxu1 }
 0x12f   :  { %894 = vmatmul.f32.gmra.mxu3 %v2769_v15 }
 0x130   :  { %v1300_v23 = vadd.f32 %v1299_v22, %v1298_v63  ;;  %v1148_v14 = vadd.f32 %v1147_v26, %v1001_v19  ;;  %1067 = vmatmul.f32.gmra.mxu0 %v1871_v2  ;;  %v466_v26 = vadd.f32 %v2268_v48, %v2265_v56  ;;  %v2771_v19 = vand.u32 4294901760, %v1939_v55 }
 0x131   :  { %v615_v52 = vpop.f32.mrf.mxu2  ;;  %1214 = vmatmul.f32.gmra.mxu1 %v1871_v2  ;;  %v2770_v2 = vand.u32 4294901760, %v1911_v34 }
 0x132   :  { %v1265_v54 = vmul.f32 %v1148_v14, %v1148_v14  ;;  %v616_v41 = vadd.f32 %v615_v52, %v462_v58  ;;  %v799_v33 = vpop.f32.mrf.mxu3  ;;  %v2421_v47 = vmax.f32 %v1300_v23, 1e-20 }
 0x134   :  { %v1301_v17 = vadd.f32 %v1265_v54, %v1264_v46  ;;  %v800_v0 = vadd.f32 %v799_v33, %v616_v41  ;;  %1695 = vrcp.f32 %v2421_v47  ;;  %vm1427_vm2 = vweird.f32 %v2421_v47 }
 0x135   :  { %v1008_v9 = vpop.f32.mrf.mxu0 }
 0x136   :  { %699 = vmatmul.f32.gmra.mxu2 %v1911_v34  ;;  %v1155_v44 = vpop.f32.mrf.mxu1  ;;  %v1302_v32 = vrot.slane %v1301_v17, 4  ;;  %v1005_v8 = vadd.f32 %v1004_v42, %v800_v0  ;;  %v470_v42 = vadd.f32 %v2279_v62, %v2276_v6  ;;  %v474_v0 = vadd.f32 %v2290_v13, %v2287_v29 }
 0x137   :  { %900 = vmatmul.f32.gmra.mxu3 %v2770_v2 }
 0x138   :  { %1071 = vmatmul.f32.gmra.mxu0 %v1899_v20  ;;  %v1303_v43 = vadd.f32 %v1302_v32, %v1301_v17  ;;  %v1152_v16 = vadd.f32 %v1151_v25, %v1005_v8 }
 0x139   :  { %v620_v38 = vpop.f32.mrf.mxu2  ;;  %1218 = vmatmul.f32.gmra.mxu1 %v1899_v20 }
 0x13a   :  { %v621_v24 = vadd.f32 %v620_v38, %v466_v26  ;;  %v1304_v31 = vrot.slane %v1303_v43, 2  ;;  %v805_v27 = vpop.f32.mrf.mxu3  ;;  %v2431_v37 = vpop.eup %1695  ;;  %v1266_v23 = vmul.f32 %v1152_v16, %v1152_v16 }
 0x13b   :  { %v1423_v20 = vmul.f32 %v2431_v37, %v2421_v47  ;;  %vm1428_vm1 = vweird.f32 %v2431_v37 }
 0x13c   :  { %v806_v7 = vadd.f32 %v805_v27, %v621_v24  ;;  %v1305_v59 = vadd.f32 %v1304_v31, %v1303_v43  ;;  %vm2460_vm3 = vmor %vm1427_vm2, %vm1428_vm1  ;;  %vm1666_vm2 = vcmask 1043459  }
 0x13d   :  { %v1012_v63 = vpop.f32.mrf.mxu0  ;;  %v1424_v62 = vsub.f32 1.0, %v1423_v20  ;;  %v2775_v20 = vand.u32 4294901760, %v1995_v60 }
 0x13e   :  { %v1009_v56 = vadd.f32 %v1008_v9, %v806_v7  ;;  %704 = vmatmul.f32.gmra.mxu2 %v1939_v55  ;;  %v1159_v34 = vpop.f32.mrf.mxu1  ;;  %v1306_v48 = vrot.slane %v1305_v59, 1 }
 0x13f   :  { %906 = vmatmul.f32.gmra.mxu3 %v2771_v19  ;;  %v1425_v32 = vmul.f32 %v2431_v37, %v1424_v62 }
 0x140   :  { %v1156_v22 = vadd.f32 %v1155_v44, %v1009_v56  ;;  %1075 = vmatmul.f32.gmra.mxu0 %v1927_v45  ;;  %v1307_v25 = vadd.f32 %v1306_v48, %v1305_v59  ;;  %v2772_v44 = vand.u32 4294901760, %v1967_v18  ;;  %v1431_v59 = vand.u32 2147483647, %v2421_v47 }
 0x141   :  { %v625_v58 = vpop.f32.mrf.mxu2  ;;  %1222 = vmatmul.f32.gmra.mxu1 %v1927_v45  ;;  %v1426_v29 = vadd.f32 %v2431_v37, %v1425_v32  ;;  %v2779_v32 = vld [vmem:[#allocation3_spill] sm:$0xff] }
 0x142   :  { %v1267_v14 = vmul.f32 %v1156_v22, %v1156_v22  ;;  %v626_v15 = vadd.f32 %v625_v58, %v470_v42  ;;  %v1407_v52 = vmax.f32 %v1307_v25, 1e-20  ;;  %v811_v54 = vpop.f32.mrf.mxu3  ;;  %v2776_v25 = vld [vmem:[#allocation2_spill] sm:$0xff]  ;;  %vm1432_vm8 = vcmp.eq.f32.partialorder %v1431_v59, 8.507059e+37 }
 0x143   :  { %v1430_v58 = vsel %vm2460_vm3, %v2431_v37, %v1426_v29 }
 0x144   :  { %v1308_v41 = vadd.f32 %v1267_v14, %v1266_v23  ;;  %v812_v6 = vadd.f32 %v811_v54, %v626_v15  ;;  %1697 = vrcp.f32 %v1407_v52  ;;  %v1445_v56 = vand.u32 2147483647, %v1407_v52 }
 0x145   :  { %v1016_v55 = vpop.f32.mrf.mxu0  ;;  %vm1441_vm5 = vweird.f32 %v1407_v52 }
 0x146   :  { %v1309_v46 = vrot.slane %v1308_v41, 4  ;;  %v1013_v33 = vadd.f32 %v1012_v63, %v812_v6  ;;  %709 = vmatmul.f32.gmra.mxu2 %v1967_v18  ;;  %v1163_v17 = vpop.f32.mrf.mxu1  ;;  %v1433_v63 = vand.u32 2147483648, %v2421_v47  ;;  %vm1446_vm9 = vcmp.eq.f32.partialorder %v1445_v56, 8.507059e+37  ;;  %v2780_v56 = vld [vmem:[#allocation6_spill] sm:$0xff] }
 0x147   :  { %912 = vmatmul.f32.gmra.mxu3 %v2772_v44 }
 0x148   :  { %v1310_v9 = vadd.f32 %v1309_v46, %v1308_v41  ;;  %v1160_v45 = vadd.f32 %v1159_v34, %v1013_v33  ;;  %1079 = vmatmul.f32.gmra.mxu0 %v1955_v5  ;;  %v1447_v34 = vand.u32 2147483648, %v1407_v52  ;;  %v1434_v54 = vor.u32 1.1754944e-38, %v1433_v63 }
 0x149   :  { %v630_v8 = vpop.f32.mrf.mxu2  ;;  %1226 = vmatmul.f32.gmra.mxu1 %v1955_v5 }
 0x14a   :  { %v1311_v26 = vrot.slane %v1310_v9, 2  ;;  %v631_v2 = vadd.f32 %v630_v8, %v474_v0  ;;  %v1698_v43 = vpop.eup %1697  ;;  %v817_v16 = vpop.f32.mrf.mxu3  ;;  %v1448_v41 = vor.u32 1.1754944e-38, %v1447_v34  ;;  %v1268_v6 = vmul.f32 %v1160_v45, %v1160_v45  ;;  %v2777_v0 = vld [vmem:[#allocation4_spill] sm:$0xff] }
 0x14b   :  { %v1437_v38 = vmul.f32 %v1698_v43, %v1407_v52  ;;  %vm1442_vm4 = vweird.f32 %v1698_v43  ;;  %v2778_v44 = vand.u32 4294901760, %v2777_v0  ;;  %v482_v45 = vadd.f32 %v2312_v61, %v2309_v12 }
 0x14c   :  { %v1312_v24 = vadd.f32 %v1311_v26, %v1310_v9  ;;  %v818_v31 = vadd.f32 %v817_v16, %v631_v2  ;;  %vm1443_vm6 = vmor %vm1441_vm5, %vm1442_vm4 }
 0x14d   :  { %v2452_v18 = vpop.f32.mrf.mxu0  ;;  %v1438_v13 = vsub.f32 1.0, %v1437_v38 }
 0x14e   :  { %v1313_v27 = vrot.slane %v1312_v24, 1  ;;  %v1017_v7 = vadd.f32 %v1016_v55, %v818_v31  ;;  %714 = vmatmul.f32.gmra.mxu2 %v1995_v60  ;;  %v2456_v5 = vpop.f32.mrf.mxu1  ;;  %v1435_v55 = vsel %vm1432_vm8, %v1434_v54, %v1430_v58 }
 0x14f   :  { %v1439_v42 = vmul.f32 %v1698_v43, %v1438_v13  ;;  %918 = vmatmul.f32.gmra.mxu3 %v2775_v20 }
 0x150   :  { %v1314_v22 = vadd.f32 %v1313_v27, %v1312_v24  ;;  %v1164_v19 = vadd.f32 %v1163_v17, %v1017_v7  ;;  %1083 = vmatmul.f32.gmra.mxu0 %v2776_v25 }
 0x151   :  { %v635_v47 = vpop.f32.mrf.mxu2  ;;  %1230 = vmatmul.f32.gmra.mxu1 %v2776_v25  ;;  %v1440_v23 = vadd.f32 %v1698_v43, %v1439_v42  ;;  %v2782_v42 = vld [vmem:[#allocation5_spill] sm:$0xff] }
 0x152   :  { %v1408_v14 = vmax.f32 %v1314_v22, 1e-20  ;;  %v1269_v15 = vmul.f32 %v1164_v19, %v1164_v19  ;;  %v823_v60 = vpop.f32.mrf.mxu3 }
 0x153   :  { %v1444_v62 = vsel %vm1443_vm6, %v1698_v43, %v1440_v23  ;;  %v478_v43 = vadd.f32 %v2301_v39, %v2298_v50  ;;  %v486_v50 = vadd.f32 %v2323_v35, %v2320_v57  ;;  %v2781_v39 = vand.u32 4294901760, %v2780_v56 }
 0x154   :  { %1699 = vrcp.f32 %v1408_v14  ;;  %v1449_v46 = vsel %vm1446_vm9, %v1448_v41, %v1444_v62  ;;  %v1315_v37 = vadd.f32 %v1269_v15, %v1268_v6  ;;  %v1459_v59 = vand.u32 2147483647, %v1408_v14 }
 0x155   :  { %v1024_v33 = vpop.f32.mrf.mxu0  ;;  %v1663_v17 = vsel %vm1662_vm7, %v1449_v46, %v1435_v55  ;;  %v636_v27 = vadd.f32 %v635_v47, %v478_v43  ;;  %v1461_v63 = vand.u32 2147483648, %v1408_v14  ;;  %vm1455_vm11 = vweird.f32 %v1408_v14 }
 0x156   :  { %719 = vmatmul.f32.gmra.mxu2 %v2777_v0  ;;  %v1171_v52 = vpop.f32.mrf.mxu1  ;;  %v1316_v9 = vrot.slane %v1315_v37, 4  ;;  %vm1460_vm13 = vcmp.eq.f32.partialorder %v1459_v59, 8.507059e+37  ;;  %vm1668_vm9 = vcmask 1044484  }
 0x157   :  { %924 = vmatmul.f32.gmra.mxu3 %v2778_v44  ;;  %v824_v20 = vadd.f32 %v823_v60, %v636_v27  ;;  %v1462_v58 = vor.u32 1.1754944e-38, %v1461_v63  ;;  %v2783_v60 = vld [vmem:[#allocation8_spill] sm:$0xff]  ;;  %v2788_v63 = vld [vmem:[#allocation9_spill] sm:$0xff] }
 0x158   :  { %1087 = vmatmul.f32.gmra.mxu0 %v2779_v32  ;;  %v1317_v8 = vadd.f32 %v1316_v9, %v1315_v37  ;;  %v490_v37 = vadd.f32 %v2334_v11, %v2331_v40  ;;  %v2784_v0 = vand.u32 4294901760, %v2783_v60 }
 0x159   :  { %v640_v26 = vpop.f32.mrf.mxu2  ;;  %1234 = vmatmul.f32.gmra.mxu1 %v2779_v32 }
 0x15a   :  { %v1700_v2 = vpop.eup %1699  ;;  %v1318_v38 = vrot.slane %v1317_v8, 2  ;;  %v641_v24 = vadd.f32 %v640_v26, %v482_v45  ;;  %v829_v31 = vpop.f32.mrf.mxu3 }
 0x15b   :  { %v1451_v16 = vmul.f32 %v1700_v2, %v1408_v14  ;;  %vm1456_vm10 = vweird.f32 %v1700_v2  ;;  %v1021_v14 = vadd.f32 %v2452_v18, %v824_v20 }
 0x15c   :  { %v1319_v13 = vadd.f32 %v1318_v38, %v1317_v8  ;;  %v830_v48 = vadd.f32 %v829_v31, %v641_v24  ;;  %vm1457_vm12 = vmor %vm1455_vm11, %vm1456_vm10 }
 0x15d   :  { %v1452_v29 = vsub.f32 1.0, %v1451_v16  ;;  %v1028_v7 = vpop.f32.mrf.mxu0  ;;  %v1168_v9 = vadd.f32 %v2456_v5, %v1021_v14  ;;  %v2786_v16 = vld [vmem:[#allocation10_spill] sm:$0xff]  ;;  %v494_v5 = vadd.f32 %v2345_v3, %v2342_v51 }
 0x15e   :  { %724 = vmatmul.f32.gmra.mxu2 %v2780_v56  ;;  %v1175_v12 = vpop.f32.mrf.mxu1  ;;  %v1320_v34 = vrot.slane %v1319_v13, 1  ;;  %v1025_v15 = vadd.f32 %v1024_v33, %v830_v48  ;;  %v2785_v33 = vld [vmem:[#allocation7_spill] sm:$0xff]  ;;  %v2787_v59 = vand.u32 4294901760, %v2786_v16 }
 0x15f   :  { %v1453_v61 = vmul.f32 %v1700_v2, %v1452_v29  ;;  %930 = vmatmul.f32.gmra.mxu3 %v2781_v39 }
 0x160   :  { %1091 = vmatmul.f32.gmra.mxu0 %v2782_v42  ;;  %v1321_v19 = vadd.f32 %v1320_v34, %v1319_v13  ;;  %v1172_v55 = vadd.f32 %v1171_v52, %v1025_v15  ;;  %v498_v15 = vadd.f32 %v2356_v30, %v2353_v1 }
 0x161   :  { %v1454_v22 = vadd.f32 %v1700_v2, %v1453_v61  ;;  %v645_v25 = vpop.f32.mrf.mxu2  ;;  %1238 = vmatmul.f32.gmra.mxu1 %v2782_v42 }
 0x162   :  { %v1409_v23 = vmax.f32 %v1321_v19, 1e-20  ;;  %v646_v57 = vadd.f32 %v645_v25, %v486_v50  ;;  %v835_v35 = vpop.f32.mrf.mxu3  ;;  %v1271_v32 = vmul.f32 %v1172_v55, %v1172_v55 }
 0x163   :  { %v1458_v47 = vsel %vm1457_vm12, %v1700_v2, %v1454_v22  ;;  %v1270_v2 = vmul.f32 %v1168_v9, %v1168_v9 }
 0x164   :  { %v1463_v54 = vsel %vm1460_vm13, %v1462_v58, %v1458_v47  ;;  %1701 = vrcp.f32 %v1409_v23  ;;  %v836_v46 = vadd.f32 %v835_v35, %v646_v57  ;;  %v1475_v24 = vand.u32 2147483648, %v1409_v23  ;;  %v2789_v58 = vld [vmem:[#allocation11_spill] sm:$0xff] }
 0x165   :  { %v1665_v41 = vsel %vm1664_vm14, %v1463_v54, %v1663_v17  ;;  %v1032_v6 = vpop.f32.mrf.mxu0  ;;  %v1322_v31 = vadd.f32 %v1271_v32, %v1270_v2  ;;  %v1473_v27 = vand.u32 2147483647, %v1409_v23  ;;  %vm1469_vm0 = vweird.f32 %v1409_v23 }
 0x166   :  { %729 = vmatmul.f32.gmra.mxu2 %v2783_v60  ;;  %v1179_v62 = vpop.f32.mrf.mxu1  ;;  %v1029_v45 = vadd.f32 %v1028_v7, %v836_v46  ;;  %v1476_v51 = vor.u32 1.1754944e-38, %v1475_v24  ;;  %v2790_v35 = vand.u32 4294901760, %v2789_v58  ;;  %v2794_v24 = vld [vmem:[#allocation12_spill] sm:$0xff] }
 0x167   :  { %936 = vmatmul.f32.gmra.mxu3 %v2784_v0  ;;  %v1323_v3 = vrot.slane %v1322_v31, 4  ;;  %vm1474_vm3 = vcmp.eq.f32.partialorder %v1473_v27, 8.507059e+37 }
 0x168   :  { %1095 = vmatmul.f32.gmra.mxu0 %v2785_v33  ;;  %v1176_v29 = vadd.f32 %v1175_v12, %v1029_v45 }
 0x169   :  { %v650_v17 = vpop.f32.mrf.mxu2  ;;  %1242 = vmatmul.f32.gmra.mxu1 %v2785_v33 }
 0x16a   :  { %v651_v18 = vadd.f32 %v650_v17, %v490_v37  ;;  %v1702_v44 = vpop.eup %1701  ;;  %v841_v8 = vpop.f32.mrf.mxu3  ;;  %v1272_v12 = vmul.f32 %v1176_v29, %v1176_v29  ;;  %v2791_v17 = vand.u32 4294901760, %v2163_v21 }
 0x16b   :  { %v1465_v52 = vmul.f32 %v1702_v44, %v1409_v23  ;;  %vm1470_vm15 = vweird.f32 %v1702_v44  ;;  %v1324_v23 = vadd.f32 %v1323_v3, %v1322_v31 }
 0x16c   :  { %v842_v26 = vadd.f32 %v841_v8, %v651_v18  ;;  %vm1471_vm1 = vmor %vm1469_vm0, %vm1470_vm15 }
 0x16d   :  { %v1036_v43 = vpop.f32.mrf.mxu0  ;;  %v1466_v40 = vsub.f32 1.0, %v1465_v52 }
 0x16e   :  { %v1033_v11 = vadd.f32 %v1032_v6, %v842_v26  ;;  %734 = vmatmul.f32.gmra.mxu2 %v2786_v16  ;;  %v1183_v38 = vpop.f32.mrf.mxu1  ;;  %v1325_v6 = vrot.slane %v1324_v23, 2 }
 0x16f   :  { %v1467_v13 = vmul.f32 %v1702_v44, %v1466_v40  ;;  %942 = vmatmul.f32.gmra.mxu3 %v2787_v59 }
 0x170   :  { %v1180_v7 = vadd.f32 %v1179_v62, %v1033_v11  ;;  %1099 = vmatmul.f32.gmra.mxu0 %v2788_v63  ;;  %v1326_v30 = vadd.f32 %v1325_v6, %v1324_v23 }
 0x171   :  { %v655_v56 = vpop.f32.mrf.mxu2  ;;  %1246 = vmatmul.f32.gmra.mxu1 %v2788_v63  ;;  %v1468_v61 = vadd.f32 %v1702_v44, %v1467_v13 }
 0x172   :  { %v1273_v34 = vmul.f32 %v1180_v7, %v1180_v7  ;;  %v656_v48 = vadd.f32 %v655_v56, %v494_v5  ;;  %v847_v50 = vpop.f32.mrf.mxu3  ;;  %v1327_v45 = vrot.slane %v1326_v30, 1 }
 0x173   :  { %v1472_v39 = vsel %vm1471_vm1, %v1702_v44, %v1468_v61 }
 0x174   :  { %v1477_v42 = vsel %vm1474_vm3, %v1476_v51, %v1472_v39  ;;  %v1329_v22 = vadd.f32 %v1273_v34, %v1272_v12  ;;  %v848_v25 = vadd.f32 %v847_v50, %v656_v48  ;;  %v1328_v11 = vadd.f32 %v1327_v45, %v1326_v30 }
 0x175   :  { %v1040_v19 = vpop.f32.mrf.mxu0  ;;  %v2506_v20 = vsel %vm1666_vm2, %v1477_v42, %v1665_v41 }
 0x176   :  { %739 = vmatmul.f32.gmra.mxu2 %v2789_v58  ;;  %v1187_v47 = vpop.f32.mrf.mxu1  ;;  %v1330_v57 = vrot.slane %v1329_v22, 4  ;;  %v1037_v14 = vadd.f32 %v1036_v43, %v848_v25  ;;  %v2529_v27 = vmax.f32 %v1328_v11, 1e-20 }
 0x177   :  { %948 = vmatmul.f32.gmra.mxu3 %v2790_v35 }
 0x178   :  { %1103 = vmatmul.f32.gmra.mxu0 %v2123_v28  ;;  %v1331_v62 = vadd.f32 %v1330_v57, %v1329_v22  ;;  %v1184_v37 = vadd.f32 %v1183_v38, %v1037_v14  ;;  %v2792_v38 = vld [vmem:[#allocation28_spill] sm:$0xff]  ;;  %1703 = vrcp.f32 %v2529_v27  ;;  %vm1483_vm5 = vweird.f32 %v2529_v27 }
 0x179   :  { %v660_v54 = vpop.f32.mrf.mxu2  ;;  %1250 = vmatmul.f32.gmra.mxu1 %v2123_v28  ;;  %v502_v28 = vadd.f32 %v2367_v10, %v2364_v49  ;;  %v506_v49 = vadd.f32 %v2792_v38, %v2375_v4 }
 0x17a   :  { %v661_v41 = vadd.f32 %v660_v54, %v498_v15  ;;  %v853_v60 = vpop.f32.mrf.mxu3  ;;  %v1332_v33 = vrot.slane %v1331_v62, 2  ;;  %v1274_v44 = vmul.f32 %v1184_v37, %v1184_v37  ;;  %v2796_v37 = vld [vmem:[#allocation14_spill] sm:$0xff] }
 0x17c   :  { %v854_v55 = vadd.f32 %v853_v60, %v661_v41  ;;  %v1333_v26 = vadd.f32 %v1332_v33, %v1331_v62 }
 0x17d   :  { %v1044_v46 = vpop.f32.mrf.mxu0 }
 0x17e   :  { %v1041_v0 = vadd.f32 %v1040_v19, %v854_v55  ;;  %744 = vmatmul.f32.gmra.mxu2 %v2163_v21  ;;  %v1191_v1 = vpop.f32.mrf.mxu1  ;;  %v1334_v10 = vrot.slane %v1333_v26, 1  ;;  %v2795_v19 = vld [vmem:[#allocation13_spill] sm:$0xff]  ;;  %v2538_v23 = vpop.eup %1703 }
 0x17f   :  { %954 = vmatmul.f32.gmra.mxu3 %v2791_v17  ;;  %v1479_v41 = vmul.f32 %v2538_v23, %v2529_v27  ;;  %vm1484_vm4 = vweird.f32 %v2538_v23 }
 0x180   :  { %v1188_v9 = vadd.f32 %v1187_v47, %v1041_v0  ;;  %1107 = vmatmul.f32.gmra.mxu0 %v2151_v36  ;;  %v1335_v63 = vadd.f32 %v1334_v10, %v1333_v26  ;;  %vm2563_vm6 = vmor %vm1483_vm5, %vm1484_vm4  ;;  %vm1670_vm5 = vcmask 1045509  }
 0x181   :  { %v665_v18 = vpop.f32.mrf.mxu2  ;;  %1254 = vmatmul.f32.gmra.mxu1 %v2151_v36  ;;  %v2793_v36 = vand.u32 4294901760, %v2188_v53 }
 0x182   :  { %v1275_v32 = vmul.f32 %v1188_v9, %v1188_v9  ;;  %v666_v8 = vadd.f32 %v665_v18, %v502_v28  ;;  %v859_v52 = vpop.f32.mrf.mxu3  ;;  %v2532_v3 = vmax.f32 %v1335_v63, 1e-20  ;;  %v1480_v9 = vsub.f32 1.0, %v1479_v41  ;;  %v2811_v41 = vld [vmem:[#allocation19_spill] sm:$0xff] }
 0x184   :  { %v1336_v2 = vadd.f32 %v1275_v32, %v1274_v44  ;;  %v860_v16 = vadd.f32 %v859_v52, %v666_v8  ;;  %1705 = vrcp.f32 %v2532_v3  ;;  %v1481_v26 = vmul.f32 %v2538_v23, %v1480_v9 }
 0x185   :  { %v1048_v43 = vpop.f32.mrf.mxu0  ;;  %vm1497_vm12 = vweird.f32 %v2532_v3 }
 0x186   :  { %v1337_v40 = vrot.slane %v1336_v2, 4  ;;  %749 = vmatmul.f32.gmra.mxu2 %v2188_v53  ;;  %v1195_v21 = vpop.f32.mrf.mxu1  ;;  %v1045_v7 = vadd.f32 %v1044_v46, %v860_v16 }
 0x187   :  { %960 = vmatmul.f32.gmra.mxu3 %v2793_v36 }
 0x188   :  { %v1338_v5 = vadd.f32 %v1337_v40, %v1336_v2  ;;  %1111 = vmatmul.f32.gmra.mxu0 %v2794_v24  ;;  %v1192_v53 = vadd.f32 %v1191_v1, %v1045_v7 }
 0x189   :  { %v670_v31 = vpop.f32.mrf.mxu2  ;;  %1258 = vmatmul.f32.gmra.mxu1 %v2794_v24 }
 0x18a   :  { %v1339_v29 = vrot.slane %v1338_v5, 2  ;;  %v671_v13 = vadd.f32 %v670_v31, %v506_v49  ;;  %v865_v59 = vpop.f32.mrf.mxu3  ;;  %v1276_v58 = vmul.f32 %v1192_v53, %v1192_v53  ;;  %v2543_v55 = vpop.eup %1705  ;;  %v2797_v49 = vld [vmem:[#allocation15_spill] sm:$0xff]  ;;  %v1482_v31 = vadd.f32 %v2538_v23, %v1481_v26 }
 0x18b   :  { %v1493_v28 = vmul.f32 %v2543_v55, %v2532_v3  ;;  %vm1498_vm10 = vweird.f32 %v2543_v55 }
 0x18c   :  { %v1340_v56 = vadd.f32 %v1339_v29, %v1338_v5  ;;  %v866_v61 = vadd.f32 %v865_v59, %v671_v13  ;;  %v1487_v5 = vand.u32 2147483647, %v2529_v27  ;;  %vm2585_vm13 = vmor %vm1497_vm12, %vm1498_vm10 }
 0x18d   :  { %v1052_v4 = vpop.f32.mrf.mxu0 }
 0x18e   :  { %v1341_v34 = vrot.slane %v1340_v56, 1  ;;  %v1049_v48 = vadd.f32 %v1048_v43, %v866_v61  ;;  %v1199_v51 = vpop.f32.mrf.mxu1  ;;  %v1494_v43 = vsub.f32 1.0, %v1493_v28  ;;  %vm2571_vm8 = vcmp.eq.f32.partialorder %v1487_v5, 8.507059e+37 }
 0x190   :  { %v1342_v12 = vadd.f32 %v1341_v34, %v1340_v56  ;;  %v1196_v50 = vadd.f32 %v1195_v21, %v1049_v48  ;;  %v1495_v7 = vmul.f32 %v2543_v55, %v1494_v43  ;;  %v1489_v48 = vand.u32 2147483648, %v2529_v27 }
 0x191   :  { %v675_v39 = vpop.f32.mrf.mxu2 }
 0x192   :  { %v2534_v42 = vmax.f32 %v1342_v12, 1e-20  ;;  %v1277_v22 = vmul.f32 %v1196_v50, %v1196_v50  ;;  %v676_v25 = vadd.f32 %v675_v39, %v2795_v19  ;;  %v871_v47 = vpop.f32.mrf.mxu3  ;;  %v1496_v39 = vadd.f32 %v2543_v55, %v1495_v7 }
 0x193   :  { %v1503_v19 = vand.u32 2147483648, %v2532_v3 }
 0x194   :  { %1707 = vrcp.f32 %v2534_v42  ;;  %v1343_v15 = vadd.f32 %v1277_v22, %v1276_v58  ;;  %v872_v35 = vadd.f32 %v871_v47, %v676_v25  ;;  %v1501_v22 = vand.u32 2147483647, %v2532_v3  ;;  %v2802_v47 = vld [vmem:[#allocation16_spill] sm:$0xff] }
 0x195   :  { %v1056_v57 = vpop.f32.mrf.mxu0  ;;  %vm1511_vm15 = vweird.f32 %v2534_v42  ;;  %v1500_v3 = vsel %vm2585_vm13, %v2543_v55, %v1496_v39 }
 0x196   :  { %v1203_v54 = vpop.f32.mrf.mxu1  ;;  %v1344_v14 = vrot.slane %v1343_v15, 4  ;;  %v1053_v6 = vadd.f32 %v1052_v4, %v872_v35  ;;  %v1515_v35 = vand.u32 2147483647, %v2534_v42  ;;  %vm2596_vm0 = vcmp.eq.f32.partialorder %v1501_v22, 8.507059e+37 }
 0x198   :  { %v1345_v60 = vadd.f32 %v1344_v14, %v1343_v15  ;;  %v1200_v46 = vadd.f32 %v1199_v51, %v1053_v6  ;;  %v1486_v51 = vsel %vm2563_vm6, %v2538_v23, %v1482_v31  ;;  %vm1516_vm3 = vcmp.eq.f32.partialorder %v1515_v35, 8.507059e+37 }
 0x199   :  { %v680_v62 = vpop.f32.mrf.mxu2  ;;  %vm1672_vm6 = vcmask 1046534  }
 0x19a   :  { %v681_v0 = vadd.f32 %v680_v62, %v2796_v37  ;;  %v2546_v1 = vpop.eup %1707  ;;  %v1346_v30 = vrot.slane %v1345_v60, 2  ;;  %v877_v33 = vpop.f32.mrf.mxu3  ;;  %v1278_v16 = vmul.f32 %v1200_v46, %v1200_v46 }
 0x19b   :  { %v1507_v32 = vmul.f32 %v2546_v1, %v2534_v42  ;;  %vm1512_vm11 = vweird.f32 %v2546_v1 }
 0x19c   :  { %v878_v17 = vadd.f32 %v877_v33, %v681_v0  ;;  %v1347_v18 = vadd.f32 %v1346_v30, %v1345_v60  ;;  %v1504_v0 = vor.u32 1.1754944e-38, %v1503_v19  ;;  %vm2602_vm1 = vmor %vm1511_vm15, %vm1512_vm11  ;;  %vm1674_vm11 = vcmask 1047559  }
 0x19d   :  { %v1060_v44 = vpop.f32.mrf.mxu0  ;;  %v1508_v11 = vsub.f32 1.0, %v1507_v32 }
 0x19e   :  { %v1057_v45 = vadd.f32 %v1056_v57, %v878_v17  ;;  %v1207_v8 = vpop.f32.mrf.mxu1  ;;  %v1348_v52 = vrot.slane %v1347_v18, 1  ;;  %v1490_v57 = vor.u32 1.1754944e-38, %v1489_v48  ;;  %v1505_v26 = vsel %vm2596_vm0, %v1504_v0, %v1500_v3 }
 0x19f   :  { %v1509_v63 = vmul.f32 %v2546_v1, %v1508_v11 }
 0x1a0   :  { %v1204_v2 = vadd.f32 %v1203_v54, %v1057_v45  ;;  %v1349_v40 = vadd.f32 %v1348_v52, %v1347_v18  ;;  %v1517_v54 = vand.u32 2147483648, %v2534_v42  ;;  %v1491_v46 = vsel %vm2571_vm8, %v1490_v57, %v1486_v51  ;;  %v2810_v51 = vld [vmem:[#allocation18_spill] sm:$0xff] }
 0x1a1   :  { %v685_v21 = vpop.f32.mrf.mxu2  ;;  %v1510_v25 = vadd.f32 %v2546_v1, %v1509_v63 }
 0x1a2   :  { %v1279_v38 = vmul.f32 %v1204_v2, %v1204_v2  ;;  %v686_v10 = vadd.f32 %v685_v21, %v2797_v49  ;;  %v2555_v36 = vmax.f32 %v1349_v40, 1e-20  ;;  %v883_v24 = vpop.f32.mrf.mxu3  ;;  %v1518_v18 = vor.u32 1.1754944e-38, %v1517_v54  ;;  %v2809_v21 = vld [vmem:[#allocation17_spill] sm:$0xff] }
 0x1a3   :  { %v1514_v33 = vsel %vm2602_vm1, %v2546_v1, %v1510_v25 }
 0x1a4   :  { %v1350_v29 = vadd.f32 %v1279_v38, %v1278_v16  ;;  %v884_v13 = vadd.f32 %v883_v24, %v686_v10  ;;  %1709 = vrcp.f32 %v2555_v36  ;;  %v1531_v32 = vand.u32 2147483648, %v2555_v36 }
 0x1a5   :  { %v1064_v59 = vpop.f32.mrf.mxu0  ;;  %v1519_v2 = vsel %vm1516_vm3, %v1518_v18, %v1514_v33  ;;  %vm1525_vm8 = vweird.f32 %v2555_v36  ;;  %v1669_v16 = vsel %vm1668_vm9, %v1491_v46, %v2506_v20 }
 0x1a6   :  { %v1351_v56 = vrot.slane %v1350_v29, 4  ;;  %v1061_v61 = vadd.f32 %v1060_v44, %v884_v13  ;;  %v1211_v4 = vpop.f32.mrf.mxu1  ;;  %v1529_v44 = vand.u32 2147483647, %v2555_v36  ;;  %v1532_v38 = vor.u32 1.1754944e-38, %v1531_v32 }
 0x1a7   :  { %v1671_v5 = vsel %vm1670_vm5, %v1505_v26, %v1669_v16 }
 0x1a8   :  { %v1352_v12 = vadd.f32 %v1351_v56, %v1350_v29  ;;  %v1208_v50 = vadd.f32 %v1207_v8, %v1061_v61  ;;  %vm1530_vm12 = vcmp.eq.f32.partialorder %v1529_v44, 8.507059e+37  ;;  %v1673_v29 = vsel %vm1672_vm6, %v1519_v2, %v1671_v5  ;;  %v2812_v44 = vld [vmem:[#allocation20_spill] sm:$0xff] }
 0x1a9   :  { %v690_v27 = vpop.f32.mrf.mxu2 }
 0x1aa   :  { %v1353_v58 = vrot.slane %v1352_v12, 2  ;;  %v691_v23 = vadd.f32 %v690_v27, %v2802_v47  ;;  %v1710_v15 = vpop.eup %1709  ;;  %v889_v14 = vpop.f32.mrf.mxu3  ;;  %v1280_v49 = vmul.f32 %v1208_v50, %v1208_v50 }
 0x1ab   :  { %v1521_v6 = vmul.f32 %v1710_v15, %v2555_v36  ;;  %vm1526_vm4 = vweird.f32 %v1710_v15 }
 0x1ac   :  { %v1354_v60 = vadd.f32 %v1353_v58, %v1352_v12  ;;  %v890_v62 = vadd.f32 %v889_v14, %v691_v23  ;;  %vm1527_vm10 = vmor %vm1525_vm8, %vm1526_vm4 }
 0x1ad   :  { %v1068_v30 = vpop.f32.mrf.mxu0  ;;  %v1522_v9 = vsub.f32 1.0, %v1521_v6 }
 0x1ae   :  { %v1355_v17 = vrot.slane %v1354_v60, 1  ;;  %v1065_v28 = vadd.f32 %v1064_v59, %v890_v62  ;;  %v1215_v55 = vpop.f32.mrf.mxu1 }
 0x1af   :  { %v1523_v45 = vmul.f32 %v1710_v15, %v1522_v9 }
 0x1b0   :  { %v1356_v8 = vadd.f32 %v1355_v17, %v1354_v60  ;;  %v1212_v52 = vadd.f32 %v1211_v4, %v1065_v28 }
 0x1b1   :  { %v695_v1 = vpop.f32.mrf.mxu2  ;;  %v1524_v43 = vadd.f32 %v1710_v15, %v1523_v45 }
 0x1b2   :  { %v1281_v40 = vmul.f32 %v1212_v52, %v1212_v52  ;;  %v696_v11 = vadd.f32 %v695_v1, %v2809_v21  ;;  %v895_v10 = vpop.f32.mrf.mxu3  ;;  %v2618_v31 = vmax.f32 %v1356_v8, 1e-20 }
 0x1b3   :  { %v1528_v24 = vsel %vm1527_vm10, %v1710_v15, %v1524_v43 }
 0x1b4   :  { %v1533_v36 = vsel %vm1530_vm12, %v1532_v38, %v1528_v24  ;;  %v1357_v13 = vadd.f32 %v1281_v40, %v1280_v49  ;;  %v896_v7 = vadd.f32 %v895_v10, %v696_v11  ;;  %1711 = vrcp.f32 %v2618_v31 }
 0x1b5   :  { %v1072_v59 = vpop.f32.mrf.mxu0  ;;  %v1675_v63 = vsel %vm1674_vm11, %v1533_v36, %v1673_v29  ;;  %vm1539_vm15 = vweird.f32 %v2618_v31  ;;  %v1543_v38 = vand.u32 2147483647, %v2618_v31  ;;  %v1545_v49 = vand.u32 2147483648, %v2618_v31 }
 0x1b6   :  { %v1219_v20 = vpop.f32.mrf.mxu1  ;;  %1685 = vst [vmem:[%s2666_s2] sm:$0xff] %v1675_v63  ;;  %v1358_v56 = vrot.slane %v1357_v13, 4  ;;  %v1069_v61 = vadd.f32 %v1068_v30, %v896_v7 }
 0x1b7   :  { %vm1544_vm8 = vcmp.eq.f32.partialorder %v1543_v38, 8.507059e+37 }
 0x1b8   :  { %v1359_v4 = vadd.f32 %v1358_v56, %v1357_v13  ;;  %v1216_v34 = vadd.f32 %v1215_v55, %v1069_v61 }
 0x1b9   :  { %v700_v48 = vpop.f32.mrf.mxu2 }
 0x1ba   :  { %v701_v53 = vadd.f32 %v700_v48, %v2810_v51  ;;  %v1360_v12 = vrot.slane %v1359_v4, 2  ;;  %v901_v50 = vpop.f32.mrf.mxu3  ;;  %v2627_v27 = vpop.eup %1711  ;;  %v1282_v54 = vmul.f32 %v1216_v34, %v1216_v34 }
 0x1bb   :  { %v1535_v15 = vmul.f32 %v2627_v27, %v2618_v31  ;;  %vm1540_vm13 = vweird.f32 %v2627_v27  ;;  %v2815_v31 = vld [vmem:[#allocation21_spill] sm:$0xff] }
 0x1bc   :  { %v902_v39 = vadd.f32 %v901_v50, %v701_v53  ;;  %v1361_v22 = vadd.f32 %v1360_v12, %v1359_v4  ;;  %vm2639_vm0 = vmor %vm1539_vm15, %vm1540_vm13  ;;  %v1546_v4 = vor.u32 1.1754944e-38, %v1545_v49 }
 0x1bd   :  { %v1076_v19 = vpop.f32.mrf.mxu0  ;;  %v1536_v37 = vsub.f32 1.0, %v1535_v15 }
 0x1be   :  { %v1073_v25 = vadd.f32 %v1072_v59, %v902_v39  ;;  %v1223_v58 = vpop.f32.mrf.mxu1  ;;  %v1362_v47 = vrot.slane %v1361_v22, 1 }
 0x1bf   :  { %v1537_v28 = vmul.f32 %v2627_v27, %v1536_v37 }
 0x1c0   :  { %v1220_v23 = vadd.f32 %v1219_v20, %v1073_v25  ;;  %v1363_v57 = vadd.f32 %v1362_v47, %v1361_v22 }
 0x1c1   :  { %v705_v35 = vpop.f32.mrf.mxu2  ;;  %v1538_v1 = vadd.f32 %v2627_v27, %v1537_v28 }
 0x1c2   :  { %v1283_v14 = vmul.f32 %v1220_v23, %v1220_v23  ;;  %v706_v6 = vadd.f32 %v705_v35, %v2811_v41  ;;  %v1415_v60 = vmax.f32 %v1363_v57, 1e-20  ;;  %v907_v62 = vpop.f32.mrf.mxu3  ;;  %v2816_v35 = vld [vmem:[#allocation22_spill] sm:$0xff] }
 0x1c3   :  { %v1542_v7 = vsel %vm2639_vm0, %v2627_v27, %v1538_v1 }
 0x1c4   :  { %v1364_v46 = vadd.f32 %v1283_v14, %v1282_v54  ;;  %v908_v3 = vadd.f32 %v907_v62, %v706_v6  ;;  %1713 = vrcp.f32 %v1415_v60  ;;  %v1557_v10 = vand.u32 2147483647, %v1415_v60 }
 0x1c5   :  { %v1080_v0 = vpop.f32.mrf.mxu0  ;;  %v1559_v5 = vand.u32 2147483648, %v1415_v60  ;;  %vm1553_vm3 = vweird.f32 %v1415_v60  ;;  %v1547_v12 = vsel %vm1544_vm8, %v1546_v4, %v1542_v7 }
 0x1c6   :  { %v1365_v42 = vrot.slane %v1364_v46, 4  ;;  %v1077_v30 = vadd.f32 %v1076_v19, %v908_v3  ;;  %v1227_v33 = vpop.f32.mrf.mxu1  ;;  %vm1558_vm10 = vcmp.eq.f32.partialorder %v1557_v10, 8.507059e+37 }
 0x1c7   :  { %v1560_v34 = vor.u32 1.1754944e-38, %v1559_v5 }
 0x1c8   :  { %v1366_v9 = vadd.f32 %v1365_v42, %v1364_v46  ;;  %v1224_v17 = vadd.f32 %v1223_v58, %v1077_v30 }
 0x1c9   :  { %v710_v55 = vpop.f32.mrf.mxu2 }
 0x1ca   :  { %v1367_v18 = vrot.slane %v1366_v9, 2  ;;  %v711_v32 = vadd.f32 %v710_v55, %v2812_v44  ;;  %v1714_v45 = vpop.eup %1713  ;;  %v913_v8 = vpop.f32.mrf.mxu3  ;;  %v1284_v48 = vmul.f32 %v1224_v17, %v1224_v17 }
 0x1cb   :  { %v1549_v52 = vmul.f32 %v1714_v45, %v1415_v60  ;;  %vm1554_vm1 = vweird.f32 %v1714_v45 }
 0x1cc   :  { %v1368_v26 = vadd.f32 %v1367_v18, %v1366_v9  ;;  %v914_v2 = vadd.f32 %v913_v8, %v711_v32  ;;  %vm1555_vm4 = vmor %vm1553_vm3, %vm1554_vm1 }
 0x1cd   :  { %v1084_v43 = vpop.f32.mrf.mxu0  ;;  %v1550_v40 = vsub.f32 1.0, %v1549_v52 }
 0x1ce   :  { %v1369_v21 = vrot.slane %v1368_v26, 1  ;;  %v1081_v11 = vadd.f32 %v1080_v0, %v914_v2  ;;  %v1231_v16 = vpop.f32.mrf.mxu1  ;;  %v2817_v2 = vld [vmem:[#allocation23_spill] sm:$0xff] }
 0x1cf   :  { %v1551_v29 = vmul.f32 %v1714_v45, %v1550_v40 }
 0x1d0   :  { %v1370_v36 = vadd.f32 %v1369_v21, %v1368_v26  ;;  %v1228_v13 = vadd.f32 %v1227_v33, %v1081_v11 }
 0x1d1   :  { %v715_v59 = vpop.f32.mrf.mxu2  ;;  %v1552_v63 = vadd.f32 %v1714_v45, %v1551_v29 }
 0x1d2   :  { %v1416_v20 = vmax.f32 %v1370_v36, 1e-20  ;;  %v1285_v56 = vmul.f32 %v1228_v13, %v1228_v13  ;;  %v716_v61 = vadd.f32 %v715_v59, %v2815_v31  ;;  %v919_v51 = vpop.f32.mrf.mxu3  ;;  %v2818_v36 = vld [vmem:[#allocation24_spill] sm:$0xff] }
 0x1d3   :  { %v1556_v53 = vsel %vm1555_vm4, %v1714_v45, %v1552_v63 }
 0x1d4   :  { %1715 = vrcp.f32 %v1416_v20  ;;  %v1561_v50 = vsel %vm1558_vm10, %v1560_v34, %v1556_v53  ;;  %v1371_v39 = vadd.f32 %v1285_v56, %v1284_v48  ;;  %v920_v27 = vadd.f32 %v919_v51, %v716_v61 }
 0x1d5   :  { %v1088_v22 = vpop.f32.mrf.mxu0  ;;  %v1676_v19 = vsel %vm1662_vm7, %v1561_v50, %v1547_v12  ;;  %v1573_v37 = vand.u32 2147483648, %v1416_v20  ;;  %v1571_v9 = vand.u32 2147483647, %v1416_v20  ;;  %vm1567_vm12 = vweird.f32 %v1416_v20 }
 0x1d6   :  { %v1235_v25 = vpop.f32.mrf.mxu1  ;;  %v1372_v58 = vrot.slane %v1371_v39, 4  ;;  %v1085_v57 = vadd.f32 %v1084_v43, %v920_v27 }
 0x1d7   :  { %v1574_v32 = vor.u32 1.1754944e-38, %v1573_v37  ;;  %vm1572_vm15 = vcmp.eq.f32.partialorder %v1571_v9, 8.507059e+37  ;;  %v2820_v9 = vld [vmem:[#allocation26_spill] sm:$0xff] }
 0x1d8   :  { %v1373_v47 = vadd.f32 %v1372_v58, %v1371_v39  ;;  %v1232_v0 = vadd.f32 %v1231_v16, %v1085_v57 }
 0x1d9   :  { %v720_v23 = vpop.f32.mrf.mxu2 }
 0x1da   :  { %v1716_v15 = vpop.eup %1715  ;;  %v721_v54 = vadd.f32 %v720_v23, %v2816_v35  ;;  %v1374_v41 = vrot.slane %v1373_v47, 2  ;;  %v925_v6 = vpop.f32.mrf.mxu3  ;;  %v1286_v45 = vmul.f32 %v1232_v0, %v1232_v0  ;;  %v2819_v23 = vld [vmem:[#allocation25_spill] sm:$0xff] }
 0x1db   :  { %v1563_v14 = vmul.f32 %v1716_v15, %v1416_v20  ;;  %vm1568_vm7 = vweird.f32 %v1716_v15 }
 0x1dc   :  { %v926_v60 = vadd.f32 %v925_v6, %v721_v54  ;;  %v1375_v46 = vadd.f32 %v1374_v41, %v1373_v47  ;;  %vm1569_vm13 = vmor %vm1567_vm12, %vm1568_vm7 }
 0x1dd   :  { %v1564_v62 = vsub.f32 1.0, %v1563_v14  ;;  %v1092_v3 = vpop.f32.mrf.mxu0 }
 0x1de   :  { %v1089_v42 = vadd.f32 %v1088_v22, %v926_v60  ;;  %v1239_v30 = vpop.f32.mrf.mxu1  ;;  %v1376_v17 = vrot.slane %v1375_v46, 1 }
 0x1df   :  { %v1565_v33 = vmul.f32 %v1716_v15, %v1564_v62 }
 0x1e0   :  { %v1236_v28 = vadd.f32 %v1235_v25, %v1089_v42  ;;  %v1377_v18 = vadd.f32 %v1376_v17, %v1375_v46 }
 0x1e1   :  { %v1566_v55 = vadd.f32 %v1716_v15, %v1565_v33  ;;  %v725_v44 = vpop.f32.mrf.mxu2 }
 0x1e2   :  { %v1287_v8 = vmul.f32 %v1236_v28, %v1236_v28  ;;  %v1417_v26 = vmax.f32 %v1377_v18, 1e-20  ;;  %v726_v1 = vadd.f32 %v725_v44, %v2817_v2  ;;  %v931_v43 = vpop.f32.mrf.mxu3 }
 0x1e3   :  { %v1570_v52 = vsel %vm1569_vm13, %v1716_v15, %v1566_v55 }
 0x1e4   :  { %v1575_v40 = vsel %vm1572_vm15, %v1574_v32, %v1570_v52  ;;  %v1378_v21 = vadd.f32 %v1287_v8, %v1286_v45  ;;  %1717 = vrcp.f32 %v1417_v26  ;;  %v932_v10 = vadd.f32 %v931_v43, %v726_v1 }
 0x1e5   :  { %v1677_v11 = vsel %vm1664_vm14, %v1575_v40, %v1676_v19  ;;  %v1096_v16 = vpop.f32.mrf.mxu0  ;;  %v1585_v51 = vand.u32 2147483647, %v1417_v26  ;;  %v1587_v53 = vand.u32 2147483648, %v1417_v26  ;;  %vm1581_vm0 = vweird.f32 %v1417_v26 }
 0x1e6   :  { %v1379_v38 = vrot.slane %v1378_v21, 4  ;;  %v1243_v49 = vpop.f32.mrf.mxu1  ;;  %v1093_v59 = vadd.f32 %v1092_v3, %v932_v10 }
 0x1e7   :  { %v1588_v57 = vor.u32 1.1754944e-38, %v1587_v53  ;;  %vm1586_vm3 = vcmp.eq.f32.partialorder %v1585_v51, 8.507059e+37  ;;  %v2822_v51 = vld [vmem:[#allocation29_spill] sm:$0xff] }
 0x1e8   :  { %v1380_v5 = vadd.f32 %v1379_v38, %v1378_v21  ;;  %v1240_v12 = vadd.f32 %v1239_v30, %v1093_v59 }
 0x1e9   :  { %v730_v24 = vpop.f32.mrf.mxu2 }
 0x1ea   :  { %v1381_v29 = vrot.slane %v1380_v5, 2  ;;  %v731_v13 = vadd.f32 %v730_v24, %v2818_v36  ;;  %v1718_v7 = vpop.eup %1717  ;;  %v937_v63 = vpop.f32.mrf.mxu3  ;;  %v1288_v35 = vmul.f32 %v1240_v12, %v1240_v12  ;;  %v2821_v36 = vld [vmem:[#allocation27_spill] sm:$0xff] }
 0x1eb   :  { %v1577_v20 = vmul.f32 %v1718_v7, %v1417_v26  ;;  %vm1582_vm14 = vweird.f32 %v1718_v7 }
 0x1ec   :  { %v1382_v56 = vadd.f32 %v1381_v29, %v1380_v5  ;;  %v938_v31 = vadd.f32 %v937_v63, %v731_v13  ;;  %vm1583_vm1 = vmor %vm1581_vm0, %vm1582_vm14 }
 0x1ed   :  { %v1100_v61 = vpop.f32.mrf.mxu0  ;;  %v1578_v4 = vsub.f32 1.0, %v1577_v20 }
 0x1ee   :  { %v1383_v34 = vrot.slane %v1382_v56, 1  ;;  %v1097_v48 = vadd.f32 %v1096_v16, %v938_v31  ;;  %v1247_v50 = vpop.f32.mrf.mxu1 }
 0x1ef   :  { %v1579_v39 = vmul.f32 %v1718_v7, %v1578_v4 }
 0x1f0   :  { %v1384_v22 = vadd.f32 %v1383_v34, %v1382_v56  ;;  %v1244_v19 = vadd.f32 %v1243_v49, %v1097_v48 }
 0x1f1   :  { %v735_v27 = vpop.f32.mrf.mxu2  ;;  %v1580_v25 = vadd.f32 %v1718_v7, %v1579_v39 }
 0x1f2   :  { %v1418_v58 = vmax.f32 %v1384_v22, 1e-20  ;;  %v1289_v47 = vmul.f32 %v1244_v19, %v1244_v19  ;;  %v736_v15 = vadd.f32 %v735_v27, %v2819_v23  ;;  %v943_v54 = vpop.f32.mrf.mxu3 }
 0x1f3   :  { %v1584_v14 = vsel %vm1583_vm1, %v1718_v7, %v1580_v25 }
 0x1f4   :  { %1719 = vrcp.f32 %v1418_v58  ;;  %v1589_v41 = vsel %vm1586_vm3, %v1588_v57, %v1584_v14  ;;  %v1385_v6 = vadd.f32 %v1289_v47, %v1288_v35  ;;  %v944_v62 = vadd.f32 %v943_v54, %v736_v15 }
 0x1f5   :  { %v1678_v60 = vsel %vm1666_vm2, %v1589_v41, %v1677_v11  ;;  %v1104_v3 = vpop.f32.mrf.mxu0  ;;  %v1601_v8 = vand.u32 2147483648, %v1418_v58  ;;  %v1599_v1 = vand.u32 2147483647, %v1418_v58  ;;  %vm1595_vm4 = vweird.f32 %v1418_v58 }
 0x1f6   :  { %v1386_v46 = vrot.slane %v1385_v6, 4  ;;  %v1251_v42 = vpop.f32.mrf.mxu1  ;;  %v1101_v33 = vadd.f32 %v1100_v61, %v944_v62 }
 0x1f7   :  { %v1602_v49 = vor.u32 1.1754944e-38, %v1601_v8  ;;  %vm1600_vm10 = vcmp.eq.f32.partialorder %v1599_v1, 8.507059e+37 }
 0x1f8   :  { %v1387_v37 = vadd.f32 %v1386_v46, %v1385_v6  ;;  %v1248_v52 = vadd.f32 %v1247_v50, %v1101_v33 }
 0x1f9   :  { %v740_v0 = vpop.f32.mrf.mxu2 }
 0x1fa   :  { %v1720_v30 = vpop.eup %1719  ;;  %v741_v17 = vadd.f32 %v740_v0, %v2820_v9  ;;  %v1388_v55 = vrot.slane %v1387_v37, 2  ;;  %v949_v18 = vpop.f32.mrf.mxu3  ;;  %v1290_v10 = vmul.f32 %v1248_v52, %v1248_v52 }
 0x1fb   :  { %v1591_v28 = vmul.f32 %v1720_v30, %v1418_v58  ;;  %vm1596_vm2 = vweird.f32 %v1720_v30 }
 0x1fc   :  { %v950_v44 = vadd.f32 %v949_v18, %v741_v17  ;;  %v1389_v45 = vadd.f32 %v1388_v55, %v1387_v37  ;;  %vm1597_vm8 = vmor %vm1595_vm4, %vm1596_vm2 }
 0x1fd   :  { %v1592_v32 = vsub.f32 1.0, %v1591_v28  ;;  %v1108_v38 = vpop.f32.mrf.mxu0 }
 0x1fe   :  { %v1105_v26 = vadd.f32 %v1104_v3, %v950_v44  ;;  %v1390_v43 = vrot.slane %v1389_v45, 1  ;;  %v1255_v59 = vpop.f32.mrf.mxu1 }
 0x1ff   :  { %v1593_v2 = vmul.f32 %v1720_v30, %v1592_v32 }
 0x200   :  { %v1252_v40 = vadd.f32 %v1251_v42, %v1105_v26  ;;  %v1391_v11 = vadd.f32 %v1390_v43, %v1389_v45 }
 0x201   :  { %v1594_v21 = vadd.f32 %v1720_v30, %v1593_v2  ;;  %v745_v16 = vpop.f32.mrf.mxu2 }
 0x202   :  { %v1291_v5 = vmul.f32 %v1252_v40, %v1252_v40  ;;  %v1419_v29 = vmax.f32 %v1391_v11, 1e-20  ;;  %v746_v13 = vadd.f32 %v745_v16, %v2821_v36  ;;  %v955_v7 = vpop.f32.mrf.mxu3 }
 0x203   :  { %v1598_v24 = vsel %vm1597_vm8, %v1720_v30, %v1594_v21 }
 0x204   :  { %v1603_v63 = vsel %vm1600_vm10, %v1602_v49, %v1598_v24  ;;  %v1392_v20 = vadd.f32 %v1291_v5, %v1290_v10  ;;  %1721 = vrcp.f32 %v1419_v29  ;;  %v956_v61 = vadd.f32 %v955_v7, %v746_v13 }
 0x205   :  { %v1679_v56 = vsel %vm1668_vm9, %v1603_v63, %v1678_v60  ;;  %v1112_v22 = vpop.f32.mrf.mxu0  ;;  %v1613_v57 = vand.u32 2147483647, %v1419_v29  ;;  %v1615_v35 = vand.u32 2147483648, %v1419_v29  ;;  %vm1609_vm7 = vweird.f32 %v1419_v29 }
 0x206   :  { %v1393_v31 = vrot.slane %v1392_v20, 4  ;;  %v1109_v50 = vadd.f32 %v1108_v38, %v956_v61  ;;  %v1259_v58 = vpop.f32.mrf.mxu1 }
 0x207   :  { %v1616_v3 = vor.u32 1.1754944e-38, %v1615_v35  ;;  %vm1614_vm13 = vcmp.eq.f32.partialorder %v1613_v57, 8.507059e+37 }
 0x208   :  { %v1394_v4 = vadd.f32 %v1393_v31, %v1392_v20  ;;  %v1256_v54 = vadd.f32 %v1255_v59, %v1109_v50 }
 0x209   :  { %v750_v34 = vpop.f32.mrf.mxu2 }
 0x20a   :  { %v1395_v48 = vrot.slane %v1394_v4, 2  ;;  %v751_v53 = vadd.f32 %v750_v34, %v2822_v51  ;;  %v1722_v12 = vpop.eup %1721  ;;  %v961_v39 = vpop.f32.mrf.mxu3  ;;  %v1292_v37 = vmul.f32 %v1256_v54, %v1256_v54 }
 0x20b   :  { %v1605_v19 = vmul.f32 %v1722_v12, %v1419_v29  ;;  %vm1610_vm9 = vweird.f32 %v1722_v12 }
 0x20c   :  { %v1396_v27 = vadd.f32 %v1395_v48, %v1394_v4  ;;  %v962_v25 = vadd.f32 %v961_v39, %v751_v53  ;;  %vm1611_vm12 = vmor %vm1609_vm7, %vm1610_vm9 }
 0x20d   :  { %v1606_v47 = vsub.f32 1.0, %v1605_v19 }
 0x20e   :  { %v1397_v23 = vrot.slane %v1396_v27, 1  ;;  %v1113_v15 = vadd.f32 %v1112_v22, %v962_v25 }
 0x20f   :  { %v1607_v14 = vmul.f32 %v1722_v12, %v1606_v47 }
 0x210   :  { %v1398_v41 = vadd.f32 %v1397_v23, %v1396_v27  ;;  %v1260_v6 = vadd.f32 %v1259_v58, %v1113_v15 }
 0x211   :  { %v1608_v60 = vadd.f32 %v1722_v12, %v1607_v14 }
 0x212   :  { %v1420_v62 = vmax.f32 %v1398_v41, 1e-20  ;;  %v1293_v46 = vmul.f32 %v1260_v6, %v1260_v6 }
 0x213   :  { %v1612_v0 = vsel %vm1611_vm12, %v1722_v12, %v1608_v60 }
 0x214   :  { %1723 = vrcp.f32 %v1420_v62  ;;  %v1617_v42 = vsel %vm1614_vm13, %v1616_v3, %v1612_v0  ;;  %v1399_v30 = vadd.f32 %v1293_v46, %v1292_v37  ;;  %v1629_v45 = vand.u32 2147483648, %v1420_v62 }
 0x215   :  { %v1680_v33 = vsel %vm1670_vm5, %v1617_v42, %v1679_v56  ;;  %v1627_v52 = vand.u32 2147483647, %v1420_v62  ;;  %vm1623_vm14 = vweird.f32 %v1420_v62 }
 0x216   :  { %v1400_v9 = vrot.slane %v1399_v30, 4  ;;  %v1630_v43 = vor.u32 1.1754944e-38, %v1629_v45 }
 0x217   :  { %vm1628_vm1 = vcmp.eq.f32.partialorder %v1627_v52, 8.507059e+37 }
 0x218   :  { %v1401_v17 = vadd.f32 %v1400_v9, %v1399_v30 }
 0x21a   :  { %v1724_v28 = vpop.eup %1723  ;;  %v1402_v18 = vrot.slane %v1401_v17, 2 }
 0x21b   :  { %v1619_v55 = vmul.f32 %v1724_v28, %v1420_v62  ;;  %vm1624_vm15 = vweird.f32 %v1724_v28 }
 0x21c   :  { %v1403_v32 = vadd.f32 %v1402_v18, %v1401_v17  ;;  %vm1625_vm0 = vmor %vm1623_vm14, %vm1624_vm15 }
 0x21d   :  { %v1620_v44 = vsub.f32 1.0, %v1619_v55 }
 0x21e   :  { %v1404_v26 = vrot.slane %v1403_v32, 1 }
 0x21f   :  { %v1621_v8 = vmul.f32 %v1724_v28, %v1620_v44 }
 0x220   :  { %v1405_v1 = vadd.f32 %v1404_v26, %v1403_v32 }
 0x221   :  { %v1622_v2 = vadd.f32 %v1724_v28, %v1621_v8 }
 0x222   :  { %v1421_v21 = vmax.f32 %v1405_v1, 1e-20 }
 0x223   :  { %v1626_v40 = vsel %vm1625_vm0, %v1724_v28, %v1622_v2 }
 0x224   :  { %v1631_v11 = vsel %vm1628_vm1, %v1630_v43, %v1626_v40  ;;  %1725 = vrcp.f32 %v1421_v21  ;;  %v1643_v5 = vand.u32 2147483648, %v1421_v21  ;;  %v1641_v29 = vand.u32 2147483647, %v1421_v21 }
 0x225   :  { %v1681_v16 = vsel %vm1672_vm6, %v1631_v11, %v1680_v33  ;;  %vm1637_vm3 = vweird.f32 %v1421_v21 }
 0x226   :  { %v1644_v13 = vor.u32 1.1754944e-38, %v1643_v5  ;;  %vm1642_vm4 = vcmp.eq.f32.partialorder %v1641_v29, 8.507059e+37 }
 0x22a   :  { %v1726_v38 = vpop.eup %1725 }
 0x22b   :  { %v1633_v49 = vmul.f32 %v1726_v38, %v1421_v21  ;;  %vm1638_vm5 = vweird.f32 %v1726_v38 }
 0x22c   :  { %vm1639_vm2 = vmor %vm1637_vm3, %vm1638_vm5 }
 0x22d   :  { %v1634_v10 = vsub.f32 1.0, %v1633_v49 }
 0x22f   :  { %v1635_v24 = vmul.f32 %v1726_v38, %v1634_v10 }
 0x231   :  { %v1636_v36 = vadd.f32 %v1726_v38, %v1635_v24 }
 0x233   :  { %v1640_v7 = vsel %vm1639_vm2, %v1726_v38, %v1636_v36 }
 0x234   :  { %v1645_v59 = vsel %vm1642_vm4, %v1644_v13, %v1640_v7 }
 0x235   :  { %v1682_v63 = vsel %vm1674_vm11, %v1645_v59, %v1681_v16 }
 0x236   :  { %1686 = vst [vmem:[%s2666_s2 + $0x8] sm:$0xff] %v1682_v63 }

</bundles_post_ra>
